<compile_context>
chip_gen: v5e
topology: v5e:2x2
jax: 0.10.0
libtpu: 0.0.40
codegen_flags: <defaults>
</compile_context>

<pallas_src>
import functools

import jax
import jax.numpy as jnp
import numpy as np
from jax import lax
from jax.experimental import pallas as pl
from jax.experimental.pallas import tpu as pltpu

_HIGHEST = lax.Precision.HIGHEST


# ----------------------------- Pallas kernel --------------------------------
def gat_head_kernel(x_ref, w_ref, a_src_ref, a_dst_ref, adj_ref, bias_ref,
                    out_ref, *, residual):
    # x_ref     : (N, F_in)    node features (dropout = identity in eval)
    # w_ref     : (F_in, F_out) pre-transposed Linear weight
    # a_src_ref : (1, F_out)   first half of attention_linear weight
    # a_dst_ref : (F_out, 1)   second half of attention_linear weight
    # adj_ref   : (N, N)       adj[dst, src] = edge multiplicity (0 if no edge)
    # bias_ref  : (1, F_out)
    # out_ref   : (N, F_out)
    wh = jnp.dot(x_ref[...], w_ref[...],
                 preferred_element_type=jnp.float32, precision=_HIGHEST)       # (N, F_out)

    # Per-node attention projections.
    f_dst = jnp.dot(wh, a_dst_ref[...],
                    preferred_element_type=jnp.float32, precision=_HIGHEST)    # (N, 1)
    # a_src . Wh[src] for every src, produced directly as a (1, N) row via a
    # trans-B matmul (avoids a (N,1)->(1,N) transpose).
    f_src = lax.dot_general(a_src_ref[...], wh, (((1,), (1,)), ((), ())),
                            preferred_element_type=jnp.float32,
                            precision=_HIGHEST)                                # (1, N)

    # Dense pairwise scores + LeakyReLU(0.2):  s[dst, src] = f_dst[dst] + f_src[src]
    s = f_dst + f_src                                                          # (N, N)
    e = jnp.where(s > 0, s, 0.2 * s)

    # Masked softmax over incoming edges of each destination node.
    adj = adj_ref[...]
    has_edge = adj > 0
    neg = jnp.float32(-1e30)
    m = jnp.max(jnp.where(has_edge, e, neg), axis=-1, keepdims=True)           # per-dst max
    z = jnp.where(has_edge, e - m, neg)
    p = adj * jnp.exp(z)                                                       # multiplicity-weighted
    denom = jnp.sum(p, axis=-1, keepdims=True)
    alpha = p / jnp.where(denom > 0, denom, 1.0)   # zero-in-degree nodes -> all-zero row (DGL gives 0)

    # Weighted aggregation of neighbour features.
    h = jnp.dot(alpha, wh, preferred_element_type=jnp.float32, precision=_HIGHEST)
    if residual:
        h = h + wh
    h = h + bias_ref[...]
    # ELU activation (alpha = 1.0)
    out_ref[...] = jnp.where(h > 0, h, jnp.exp(jnp.minimum(h, 0.0)) - 1.0)


def gat_single_head_forward(x, w_t, a_src, a_dst, adj, bias, *, residual=True):
    """x:(N,F_in) w_t:(F_in,F_out) a_src:(1,F_out) a_dst:(F_out,1) adj:(N,N) bias:(1,F_out)."""
    N = x.shape[0]
    F_out = w_t.shape[1]
    vmem = lambda: pl.BlockSpec(memory_space=pltpu.MemorySpace.VMEM)
    return pl.pallas_call(
        functools.partial(gat_head_kernel, residual=residual),
        out_shape=jax.ShapeDtypeStruct((N, F_out), jnp.float32),
        in_specs=[vmem(), vmem(), vmem(), vmem(), vmem(), vmem()],
        out_specs=vmem(),
    )(x, w_t, a_src, a_dst, adj, bias)


# ----------------------------- reference (plain JAX) ------------------------
def gat_single_head_reference(x, w_t, a_src, a_dst, adj, bias, residual=True):
    wh = jnp.dot(x, w_t, precision=_HIGHEST)
    f_dst = jnp.dot(wh, a_dst, precision=_HIGHEST)            # (N, 1)
    f_src = jnp.dot(a_src, wh.T, precision=_HIGHEST)          # (1, N)
    s = f_dst + f_src
    e = jnp.where(s > 0, s, 0.2 * s)
    has_edge = adj > 0
    neg = jnp.float32(-1e30)
    m = jnp.max(jnp.where(has_edge, e, neg), axis=-1, keepdims=True)
    p = adj * jnp.exp(jnp.where(has_edge, e - m, neg))
    denom = jnp.sum(p, axis=-1, keepdims=True)
    alpha = p / jnp.where(denom > 0, denom, 1.0)
    h = jnp.dot(alpha, wh, precision=_HIGHEST)
    if residual:
        h = h + wh
    h = h + bias
    return jnp.where(h > 0, h, jnp.exp(jnp.minimum(h, 0.0)) - 1.0)


# ----------------------------- setup & run -----------------------------------
if __name__ == "__main__":
    N = 128          # number of graph nodes
    F_IN = 64        # in_feats
    F_OUT = 128      # out_feats (lane-dense output width)
    NUM_EDGES = 512
    RESIDUAL = True
    # activation = F.elu; dropout_prob is a no-op in eval mode.
    # TODO(synk): training-mode dropout (in_feats / attention / linear_feats) not implemented.

    key = jax.random.PRNGKey(0)
    k_x, k_src, k_dst, k_w, k_a, k_b = jax.random.split(key, 6)

    # Node features
    x = jax.random.normal(k_x, (N, F_IN), dtype=jnp.float32)

    # Deterministic random graph + self loops (so every node has >= 1 incoming
    # edge, as in standard GAT usage). adj[dst, src] counts edge multiplicity,
    # matching DGL's per-edge mailbox semantics for duplicate edges.
    src = jax.random.randint(k_src, (NUM_EDGES,), 0, N)
    dst = jax.random.randint(k_dst, (NUM_EDGES,), 0, N)
    src = jnp.concatenate([src, jnp.arange(N)])
    dst = jnp.concatenate([dst, jnp.arange(N)])
    adj = jnp.zeros((N, N), jnp.float32).at[dst, src].add(1.0)

    # Xavier-uniform parameters (matching the PyTorch init).
    bw = float(np.sqrt(6.0 / (F_IN + F_OUT)))
    w = jax.random.uniform(k_w, (F_OUT, F_IN), minval=-bw, maxval=bw, dtype=jnp.float32)
    w_t = w.T                                                  # (F_IN, F_OUT): kernel does x @ w_t

    ba = float(np.sqrt(6.0 / (1 + 2 * F_OUT)))
    a = jax.random.uniform(k_a, (1, 2 * F_OUT), minval=-ba, maxval=ba, dtype=jnp.float32)
    a_src = a[:, :F_OUT]                                       # (1, F_OUT)
    a_dst = a[:, F_OUT:].reshape(F_OUT, 1)                     # (F_OUT, 1)

    bb = float(np.sqrt(6.0 / (1 + F_OUT)))
    bias = jax.random.uniform(k_b, (1, F_OUT), minval=-bb, maxval=bb, dtype=jnp.float32)

    out = gat_single_head_forward(x, w_t, a_src, a_dst, adj, bias, residual=RESIDUAL)
    out = jax.block_until_ready(out)

    ref = gat_single_head_reference(x, w_t, a_src, a_dst, adj, bias, residual=RESIDUAL)
    np.testing.assert_allclose(np.asarray(out), np.asarray(ref), rtol=1e-4, atol=1e-4)

    print("KERNEL_OK")
</pallas_src>

<mosaic_0001>
module attributes {stable_mosaic.version = 11 : i64} {
  func.func @gat_head_kernel(%arg0: memref<128x64xf32, #tpu.memory_space<vmem>>, %arg1: memref<64x128xf32, #tpu.memory_space<vmem>>, %arg2: memref<1x128xf32, #tpu.memory_space<vmem>>, %arg3: memref<128x1xf32, #tpu.memory_space<vmem>>, %arg4: memref<128x128xf32, #tpu.memory_space<vmem>>, %arg5: memref<1x128xf32, #tpu.memory_space<vmem>>, %arg6: memref<128x128xf32, #tpu.memory_space<vmem>>) attributes {dimension_semantics = [], scalar_prefetch = 0 : i64, scratch_operands = 0 : i64, tpu.core_type = #tpu.core_type<tc>} {
    %c0 = arith.constant 0 : index
    %c0_0 = arith.constant 0 : index
    %0 = vector.load %arg0[%c0, %c0_0] : memref<128x64xf32, #tpu.memory_space<vmem>>, vector<128x64xf32>
    %c0_1 = arith.constant 0 : index
    %c0_2 = arith.constant 0 : index
    %1 = vector.load %arg1[%c0_1, %c0_2] : memref<64x128xf32, #tpu.memory_space<vmem>>, vector<64x128xf32>
    %cst = arith.constant dense<0.000000e+00> : vector<128x128xf32>
    %2 = tpu.matmul %0, %1, %cst {dimension_numbers = #tpu.dot_dimension_numbers<[1], [0], [0], [1], [0, 0, 1, 1], [], []>, precision = #tpu.contract_precision<fp32>} : vector<128x64xf32>, vector<64x128xf32>, vector<128x128xf32> -> vector<128x128xf32>
    %c0_3 = arith.constant 0 : index
    %c0_4 = arith.constant 0 : index
    %3 = vector.load %arg3[%c0_3, %c0_4] : memref<128x1xf32, #tpu.memory_space<vmem>>, vector<128x1xf32>
    %cst_5 = arith.constant dense<0.000000e+00> : vector<128x1xf32>
    %4 = tpu.matmul %2, %3, %cst_5 {dimension_numbers = #tpu.dot_dimension_numbers<[1], [0], [0], [1], [0, 0, 1, 1], [], []>, precision = #tpu.contract_precision<fp32>} : vector<128x128xf32>, vector<128x1xf32>, vector<128x1xf32> -> vector<128x1xf32>
    %c0_6 = arith.constant 0 : index
    %c0_7 = arith.constant 0 : index
    %5 = vector.load %arg2[%c0_6, %c0_7] : memref<1x128xf32, #tpu.memory_space<vmem>>, vector<1x128xf32>
    %cst_8 = arith.constant dense<0.000000e+00> : vector<1x128xf32>
    %6 = tpu.matmul %5, %2, %cst_8 {dimension_numbers = #tpu.dot_dimension_numbers<[1], [1], [0], [0], [0, 0, 1, 0], [], []>, precision = #tpu.contract_precision<fp32>} : vector<1x128xf32>, vector<128x128xf32>, vector<1x128xf32> -> vector<1x128xf32>
    %7 = vector.broadcast %4 : vector<128x1xf32> to vector<128x128xf32>
    %8 = vector.broadcast %6 : vector<1x128xf32> to vector<128x128xf32>
    %9 = arith.addf %7, %8 : vector<128x128xf32>
    %cst_9 = arith.constant 0.000000e+00 : f32
    %10 = vector.broadcast %cst_9 : f32 to vector<128x128xf32>
    %11 = arith.cmpf ogt, %9, %10 : vector<128x128xf32>
    %cst_10 = arith.constant 2.000000e-01 : f32
    %12 = vector.broadcast %cst_10 : f32 to vector<128x128xf32>
    %13 = arith.mulf %12, %9 : vector<128x128xf32>
    %14 = arith.select %11, %9, %13 : vector<128x128xi1>, vector<128x128xf32>
    %c0_11 = arith.constant 0 : index
    %c0_12 = arith.constant 0 : index
    %15 = vector.load %arg4[%c0_11, %c0_12] : memref<128x128xf32, #tpu.memory_space<vmem>>, vector<128x128xf32>
    %cst_13 = arith.constant 0.000000e+00 : f32
    %16 = vector.broadcast %cst_13 : f32 to vector<128x128xf32>
    %17 = arith.cmpf ogt, %15, %16 : vector<128x128xf32>
    %cst_14 = arith.constant -1.000000e+30 : f32
    %18 = vector.broadcast %cst_14 : f32 to vector<128x128xf32>
    %19 = arith.select %17, %14, %18 : vector<128x128xi1>, vector<128x128xf32>
    %cst_15 = arith.constant dense<0xFF800000> : vector<128xf32>
    %20 = vector.multi_reduction <maximumf>, %19, %cst_15 [1] : vector<128x128xf32> to vector<128xf32>
    %21 = vector.shape_cast %20 : vector<128xf32> to vector<128x1xf32>
    %22 = vector.broadcast %21 : vector<128x1xf32> to vector<128x128xf32>
    %23 = arith.subf %14, %22 : vector<128x128xf32>
    %cst_16 = arith.constant -1.000000e+30 : f32
    %24 = vector.broadcast %cst_16 : f32 to vector<128x128xf32>
    %25 = arith.select %17, %23, %24 : vector<128x128xi1>, vector<128x128xf32>
    %26 = math.exp %25 : vector<128x128xf32>
    %27 = arith.mulf %15, %26 : vector<128x128xf32>
    %cst_17 = arith.constant dense<0.000000e+00> : vector<128xf32>
    %28 = vector.multi_reduction <add>, %27, %cst_17 [1] : vector<128x128xf32> to vector<128xf32>
    %29 = vector.shape_cast %28 : vector<128xf32> to vector<128x1xf32>
    %cst_18 = arith.constant 0.000000e+00 : f32
    %30 = vector.broadcast %cst_18 : f32 to vector<128x1xf32>
    %31 = arith.cmpf ogt, %29, %30 : vector<128x1xf32>
    %cst_19 = arith.constant 1.000000e+00 : f32
    %32 = vector.broadcast %cst_19 : f32 to vector<128x1xf32>
    %33 = arith.select %31, %29, %32 : vector<128x1xi1>, vector<128x1xf32>
    %34 = vector.broadcast %33 : vector<128x1xf32> to vector<128x128xf32>
    %35 = arith.divf %27, %34 : vector<128x128xf32>
    %cst_20 = arith.constant dense<0.000000e+00> : vector<128x128xf32>
    %36 = tpu.matmul %35, %2, %cst_20 {dimension_numbers = #tpu.dot_dimension_numbers<[1], [0], [0], [1], [0, 0, 1, 1], [], []>, precision = #tpu.contract_precision<fp32>} : vector<128x128xf32>, vector<128x128xf32>, vector<128x128xf32> -> vector<128x128xf32>
    %37 = arith.addf %36, %2 : vector<128x128xf32>
    %c0_21 = arith.constant 0 : index
    %c0_22 = arith.constant 0 : index
    %38 = vector.load %arg5[%c0_21, %c0_22] : memref<1x128xf32, #tpu.memory_space<vmem>>, vector<1x128xf32>
    %39 = vector.broadcast %38 : vector<1x128xf32> to vector<128x128xf32>
    %40 = arith.addf %37, %39 : vector<128x128xf32>
    %cst_23 = arith.constant 0.000000e+00 : f32
    %41 = vector.broadcast %cst_23 : f32 to vector<128x128xf32>
    %42 = arith.cmpf ogt, %40, %41 : vector<128x128xf32>
    %cst_24 = arith.constant 0.000000e+00 : f32
    %43 = vector.broadcast %cst_24 : f32 to vector<128x128xf32>
    %44 = arith.minimumf %40, %43 : vector<128x128xf32>
    %45 = math.exp %44 : vector<128x128xf32>
    %cst_25 = arith.constant 1.000000e+00 : f32
    %46 = vector.broadcast %cst_25 : f32 to vector<128x128xf32>
    %47 = arith.subf %45, %46 : vector<128x128xf32>
    %48 = arith.select %42, %40, %47 : vector<128x128xi1>, vector<128x128xf32>
    %c0_26 = arith.constant 0 : index
    %c0_27 = arith.constant 0 : index
    %49 = vector.load %arg6[%c0_26, %c0_27] : memref<128x128xf32, #tpu.memory_space<vmem>>, vector<128x128xf32>
    tpu.vector_store %arg6[%c0_26, %c0_27], %48 {strides = array<i32>} : memref<128x128xf32, #tpu.memory_space<vmem>>, vector<128x128xf32>,
    return
  }
}

</mosaic_0001>

<bundles_post_ra>
// kernel: tpu_custom_call.1
= control target key start
LH: loop header
LB: loop body
LE: loop exit
PB: predicated region body
PF: predicated region fallthrough
CT: control target
= control target key end

     0   :  { %vm48_vm0 = vcmask 523264   ;;  %s5810_s0 = inlined_call_operand.vmem [shape: f32[128,64], index: 0, kind: input, shape index: {}]   ;;  %s5811_s1 = inlined_call_operand.vmem [shape: f32[64,128], index: 1, kind: input, shape index: {}]   ;;  %s5812_s2 = inlined_call_operand.vmem [shape: f32[1,128], index: 2, kind: input, shape index: {}]   ;;  %s5813_s3 = inlined_call_operand.vmem [shape: f32[128,1], index: 3, kind: input, shape index: {}]   ;;  %s5814_s4 = inlined_call_operand.vmem [shape: f32[128,128], index: 4, kind: input, shape index: {}]   ;;  %s5815_s5 = inlined_call_operand.vmem [shape: f32[1,128], index: 5, kind: input, shape index: {}]   ;;  %s5816_s6 = inlined_call_operand.hbm [shape: f32[128,128], index: 6, kind: output, shape index: {}]  }
   0x1   :  { %v47_v0 = vld [vmem:[%s5811_s1 + $0x38] sm:$0xff]  ;;  %v46_v1 = vld [vmem:[%s5811_s1 + $0x30] sm:$0xff]  ;;  %v45_v2 = vld [vmem:[%s5811_s1 + $0x28] sm:$0xff] }
   0x2   :  { %v3738_v3 = vand.u32 4294901760, %v47_v0  ;;  %v3740_v4 = vand.u32 4294901760, %v46_v1  ;;  %v3742_v5 = vand.u32 4294901760, %v45_v2  ;;  %v44_v6 = vld [vmem:[%s5811_s1 + $0x20] sm:$0xff]  ;;  %v43_v7 = vld [vmem:[%s5811_s1 + $0x18] sm:$0xff]  ;;  %v42_v8 = vld [vmem:[%s5811_s1 + $0x10] sm:$0xff] }
   0x3   :  { %v3753_v9 = vand.u32 4294901760, %v44_v6  ;;  %v3755_v10 = vand.u32 4294901760, %v43_v7  ;;  %v3757_v11 = vand.u32 4294901760, %v42_v8  ;;  %v41_v12 = vld [vmem:[%s5811_s1 + $0x8] sm:$0xff]  ;;  %v40_v13 = vld [vmem:[%s5811_s1] sm:$0xff] }
   0x4   :  { %v24_v14 = vld [vmem:[%s5810_s0] sm:$0xff]  ;;  %106 = vmatpush.msra.mxu0 %v3738_v3  ;;  %v3770_v15 = vsub.f32 %v47_v0, %v3738_v3  ;;  %v3773_v16 = vsub.f32 %v46_v1, %v3740_v4  ;;  %v3775_v17 = vand.u32 4294901760, %v41_v12  ;;  %v3778_v18 = vsub.f32 %v45_v2, %v3742_v5  ;;  %3552 = vmatpush.msra.mxu3 %v3738_v3 }
   0x5   :  { %v3781_v19 = vand.u32 4294901760, %v40_v13  ;;  %v3784_v20 = vsub.f32 %v44_v6, %v3753_v9  ;;  %v50_v21 = vsel %vm48_vm0, %v24_v14, 0  ;;  %v3788_v22 = vsub.f32 %v43_v7, %v3755_v10 }
   0x6   :  { %11 = vsyncpa [#allocation3], 0  ;;  %108 = vmatpush.msra.mxu0 %v3740_v4  ;;  %v260_v23 = vand.u32 4294901760, %v3770_v15  ;;  %v266_v24 = vand.u32 4294901760, %v3773_v16  ;;  %v272_v25 = vand.u32 4294901760, %v3778_v18  ;;  %v3794_v26 = vand.u32 4294901760, %v50_v21  ;;  %3544 = vmatpush.msra.mxu2 %v3770_v15 }
   0x7   :  { %v278_v27 = vand.u32 4294901760, %v3784_v20  ;;  %v284_v28 = vand.u32 4294901760, %v3788_v22  ;;  %v3800_v29 = vsub.f32 %v42_v8, %v3757_v11  ;;  %v3803_v30 = vsub.f32 %v41_v12, %v3775_v17  ;;  %3553 = vmatpush.msra.mxu3 %v3740_v4  ;;  %v25_v36 = vld [vmem:[%s5810_s0 + $0x8] sm:$0xff]  ;;  %v26_v37 = vld [vmem:[%s5810_s0 + $0x10] sm:$0xff]  ;;  %v28_v45 = vld [vmem:[%s5810_s0 + $0x20] sm:$0xff]  ;;  %s3516_s8 = sshll.u32 %s5816_s6, 4  ;;  %s3517_s8 = int_to_ptr.hbm [resolvable:$true] %s3516_s8 }
   0x8   :  { %110 = vmatpush.msra.mxu0 %v3742_v5  ;;  %v261_v31 = vsub.f32 %v3770_v15, %v260_v23  ;;  %v267_v32 = vsub.f32 %v3773_v16, %v266_v24  ;;  %v273_v33 = vsub.f32 %v3778_v18, %v272_v25  ;;  %v3817_v34 = vsub.f32 %v50_v21, %v3794_v26  ;;  %v29_v59 = vld [vmem:[%s5810_s0 + $0x28] sm:$0xff]  ;;  %v27_v63 = vld [vmem:[%s5810_s0 + $0x18] sm:$0xff]  ;;  %s3692_s9 = smov 128   ;;  %s3693_s10 = smov 8  }
   0x9   :  { %v279_v35 = vsub.f32 %v3784_v20, %v278_v27  ;;  %3545 = vmatpush.msra.mxu2 %v3773_v16  ;;  %3554 = vmatpush.msra.mxu3 %v3742_v5  ;;  %v290_v41 = vand.u32 4294901760, %v3800_v29  ;;  %v285_v43 = vsub.f32 %v3788_v22, %v284_v28  ;;  %v296_v44 = vand.u32 4294901760, %v3803_v30 }
   0xa   :  { %112 = vmatpush.msra.mxu0 %v3753_v9  ;;  %v262_v38 = vand.u32 4294901760, %v261_v31  ;;  %v268_v39 = vand.u32 4294901760, %v267_v32  ;;  %v123_v40 = vand.u32 4294901760, %v3817_v34  ;;  %v274_v42 = vand.u32 4294901760, %v273_v33 }
   0xb   :  { %3546 = vmatpush.msra.mxu2 %v3778_v18  ;;  %3555 = vmatpush.msra.mxu3 %v3753_v9  ;;  %v3847_v47 = vsub.f32 %v40_v13, %v3781_v19  ;;  %v53_v48 = vsel %vm48_vm0, %v25_v36, 0  ;;  %v56_v49 = vsel %vm48_vm0, %v26_v37, 0  ;;  %v280_v51 = vand.u32 4294901760, %v279_v35  ;;  %v30_v36 = vld [vmem:[%s5810_s0 + $0x30] sm:$0xff] }
   0xc   :  { %114 = vmatpush.msra.mxu0 %v3755_v10  ;;  %263 = vmatpush.msra.mxu1 %v262_v38  ;;  %v124_v46 = vsub.f32 %v3817_v34, %v123_v40  ;;  %v3851_v50 = vand.u32 4294901760, %v53_v48  ;;  %v291_v52 = vsub.f32 %v3800_v29, %v290_v41  ;;  %v62_v54 = vsel %vm48_vm0, %v28_v45, 0 }
   0xd   :  { %3547 = vmatpush.msra.mxu2 %v3784_v20  ;;  %3556 = vmatpush.msra.mxu3 %v3755_v10  ;;  %v302_v53 = vand.u32 4294901760, %v3847_v47  ;;  %v3864_v57 = vand.u32 4294901760, %v56_v49  ;;  %v3867_v58 = vand.u32 4294901760, %v62_v54  ;;  %v286_v60 = vand.u32 4294901760, %v285_v43 }
   0xe   :  { %116 = vmatpush.msra.mxu0 %v3757_v11  ;;  %269 = vmatpush.msra.mxu1 %v268_v39  ;;  %v125_v55 = vand.u32 4294901760, %v124_v46  ;;  %v3862_v56 = vsub.f32 %v53_v48, %v3851_v50  ;;  %v297_v61 = vsub.f32 %v3803_v30, %v296_v44  ;;  %v292_v1 = vand.u32 4294901760, %v291_v52 }
   0xf   :  { %3548 = vmatpush.msra.mxu2 %v3788_v22  ;;  %3557 = vmatpush.msra.mxu3 %v3757_v11  ;;  %v3883_v0 = vsub.f32 %v62_v54, %v3867_v58  ;;  %v303_v2 = vsub.f32 %v3847_v47, %v302_v53  ;;  %v65_v6 = vsel %vm48_vm0, %v29_v59, 0  ;;  %v3895_v8 = vsub.f32 %v56_v49, %v3864_v57  ;;  %v31_v49 = vld [vmem:[%s5810_s0 + $0x38] sm:$0xff] }
  0x10   :  { %118 = vmatpush.msra.mxu0 %v3775_v17  ;;  %275 = vmatpush.msra.mxu1 %v274_v42  ;;  %v131_v62 = vand.u32 4294901760, %v3862_v56  ;;  %v298_v12 = vand.u32 4294901760, %v297_v61  ;;  %v59_v13 = vsel %vm48_vm0, %v27_v63, 0  ;;  %v3903_v21 = vand.u32 4294901760, %v65_v6  ;;  %v32_v61 = vld [vmem:[%s5810_s0 + $0x40] sm:$0xff] }
  0x11   :  { %3549 = vmatpush.msra.mxu2 %v3800_v29  ;;  %3558 = vmatpush.msra.mxu3 %v3775_v17  ;;  %v155_v14 = vand.u32 4294901760, %v3883_v0  ;;  %v304_v31 = vand.u32 4294901760, %v303_v2  ;;  %v139_v33 = vand.u32 4294901760, %v3895_v8  ;;  %v3907_v35 = vand.u32 4294901760, %v59_v13  ;;  %v36_v2 = vld [vmem:[%s5810_s0 + $0x60] sm:$0xff] }
  0x12   :  { %120 = vmatpush.msra.mxu0 %v3781_v19  ;;  %281 = vmatpush.msra.mxu1 %v280_v51  ;;  %v132_v7 = vsub.f32 %v3862_v56, %v131_v62  ;;  %v3915_v37 = vsub.f32 %v65_v6, %v3903_v21  ;;  %v68_v38 = vsel %vm48_vm0, %v30_v36, 0  ;;  %v71_v52 = vsel %vm48_vm0, %v31_v49, 0  ;;  %v38_v49 = vld [vmem:[%s5810_s0 + $0x70] sm:$0xff] }
  0x13   :  { %126 = vmatmul.f32.vlgmr.msra.gmra.mxu0 %v125_v55  ;;  %3550 = vmatpush.msra.mxu2 %v3803_v30  ;;  %v140_v39 = vsub.f32 %v3895_v8, %v139_v33  ;;  %v3924_v42 = vsub.f32 %v59_v13, %v3907_v35  ;;  %v3929_v45 = vand.u32 4294901760, %v68_v38  ;;  %v3951_v59 = vand.u32 4294901760, %v71_v52 }
  0x14   :  { %287 = vmatpush.msra.mxu1 %v286_v60  ;;  %381 = vmatpush.msrb.mxu0 %v3770_v15  ;;  %v133_v32 = vand.u32 4294901760, %v132_v7  ;;  %v163_v43 = vand.u32 4294901760, %v3915_v37  ;;  %v86_v7 = vsel %vm48_vm0, %v36_v2, 0 }
  0x15   :  { %3551 = vmatpush.msra.mxu2 %v3847_v47  ;;  %3559 = vmatpush.msra.mxu3 %v3781_v19  ;;  %v141_v46 = vand.u32 4294901760, %v140_v39  ;;  %v147_v48 = vand.u32 4294901760, %v3924_v42  ;;  %v170_v51 = vsub.f32 %v68_v38, %v3929_v45  ;;  %v178_v15 = vsub.f32 %v71_v52, %v3951_v59 }
  0x16   :  { %293 = vmatpush.msra.mxu1 %v292_v1  ;;  %384 = vmatpush.msrb.mxu0 %v3773_v16  ;;  %v156_v16 = vsub.f32 %v3883_v0, %v155_v14  ;;  %v92_v52 = vsel %vm48_vm0, %v38_v49, 0 }
  0x17   :  { %425 = vmatmul.f32.vlgmr.msra.gmra.mxu2 %v3883_v0  ;;  %535 = vmatmul.f32.vlgmr.msra.gmra.mxu3 %v155_v14  ;;  %v148_v54 = vsub.f32 %v3924_v42, %v147_v48  ;;  %v171_v55 = vand.u32 4294901760, %v170_v51  ;;  %v4018_v14 = vand.u32 4294901760, %v86_v7 }
  0x18   :  { %299 = vmatpush.msra.mxu1 %v298_v12  ;;  %387 = vmatpush.msrb.mxu0 %v3778_v18  ;;  %v179_v18 = vand.u32 4294901760, %v178_v15 }
  0x19   :  { %v149_v60 = vand.u32 4294901760, %v148_v54  ;;  %v218_v36 = vsub.f32 %v86_v7, %v4018_v14 }
  0x1a   :  { %305 = vmatpush.msra.mxu1 %v304_v31  ;;  %390 = vmatpush.msrb.mxu0 %v3784_v20  ;;  %v157_v20 = vand.u32 4294901760, %v156_v16 }
  0x1b   :  { %134 = vmatmul.f32.gmra.mxu0 %v133_v32  ;;  %307 = vmatmul.f32.vlgmr.msra.gmra.mxu1 %v3794_v26  ;;  %v37_v32 = vld [vmem:[%s5810_s0 + $0x68] sm:$0xff]  ;;  %v219_v39 = vand.u32 4294901760, %v218_v36 }
  0x1c   :  { %493 = vmatpush.msrb.mxu1 %v3738_v3  ;;  %393 = vmatpush.msrb.mxu0 %v3788_v22 }
  0x1e   :  { %495 = vmatpush.msrb.mxu1 %v3740_v4  ;;  %396 = vmatpush.msrb.mxu0 %v3800_v29 }
  0x1f   :  { %430 = vmatmul.f32.gmra.mxu2 %v3915_v37  ;;  %541 = vmatmul.f32.gmra.mxu3 %v163_v43 }
  0x20   :  { %497 = vmatpush.msrb.mxu1 %v3742_v5  ;;  %399 = vmatpush.msrb.mxu0 %v3803_v30 }
  0x22   :  { %499 = vmatpush.msrb.mxu1 %v3753_v9  ;;  %402 = vmatpush.msrb.mxu0 %v3847_v47 }
  0x23   :  { %142 = vmatmul.f32.gmra.mxu0 %v141_v46  ;;  %311 = vmatmul.f32.gmra.mxu1 %v3851_v50 }
  0x24   :  { %501 = vmatpush.msrb.mxu1 %v3755_v10  ;;  %616 = vmatpush.msra.mxu0 %v260_v23  ;;  %v74_v23 = vsel %vm48_vm0, %v32_v61, 0 }
  0x26   :  { %503 = vmatpush.msrb.mxu1 %v3757_v11  ;;  %620 = vmatpush.msra.mxu0 %v266_v24  ;;  %v3972_v24 = vand.u32 4294901760, %v74_v23 }
  0x27   :  { %435 = vmatmul.f32.gmra.mxu2 %v170_v51  ;;  %547 = vmatmul.f32.gmra.mxu3 %v171_v55 }
  0x28   :  { %505 = vmatpush.msrb.mxu1 %v3775_v17  ;;  %624 = vmatpush.msra.mxu0 %v272_v25  ;;  %v33_v25 = vld [vmem:[%s5810_s0 + $0x48] sm:$0xff] }
  0x29   :  { %v77_v22 = vsel %vm48_vm0, %v33_v25, 0 }
  0x2a   :  { %507 = vmatpush.msrb.mxu1 %v3781_v19  ;;  %628 = vmatpush.msra.mxu0 %v278_v27  ;;  %v3991_v27 = vand.u32 4294901760, %v77_v22 }
  0x2b   :  { %150 = vmatmul.f32.gmra.mxu0 %v149_v60  ;;  %315 = vmatmul.f32.gmra.mxu1 %v3864_v57  ;;  %v4034_v60 = vand.u32 4294901760, %v92_v52 }
  0x2c   :  { %719 = vmatpush.msra.mxu1 %v3738_v3  ;;  %632 = vmatpush.msra.mxu0 %v284_v28  ;;  %v186_v3 = vsub.f32 %v74_v23, %v3972_v24  ;;  %v194_v29 = vsub.f32 %v77_v22, %v3991_v27 }
  0x2d   :  { %v234_v23 = vsub.f32 %v92_v52, %v4034_v60 }
  0x2e   :  { %721 = vmatpush.msra.mxu1 %v3740_v4  ;;  %636 = vmatpush.msra.mxu0 %v290_v41  ;;  %v164_v4 = vsub.f32 %v3915_v37, %v163_v43  ;;  %v89_v37 = vsel %vm48_vm0, %v37_v32, 0 }
  0x2f   :  { %440 = vmatmul.f32.gmra.mxu2 %v178_v15  ;;  %553 = vmatmul.f32.gmra.mxu3 %v179_v18  ;;  %v4026_v43 = vand.u32 4294901760, %v89_v37 }
  0x30   :  { %723 = vmatpush.msra.mxu1 %v3742_v5  ;;  %640 = vmatpush.msra.mxu0 %v296_v44  ;;  %v187_v5 = vand.u32 4294901760, %v186_v3  ;;  %v165_v28 = vand.u32 4294901760, %v164_v4  ;;  %v220_v4 = vsub.f32 %v218_v36, %v219_v39 }
  0x32   :  { %725 = vmatpush.msra.mxu1 %v3753_v9  ;;  %644 = vmatpush.msra.mxu0 %v302_v53  ;;  %v34_v9 = vld [vmem:[%s5810_s0 + $0x50] sm:$0xff]  ;;  %v188_v12 = vsub.f32 %v186_v3, %v187_v5 }
  0x33   :  { %158 = vmatmul.f32.gmra.mxu0 %v157_v20  ;;  %319 = vmatmul.f32.gmra.mxu1 %v3907_v35  ;;  %v80_v30 = vsel %vm48_vm0, %v34_v9, 0  ;;  %v235_v20 = vand.u32 4294901760, %v234_v23 }
  0x34   :  { %727 = vmatpush.msra.mxu1 %v3755_v10  ;;  %v172_v10 = vsub.f32 %v170_v51, %v171_v55  ;;  %v4002_v41 = vand.u32 4294901760, %v80_v30  ;;  %v189_v31 = vand.u32 4294901760, %v188_v12  ;;  %v226_v51 = vsub.f32 %v89_v37, %v4026_v43 }
  0x36   :  { %729 = vmatpush.msra.mxu1 %v3757_v11  ;;  %v195_v11 = vand.u32 4294901760, %v194_v29  ;;  %v173_v44 = vand.u32 4294901760, %v172_v10  ;;  %v202_v47 = vsub.f32 %v80_v30, %v4002_v41  ;;  %v227_v55 = vand.u32 4294901760, %v226_v51 }
  0x37   :  { %445 = vmatmul.f32.gmra.mxu2 %v186_v3  ;;  %559 = vmatmul.f32.gmra.mxu3 %v187_v5  ;;  %v236_v30 = vsub.f32 %v234_v23, %v235_v20 }
  0x38   :  { %731 = vmatpush.msra.mxu1 %v3775_v17  ;;  %v35_v17 = vld [vmem:[%s5810_s0 + $0x58] sm:$0xff]  ;;  %v203_v63 = vand.u32 4294901760, %v202_v47  ;;  %v196_v38 = vsub.f32 %v194_v29, %v195_v11  ;;  %v228_v9 = vsub.f32 %v226_v51, %v227_v55 }
  0x39   :  { %v83_v53 = vsel %vm48_vm0, %v35_v17, 0  ;;  %v237_v10 = vand.u32 4294901760, %v236_v30  ;;  %v809_v30 = vld [vmem:[%s5813_s3 + $0x50] sm:$0xff] }
  0x3a   :  { %733 = vmatpush.msra.mxu1 %v3781_v19  ;;  %v180_v19 = vsub.f32 %v178_v15, %v179_v18  ;;  %v4010_v0 = vand.u32 4294901760, %v83_v53  ;;  %v197_v46 = vand.u32 4294901760, %v196_v38  ;;  %v204_v54 = vsub.f32 %v202_v47, %v203_v63  ;;  %v39_v15 = vld [vmem:[%s5810_s0 + $0x78] sm:$0xff] }
  0x3b   :  { %166 = vmatmul.f32.gmra.mxu0 %v165_v28  ;;  %323 = vmatmul.f32.gmra.mxu1 %v3867_v58  ;;  %v95_v16 = vsel %vm48_vm0, %v39_v15, 0  ;;  %v221_v28 = vand.u32 4294901760, %v220_v4 }
  0x3c   :  { %v181_v1 = vand.u32 4294901760, %v180_v19  ;;  %v210_v6 = vsub.f32 %v83_v53, %v4010_v0  ;;  %v205_v61 = vand.u32 4294901760, %v204_v54  ;;  %v4042_v25 = vand.u32 4294901760, %v95_v16  ;;  %v811_v54 = vld [vmem:[%s5813_s3 + $0x60] sm:$0xff] }
  0x3e   :  { %v211_v13 = vand.u32 4294901760, %v210_v6  ;;  %v242_v22 = vsub.f32 %v95_v16, %v4042_v25 }
  0x3f   :  { %450 = vmatmul.f32.gmra.mxu2 %v194_v29  ;;  %565 = vmatmul.f32.gmra.mxu3 %v195_v11  ;;  %v229_v29 = vand.u32 4294901760, %v228_v9 }
  0x40   :  { %v212_v18 = vsub.f32 %v210_v6, %v211_v13  ;;  %v243_v5 = vand.u32 4294901760, %v242_v22 }
  0x42   :  { %v213_v3 = vand.u32 4294901760, %v212_v18  ;;  %v244_v11 = vsub.f32 %v242_v22, %v243_v5 }
  0x43   :  { %174 = vmatmul.f32.gmra.mxu0 %v173_v44  ;;  %327 = vmatmul.f32.gmra.mxu1 %v3903_v21 }
  0x44   :  { %v245_v44 = vand.u32 4294901760, %v244_v11  ;;  %v4196_v11 = vand.u32 4294901760, %v809_v30 }
  0x47   :  { %455 = vmatmul.f32.gmra.mxu2 %v202_v47  ;;  %571 = vmatmul.f32.gmra.mxu3 %v203_v63 }
  0x4b   :  { %182 = vmatmul.f32.gmra.mxu0 %v181_v1  ;;  %331 = vmatmul.f32.gmra.mxu1 %v3929_v45 }
  0x4f   :  { %460 = vmatmul.f32.gmra.mxu2 %v210_v6  ;;  %577 = vmatmul.f32.gmra.mxu3 %v211_v13 }
  0x53   :  { %190 = vmatmul.f32.gmra.mxu0 %v189_v31  ;;  %335 = vmatmul.f32.gmra.mxu1 %v3951_v59 }
  0x57   :  { %465 = vmatmul.f32.gmra.mxu2 %v218_v36  ;;  %583 = vmatmul.f32.gmra.mxu3 %v219_v39  ;;  %v812_v39 = vld [vmem:[%s5813_s3 + $0x68] sm:$0xff] }
  0x58   :  { %v4137_v49 = vand.u32 4294901760, %v812_v39 }
  0x5a   :  { %v4143_v52 = vsub.f32 %v812_v39, %v4137_v49 }
  0x5b   :  { %198 = vmatmul.f32.gmra.mxu0 %v197_v46  ;;  %339 = vmatmul.f32.gmra.mxu1 %v3972_v24 }
  0x5f   :  { %470 = vmatmul.f32.gmra.mxu2 %v226_v51  ;;  %589 = vmatmul.f32.gmra.mxu3 %v227_v55  ;;  %v5823_v55 = vand.u32 4294901760, %v4143_v52 }
  0x63   :  { %206 = vmatmul.f32.gmra.mxu0 %v205_v61  ;;  %343 = vmatmul.f32.gmra.mxu1 %v3991_v27  ;;  %v4150_v61 = vand.u32 4294901760, %v811_v54 }
  0x65   :  { %v4163_v16 = vsub.f32 %v811_v54, %v4150_v61 }
  0x67   :  { %475 = vmatmul.f32.gmra.mxu2 %v234_v23  ;;  %595 = vmatmul.f32.gmra.mxu3 %v235_v20  ;;  %v991_v23 = vsub.f32 %v4143_v52, %v5823_v55  ;;  %v5821_v20 = vand.u32 4294901760, %v4163_v16 }
  0x69   :  { %v992_v18 = vand.u32 4294901760, %v991_v23  ;;  %v807_v23 = vld [vmem:[%s5813_s3 + $0x40] sm:$0xff] }
  0x6b   :  { %214 = vmatmul.f32.gmra.mxu0 %v213_v3  ;;  %347 = vmatmul.f32.gmra.mxu1 %v4002_v41  ;;  %v997_v3 = vsub.f32 %v4163_v16, %v5821_v20 }
  0x6f   :  { %480 = vmatmul.f32.gmra.mxu2 %v242_v22  ;;  %601 = vmatmul.f32.gmra.mxu3 %v243_v5  ;;  %v810_v22 = vld [vmem:[%s5813_s3 + $0x58] sm:$0xff]  ;;  %v998_v5 = vand.u32 4294901760, %v997_v3  ;;  %v4228_v3 = vand.u32 4294901760, %v807_v23 }
  0x70   :  { %v4175_v4 = vand.u32 4294901760, %v810_v22 }
  0x73   :  { %222 = vmatmul.f32.gmra.mxu0 %v221_v28  ;;  %351 = vmatmul.f32.gmra.mxu1 %v4010_v0 }
  0x7b   :  { %230 = vmatmul.f32.gmra.mxu0 %v229_v29  ;;  %355 = vmatmul.f32.gmra.mxu1 %v4018_v14 }
  0x83   :  { %238 = vmatmul.f32.gmra.mxu0 %v237_v10  ;;  %359 = vmatmul.f32.gmra.mxu1 %v4026_v43 }
  0x8b   :  { %246 = vmatmul.f32.gmra.mxu0 %v245_v44  ;;  %363 = vmatmul.f32.gmra.mxu1 %v4034_v60 }
  0x90   :  { %v4050_v17 = vpop.f32.mrf.mxu0 }
  0x93   :  { %367 = vmatmul.f32.gmra.mxu1 %v4042_v25  ;;  %405 = vmatmul.f32.vlgmr.msrb.gmra.mxu0 %v3817_v34 }
  0x98   :  { %v4054_v47 = vpop.f32.mrf.mxu0  ;;  %v4056_v53 = vpop.f32.mrf.mxu1 }
  0x9b   :  { %410 = vmatmul.f32.gmra.mxu0 %v3862_v56  ;;  %511 = vmatmul.f32.vlgmr.msrb.gmra.mxu1 %v123_v40 }
  0xa0   :  { %v4061_v19 = vpop.f32.mrf.mxu0  ;;  %v4063_v63 = vpop.f32.mrf.mxu1 }
  0xa3   :  { %415 = vmatmul.f32.gmra.mxu0 %v3895_v8  ;;  %517 = vmatmul.f32.gmra.mxu1 %v131_v62 }
  0xa8   :  { %v4068_v1 = vpop.f32.mrf.mxu0  ;;  %v4070_v2 = vpop.f32.mrf.mxu1 }
  0xab   :  { %420 = vmatmul.f32.gmra.mxu0 %v3924_v42  ;;  %523 = vmatmul.f32.gmra.mxu1 %v139_v33  ;;  %v814_v33 = vld [vmem:[%s5813_s3 + $0x78] sm:$0xff] }
  0xac   :  { %v4097_v42 = vand.u32 4294901760, %v814_v33 }
  0xae   :  { %816 = vmatpush.msrb.mxu2 %v4097_v42  ;;  %1267 = vmatpush.msrb.mxu1 %v4097_v42 }
  0xb0   :  { %v4075_v34 = vpop.f32.mrf.mxu0  ;;  %v4077_v40 = vpop.f32.mrf.mxu1 }
  0xb3   :  { %529 = vmatmul.f32.gmra.mxu1 %v147_v48  ;;  %646 = vmatmul.f32.vlgmr.msra.gmra.mxu0 %v3794_v26 }
  0xb8   :  { %v4082_v56 = vpop.f32.mrf.mxu0  ;;  %v4084_v62 = vpop.f32.mrf.mxu1 }
  0xbb   :  { %650 = vmatmul.f32.gmra.mxu0 %v3851_v50  ;;  %735 = vmatmul.f32.vlgmr.msra.gmra.mxu1 %v3794_v26  ;;  %v4105_v26 = vsub.f32 %v814_v33, %v4097_v42  ;;  %v4200_v33 = vsub.f32 %v809_v30, %v4196_v11  ;;  %v4241_v30 = vsub.f32 %v807_v23, %v4228_v3 }
  0xbd   :  { %v5825_v12 = vand.u32 4294901760, %v4105_v26  ;;  %1139 = vmatpush.msrb.mxu0 %v4105_v26 }
  0xbf   :  { %v979_v13 = vsub.f32 %v4105_v26, %v5825_v12 }
  0xc0   :  { %v4088_v6 = vpop.f32.mrf.mxu0  ;;  %v4090_v8 = vpop.f32.mrf.mxu1 }
  0xc1   :  { %v980_v32 = vand.u32 4294901760, %v979_v13  ;;  %v5819_v13 = vand.u32 4294901760, %v4200_v33 }
  0xc3   :  { %654 = vmatmul.f32.gmra.mxu0 %v3864_v57  ;;  %739 = vmatmul.f32.gmra.mxu1 %v3851_v50  ;;  %v813_v50 = vld [vmem:[%s5813_s3 + $0x70] sm:$0xff]  ;;  %v1009_v39 = vsub.f32 %v4200_v33, %v5819_v13 }
  0xc4   :  { %v4118_v31 = vand.u32 4294901760, %v813_v50  ;;  %981 = vmatpush.msrb.mxu3 %v980_v32  ;;  %v808_v32 = vld [vmem:[%s5813_s3 + $0x48] sm:$0xff] }
  0xc6   :  { %818 = vmatpush.msrb.mxu2 %v4118_v31  ;;  %v4122_v36 = vsub.f32 %v813_v50, %v4118_v31  ;;  %1269 = vmatpush.msrb.mxu1 %v4118_v31 }
  0xc8   :  { %v4099_v48 = vpop.f32.mrf.mxu0  ;;  %v4101_v7 = vpop.f32.mrf.mxu1  ;;  %v5824_v38 = vand.u32 4294901760, %v4122_v36  ;;  %1142 = vmatpush.msrb.mxu0 %v4122_v36  ;;  %820 = vmatpush.msrb.mxu2 %v4137_v49 }
  0xc9   :  { %1271 = vmatpush.msrb.mxu1 %v4137_v49 }
  0xca   :  { %v985_v46 = vsub.f32 %v4122_v36, %v5824_v38  ;;  %1145 = vmatpush.msrb.mxu0 %v4143_v52  ;;  %822 = vmatpush.msrb.mxu2 %v4150_v61 }
  0xcb   :  { %658 = vmatmul.f32.gmra.mxu0 %v3907_v35  ;;  %743 = vmatmul.f32.gmra.mxu1 %v3864_v57 }
  0xcc   :  { %v986_v51 = vand.u32 4294901760, %v985_v46  ;;  %1273 = vmatpush.msrb.mxu1 %v4150_v61  ;;  %1148 = vmatpush.msrb.mxu0 %v4163_v16  ;;  %v4215_v46 = vand.u32 4294901760, %v808_v32 }
  0xcd   :  { %824 = vmatpush.msrb.mxu2 %v4175_v4 }
  0xce   :  { %987 = vmatpush.msrb.mxu3 %v986_v51  ;;  %1275 = vmatpush.msrb.mxu1 %v4175_v4  ;;  %v1010_v51 = vand.u32 4294901760, %v1009_v39  ;;  %v4221_v54 = vsub.f32 %v808_v32, %v4215_v46  ;;  %v806_v39 = vld [vmem:[%s5813_s3 + $0x38] sm:$0xff] }
  0xcf   :  { %826 = vmatpush.msrb.mxu2 %v4196_v11 }
  0xd0   :  { %v4125_v37 = vpop.f32.mrf.mxu0  ;;  %v4127_v57 = vpop.f32.mrf.mxu1  ;;  %993 = vmatpush.msrb.mxu3 %v992_v18  ;;  %1277 = vmatpush.msrb.mxu1 %v4196_v11  ;;  %v5817_v18 = vand.u32 4294901760, %v4221_v54 }
  0xd1   :  { %5858 = vst [vmem:[#allocation5_spill] sm:$0xff] %v4125_v37  ;;  %828 = vmatpush.msrb.mxu2 %v4215_v46 }
  0xd2   :  { %5859 = vst [vmem:[#allocation6_spill] sm:$0xff] %v4127_v57  ;;  %999 = vmatpush.msrb.mxu3 %v998_v5  ;;  %1279 = vmatpush.msrb.mxu1 %v4215_v46  ;;  %v1015_v5 = vsub.f32 %v4221_v54, %v5817_v18  ;;  %v5876_v57 = vand.u32 4294901760, %v4122_v36 }
  0xd3   :  { %662 = vmatmul.f32.gmra.mxu0 %v3867_v58  ;;  %747 = vmatmul.f32.gmra.mxu1 %v3907_v35 }
  0xd4   :  { %830 = vmatpush.msrb.mxu2 %v4228_v3  ;;  %1281 = vmatpush.msrb.mxu1 %v4228_v3 }
  0xd8   :  { %v4153_v35 = vpop.f32.mrf.mxu0  ;;  %v4155_v15 = vpop.f32.mrf.mxu1 }
  0xd9   :  { %5860 = vst [vmem:[#allocation7_spill] sm:$0xff] %v4153_v35 }
  0xda   :  { %5861 = vst [vmem:[#allocation8_spill] sm:$0xff] %v4155_v15 }
  0xdb   :  { %666 = vmatmul.f32.gmra.mxu0 %v3903_v21  ;;  %751 = vmatmul.f32.gmra.mxu1 %v3867_v58  ;;  %v4183_v58 = vsub.f32 %v810_v22, %v4175_v4 }
  0xdd   :  { %v5820_v29 = vand.u32 4294901760, %v4183_v58  ;;  %1151 = vmatpush.msrb.mxu0 %v4183_v58 }
  0xdf   :  { %v1003_v10 = vsub.f32 %v4183_v58, %v5820_v29  ;;  %1154 = vmatpush.msrb.mxu0 %v4200_v33 }
  0xe0   :  { %v4177_v28 = vpop.f32.mrf.mxu0  ;;  %v4179_v9 = vpop.f32.mrf.mxu1 }
  0xe1   :  { %5862 = vst [vmem:[#allocation9_spill] sm:$0xff] %v4177_v28  ;;  %v1004_v44 = vand.u32 4294901760, %v1003_v10  ;;  %1157 = vmatpush.msrb.mxu0 %v4221_v54  ;;  %v1016_v10 = vand.u32 4294901760, %v1015_v5 }
  0xe2   :  { %5863 = vst [vmem:[#allocation10_spill] sm:$0xff] %v4179_v9 }
  0xe3   :  { %670 = vmatmul.f32.gmra.mxu0 %v3929_v45  ;;  %755 = vmatmul.f32.gmra.mxu1 %v3903_v21 }
  0xe4   :  { %1005 = vmatpush.msrb.mxu3 %v1004_v44  ;;  %v5818_v44 = vand.u32 4294901760, %v4241_v30  ;;  %1160 = vmatpush.msrb.mxu0 %v4241_v30 }
  0xe6   :  { %1011 = vmatpush.msrb.mxu3 %v1010_v51  ;;  %v1021_v32 = vsub.f32 %v4241_v30, %v5818_v44  ;;  %v4253_v51 = vand.u32 4294901760, %v806_v39 }
  0xe8   :  { %v4203_v50 = vpop.f32.mrf.mxu0  ;;  %v4205_v21 = vpop.f32.mrf.mxu1  ;;  %1017 = vmatpush.msrb.mxu3 %v1016_v10  ;;  %v1022_v23 = vand.u32 4294901760, %v1021_v32  ;;  %832 = vmatpush.msrb.mxu2 %v4253_v51  ;;  %v805_v32 = vld [vmem:[%s5813_s3 + $0x30] sm:$0xff] }
  0xe9   :  { %5864 = vst [vmem:[#allocation11_spill] sm:$0xff] %v4203_v50  ;;  %1283 = vmatpush.msrb.mxu1 %v4253_v51  ;;  %v4274_v44 = vand.u32 4294901760, %v805_v32 }
  0xea   :  { %5865 = vst [vmem:[#allocation12_spill] sm:$0xff] %v4205_v21  ;;  %1023 = vmatpush.msrb.mxu3 %v1022_v23 }
  0xeb   :  { %674 = vmatmul.f32.gmra.mxu0 %v3951_v59  ;;  %759 = vmatmul.f32.gmra.mxu1 %v3929_v45  ;;  %v4278_v23 = vsub.f32 %v805_v32, %v4274_v44 }
  0xec   :  { %834 = vmatpush.msrb.mxu2 %v4274_v44  ;;  %1285 = vmatpush.msrb.mxu1 %v4274_v44 }
  0xed   :  { %v5826_v20 = vand.u32 4294901760, %v4278_v23 }
  0xef   :  { %v1033_v32 = vsub.f32 %v4278_v23, %v5826_v20 }
  0xf0   :  { %v4231_v45 = vpop.f32.mrf.mxu0  ;;  %v4233_v22 = vpop.f32.mrf.mxu1 }
  0xf1   :  { %5866 = vst [vmem:[#allocation13_spill] sm:$0xff] %v4231_v45  ;;  %v1034_v55 = vand.u32 4294901760, %v1033_v32 }
  0xf2   :  { %5867 = vst [vmem:[#allocation14_spill] sm:$0xff] %v4233_v22 }
  0xf3   :  { %678 = vmatmul.f32.gmra.mxu0 %v3972_v24  ;;  %763 = vmatmul.f32.gmra.mxu1 %v3951_v59  ;;  %v4261_v59 = vsub.f32 %v806_v39, %v4253_v51 }
  0xf5   :  { %v5822_v10 = vand.u32 4294901760, %v4261_v59  ;;  %1163 = vmatpush.msrb.mxu0 %v4261_v59 }
  0xf7   :  { %v1027_v39 = vsub.f32 %v4261_v59, %v5822_v10  ;;  %1166 = vmatpush.msrb.mxu0 %v4278_v23 }
  0xf8   :  { %v4255_v5 = vpop.f32.mrf.mxu0  ;;  %v4257_v18 = vpop.f32.mrf.mxu1 }
  0xf9   :  { %5868 = vst [vmem:[#allocation15_spill] sm:$0xff] %v4255_v5  ;;  %v1028_v13 = vand.u32 4294901760, %v1027_v39  ;;  %v804_v39 = vld [vmem:[%s5813_s3 + $0x28] sm:$0xff] }
  0xfa   :  { %5869 = vst [vmem:[#allocation16_spill] sm:$0xff] %v4257_v18  ;;  %v4293_v10 = vand.u32 4294901760, %v804_v39  ;;  %v800_v5 = vld [vmem:[%s5813_s3 + $0x8] sm:$0xff] }
  0xfb   :  { %682 = vmatmul.f32.gmra.mxu0 %v3991_v27  ;;  %767 = vmatmul.f32.gmra.mxu1 %v3972_v24  ;;  %v4356_v22 = vand.u32 4294901760, %v800_v5 }
  0xfc   :  { %1029 = vmatpush.msrb.mxu3 %v1028_v13  ;;  %v803_v13 = vld [vmem:[%s5813_s3 + $0x20] sm:$0xff]  ;;  %836 = vmatpush.msrb.mxu2 %v4293_v10  ;;  %v4302_v38 = vsub.f32 %v804_v39, %v4293_v10 }
  0xfd   :  { %v4304_v12 = vand.u32 4294901760, %v803_v13  ;;  %1287 = vmatpush.msrb.mxu1 %v4293_v10 }
  0xfe   :  { %1035 = vmatpush.msrb.mxu3 %v1034_v55  ;;  %v5827_v20 = vand.u32 4294901760, %v4302_v38  ;;  %1169 = vmatpush.msrb.mxu0 %v4302_v38 }
  0xff   :  { %838 = vmatpush.msrb.mxu2 %v4304_v12  ;;  %1289 = vmatpush.msrb.mxu1 %v4304_v12 }
 0x100   :  { %v4281_v29 = vpop.f32.mrf.mxu0  ;;  %v4283_v24 = vpop.f32.mrf.mxu1  ;;  %v1039_v39 = vsub.f32 %v4302_v38, %v5827_v20 }
 0x101   :  { %5870 = vst [vmem:[#allocation17_spill] sm:$0xff] %v4281_v29  ;;  %v4319_v29 = vsub.f32 %v803_v13, %v4304_v12 }
 0x102   :  { %5871 = vst [vmem:[#allocation18_spill] sm:$0xff] %v4283_v24  ;;  %v1040_v55 = vand.u32 4294901760, %v1039_v39  ;;  %v801_v39 = vld [vmem:[%s5813_s3 + $0x10] sm:$0xff] }
 0x103   :  { %686 = vmatmul.f32.gmra.mxu0 %v4002_v41  ;;  %771 = vmatmul.f32.gmra.mxu1 %v3991_v27  ;;  %v5828_v24 = vand.u32 4294901760, %v4319_v29  ;;  %v4340_v20 = vand.u32 4294901760, %v801_v39 }
 0x104   :  { %1041 = vmatpush.msrb.mxu3 %v1040_v55  ;;  %1172 = vmatpush.msrb.mxu0 %v4319_v29 }
 0x105   :  { %v1045_v13 = vsub.f32 %v4319_v29, %v5828_v24 }
 0x107   :  { %v1046_v55 = vand.u32 4294901760, %v1045_v13  ;;  %v799_v13 = vld [vmem:[%s5813_s3] sm:$0xff] }
 0x108   :  { %v4311_v27 = vpop.f32.mrf.mxu0  ;;  %v4313_v32 = vpop.f32.mrf.mxu1 }
 0x109   :  { %5872 = vst [vmem:[#allocation19_spill] sm:$0xff] %v4311_v27  ;;  %v802_v27 = vld [vmem:[%s5813_s3 + $0x18] sm:$0xff]  ;;  %1047 = vmatpush.msrb.mxu3 %v1046_v55  ;;  %v4371_v55 = vand.u32 4294901760, %v799_v13 }
 0x10a   :  { %5873 = vst [vmem:[#allocation20_spill] sm:$0xff] %v4313_v32  ;;  %v4327_v32 = vand.u32 4294901760, %v802_v27 }
 0x10b   :  { %690 = vmatmul.f32.gmra.mxu0 %v4010_v0  ;;  %775 = vmatmul.f32.gmra.mxu1 %v4002_v41  ;;  %v1067_v9 = vsub.f32 %v799_v13, %v4371_v55 }
 0x10c   :  { %840 = vmatpush.msrb.mxu2 %v4327_v32  ;;  %v4338_v41 = vsub.f32 %v802_v27, %v4327_v32  ;;  %1291 = vmatpush.msrb.mxu1 %v4327_v32  ;;  %v4353_v27 = vsub.f32 %v801_v39, %v4340_v20  ;;  %v4368_v39 = vsub.f32 %v800_v5, %v4356_v22 }
 0x10e   :  { %v5829_v45 = vand.u32 4294901760, %v4338_v41  ;;  %842 = vmatpush.msrb.mxu2 %v4340_v20  ;;  %1175 = vmatpush.msrb.mxu0 %v4338_v41  ;;  %v5830_v50 = vand.u32 4294901760, %v4353_v27  ;;  %v1062_v28 = vand.u32 4294901760, %v4368_v39 }
 0x10f   :  { %1293 = vmatpush.msrb.mxu1 %v4340_v20 }
 0x110   :  { %v4346_v18 = vpop.f32.mrf.mxu1  ;;  %v4348_v24 = vpop.f32.mrf.mxu0  ;;  %844 = vmatpush.msrb.mxu2 %v4356_v22  ;;  %1178 = vmatpush.msrb.mxu0 %v4353_v27  ;;  %v1063_v35 = vsub.f32 %v4368_v39, %v1062_v28 }
 0x111   :  { %5874 = vst [vmem:[#allocation21_spill] sm:$0xff] %v4346_v18  ;;  %v1051_v18 = vsub.f32 %v4338_v41, %v5829_v45  ;;  %v1057_v45 = vsub.f32 %v4353_v27, %v5830_v50  ;;  %1295 = vmatpush.msrb.mxu1 %v4356_v22 }
 0x112   :  { %1181 = vmatpush.msrb.mxu0 %v4368_v39  ;;  %846 = vmatpush.msrb.mxu2 %v4371_v55  ;;  %v1064_v13 = vand.u32 4294901760, %v1063_v35 }
 0x113   :  { %694 = vmatmul.f32.gmra.mxu0 %v4018_v14  ;;  %779 = vmatmul.f32.gmra.mxu1 %v4010_v0  ;;  %v1052_v21 = vand.u32 4294901760, %v1051_v18  ;;  %v1058_v5 = vand.u32 4294901760, %v1057_v45  ;;  %v1068_v0 = vand.u32 4294901760, %v1067_v9  ;;  %v5875_v18 = vand.u32 4294901760, %v4105_v26 }
 0x114   :  { %1184 = vmatpush.msrb.mxu0 %v1067_v9  ;;  %1297 = vmatpush.msrb.mxu1 %v4371_v55  ;;  %v5877_v45 = vand.u32 4294901760, %v4143_v52  ;;  %v5878_v26 = vand.u32 4294901760, %v4163_v16  ;;  %v5883_v52 = vand.u32 4294901760, %v4261_v59  ;;  %v5886_v16 = vand.u32 4294901760, %v4319_v29 }
 0x115   :  { %1053 = vmatpush.msrb.mxu3 %v1052_v21  ;;  %1398 = vmatpush.msra.mxu2 %v5875_v18  ;;  %v1069_v37 = vsub.f32 %v1067_v9, %v1068_v0 }
 0x117   :  { %1059 = vmatpush.msrb.mxu3 %v1058_v5  ;;  %1402 = vmatpush.msra.mxu2 %v5876_v57  ;;  %v1070_v21 = vand.u32 4294901760, %v1069_v37  ;;  %v5879_v57 = vand.u32 4294901760, %v4183_v58  ;;  %v5887_v58 = vand.u32 4294901760, %v4338_v41  ;;  %v321_v5 = vadd.f32 %v4077_v40, %v4068_v1 }
 0x118   :  { %v411_v50 = vpop.f32.mrf.mxu0  ;;  %v512_v15 = vpop.f32.mrf.mxu1 }
 0x119   :  { %1065 = vmatpush.msrb.mxu3 %v1064_v13  ;;  %1406 = vmatpush.msra.mxu2 %v5877_v45 }
 0x11b   :  { %698 = vmatmul.f32.gmra.mxu0 %v4026_v43  ;;  %783 = vmatmul.f32.gmra.mxu1 %v4018_v14  ;;  %v5880_v14 = vand.u32 4294901760, %v4200_v33  ;;  %v426_v33 = vpop.f32.mrf.mxu2 }
 0x11c   :  { %1071 = vmatpush.msrb.mxu3 %v1070_v21  ;;  %1410 = vmatpush.msra.mxu2 %v5878_v26 }
 0x11e   :  { %1525 = vmatpush.msra.mxu3 %v4097_v42  ;;  %1414 = vmatpush.msra.mxu2 %v5879_v57  ;;  %v5881_v42 = vand.u32 4294901760, %v4221_v54 }
 0x120   :  { %1527 = vmatpush.msra.mxu3 %v4118_v31  ;;  %v416_v35 = vpop.f32.mrf.mxu0  ;;  %v518_v36 = vpop.f32.mrf.mxu1  ;;  %1418 = vmatpush.msra.mxu2 %v5880_v14  ;;  %v5882_v31 = vand.u32 4294901760, %v4241_v30 }
 0x122   :  { %1529 = vmatpush.msra.mxu3 %v4137_v49  ;;  %1422 = vmatpush.msra.mxu2 %v5881_v42 }
 0x123   :  { %702 = vmatmul.f32.gmra.mxu0 %v4034_v60  ;;  %787 = vmatmul.f32.gmra.mxu1 %v4026_v43  ;;  %v5884_v43 = vand.u32 4294901760, %v4278_v23 }
 0x124   :  { %1531 = vmatpush.msra.mxu3 %v4150_v61  ;;  %1426 = vmatpush.msra.mxu2 %v5882_v31  ;;  %v5885_v61 = vand.u32 4294901760, %v4302_v38  ;;  %v5888_v38 = vand.u32 4294901760, %v4353_v27 }
 0x126   :  { %1533 = vmatpush.msra.mxu3 %v4175_v4  ;;  %1430 = vmatpush.msra.mxu2 %v5883_v52 }
 0x128   :  { %v4410_v37 = vpop.f32.mrf.mxu0  ;;  %v524_v49 = vpop.f32.mrf.mxu1  ;;  %1535 = vmatpush.msra.mxu3 %v4196_v11  ;;  %1434 = vmatpush.msra.mxu2 %v5884_v43 }
 0x129   :  { %v422_v21 = vadd.f32 %v4410_v37, %v321_v5 }
 0x12a   :  { %1537 = vmatpush.msra.mxu3 %v4215_v46  ;;  %1438 = vmatpush.msra.mxu2 %v5885_v61  ;;  %v329_v61 = vadd.f32 %v4090_v8, %v4082_v56 }
 0x12b   :  { %706 = vmatmul.f32.gmra.mxu0 %v4042_v25  ;;  %791 = vmatmul.f32.gmra.mxu1 %v4034_v60  ;;  %v309_v60 = vadd.f32 %v4056_v53, %v4050_v17  ;;  %v313_v53 = vadd.f32 %v4063_v63, %v4054_v47 }
 0x12c   :  { %1539 = vmatpush.msra.mxu3 %v4228_v3  ;;  %1442 = vmatpush.msra.mxu2 %v5886_v16 }
 0x12d   :  { %v407_v11 = vadd.f32 %v4348_v24, %v309_v60 }
 0x12e   :  { %1541 = vmatpush.msra.mxu3 %v4253_v51  ;;  %1446 = vmatpush.msra.mxu2 %v5887_v58 }
 0x12f   :  { %v513_v29 = vadd.f32 %v512_v15, %v407_v11 }
 0x130   :  { %v530_v4 = vpop.f32.mrf.mxu1  ;;  %v647_v9 = vpop.f32.mrf.mxu0  ;;  %1543 = vmatpush.msra.mxu3 %v4274_v44  ;;  %1450 = vmatpush.msra.mxu2 %v5888_v38 }
 0x131   :  { %v648_v46 = vadd.f32 %v647_v9, %v513_v29  ;;  %v431_v44 = vpop.f32.mrf.mxu2 }
 0x132   :  { %1545 = vmatpush.msra.mxu3 %v4293_v10  ;;  %1454 = vmatpush.msra.mxu2 %v1062_v28  ;;  %v432_v11 = vadd.f32 %v431_v44, %v329_v61 }
 0x133   :  { %795 = vmatmul.f32.gmra.mxu1 %v4042_v25  ;;  %v536_v25 = vpop.f32.mrf.mxu3 }
 0x134   :  { %1547 = vmatpush.msra.mxu3 %v4304_v12  ;;  %1458 = vmatpush.msra.mxu2 %v1068_v0  ;;  %v412_v12 = vadd.f32 %v411_v50, %v313_v53 }
 0x136   :  { %1549 = vmatpush.msra.mxu3 %v4327_v32  ;;  %v519_v28 = vadd.f32 %v518_v36, %v412_v12  ;;  %v531_v36 = vadd.f32 %v530_v4, %v422_v21 }
 0x138   :  { %v651_v54 = vpop.f32.mrf.mxu0  ;;  %v736_v17 = vpop.f32.mrf.mxu1  ;;  %1551 = vmatpush.msra.mxu3 %v4340_v20 }
 0x139   :  { %v4441_v3 = vadd.f32 %v736_v17, %v648_v46  ;;  %v652_v20 = vadd.f32 %v651_v54, %v519_v28  ;;  %v436_v13 = vpop.f32.mrf.mxu2  ;;  %v333_v17 = vadd.f32 %v4101_v7, %v4088_v6 }
 0x13a   :  { %1553 = vmatpush.msra.mxu3 %v4356_v22  ;;  %v317_v22 = vadd.f32 %v4070_v2, %v4061_v19 }
 0x13b   :  { %5889 = vst [vmem:[#allocation22_spill] sm:$0xff] %v4441_v3  ;;  %v4445_v15 = vand.u32 4294901760, %v4441_v3  ;;  %v542_v32 = vpop.f32.mrf.mxu3 }
 0x13c   :  { %1555 = vmatpush.msra.mxu3 %v4371_v55  ;;  %v417_v10 = vadd.f32 %v416_v35, %v317_v22  ;;  %v325_v35 = vadd.f32 %v4084_v62, %v4075_v34  ;;  %v543_v54 = vadd.f32 %v542_v32, %v432_v11  ;;  %v5899_v32 = vld [vmem:[#allocation6_spill] sm:$0xff] }
 0x13d   :  { %v4450_v30 = vsub.f32 %v4441_v3, %v4445_v15  ;;  %1073 = vmatmul.f32.vlgmr.msrb.gmra.mxu3 %v4445_v15 }
 0x13e   :  { %v525_v41 = vadd.f32 %v524_v49, %v417_v10  ;;  %v427_v37 = vadd.f32 %v426_v33, %v325_v35 }
 0x13f   :  { %1187 = vmatmul.f32.vlgmr.msrb.gmra.mxu0 %v4450_v30  ;;  %v4455_v47 = vand.u32 4294901760, %v4450_v30 }
 0x140   :  { %v655_v63 = vpop.f32.mrf.mxu0  ;;  %v740_v50 = vpop.f32.mrf.mxu1  ;;  %v537_v43 = vadd.f32 %v536_v25, %v427_v37 }
 0x141   :  { %5890 = vst [vmem:[#allocation23_spill] sm:$0xff] %v4455_v47  ;;  %v4459_v51 = vadd.f32 %v740_v50, %v652_v20  ;;  %1301 = vmatmul.f32.vlgmr.msrb.gmra.mxu1 %v4455_v47  ;;  %v850_v59 = vsub.f32 %v4450_v30, %v4455_v47  ;;  %v656_v19 = vadd.f32 %v655_v63, %v525_v41  ;;  %v441_v16 = vpop.f32.mrf.mxu2  ;;  %v5923_v47 = vld [vmem:[#allocation21_spill] sm:$0xff] }
 0x142   :  { %v437_v50 = vadd.f32 %v436_v13, %v333_v17  ;;  %v337_v41 = vadd.f32 %v5899_v32, %v4099_v48 }
 0x143   :  { %5891 = vst [vmem:[#allocation24_spill] sm:$0xff] %v4459_v51  ;;  %v4465_v23 = vand.u32 4294901760, %v4459_v51  ;;  %v4467_v24 = vand.u32 4294901760, %v850_v59  ;;  %v548_v40 = vpop.f32.mrf.mxu3 }
 0x144   :  { %v549_v10 = vadd.f32 %v548_v40, %v437_v50  ;;  %v442_v13 = vadd.f32 %v441_v16, %v337_v41 }
 0x145   :  { %v4471_v27 = vsub.f32 %v4459_v51, %v4465_v23  ;;  %852 = vmatmul.f32.vlgmr.msrb.gmra.mxu2 %v4467_v24  ;;  %1077 = vmatmul.f32.gmra.mxu3 %v4465_v23 }
 0x147   :  { %1192 = vmatmul.f32.gmra.mxu0 %v4471_v27  ;;  %v4477_v2 = vand.u32 4294901760, %v4471_v27 }
 0x148   :  { %v659_v39 = vpop.f32.mrf.mxu0  ;;  %v744_v55 = vpop.f32.mrf.mxu1 }
 0x149   :  { %5892 = vst [vmem:[#allocation25_spill] sm:$0xff] %v4477_v2  ;;  %v4481_v0 = vadd.f32 %v744_v55, %v656_v19  ;;  %1307 = vmatmul.f32.gmra.mxu1 %v4477_v2  ;;  %v858_v18 = vsub.f32 %v4471_v27, %v4477_v2  ;;  %v660_v57 = vadd.f32 %v659_v39, %v531_v36  ;;  %v446_v25 = vpop.f32.mrf.mxu2 }
 0x14b   :  { %5893 = vst [vmem:[#allocation26_spill] sm:$0xff] %v4481_v0  ;;  %v4488_v45 = vand.u32 4294901760, %v4481_v0  ;;  %v4490_v26 = vand.u32 4294901760, %v858_v18  ;;  %v554_v29 = vpop.f32.mrf.mxu3 }
 0x14d   :  { %v4496_v1 = vsub.f32 %v4481_v0, %v4488_v45  ;;  %860 = vmatmul.f32.gmra.mxu2 %v4490_v26  ;;  %1081 = vmatmul.f32.gmra.mxu3 %v4488_v45 }
 0x14f   :  { %1197 = vmatmul.f32.gmra.mxu0 %v4496_v1  ;;  %v4502_v14 = vand.u32 4294901760, %v4496_v1 }
 0x150   :  { %v663_v42 = vpop.f32.mrf.mxu0  ;;  %v748_v31 = vpop.f32.mrf.mxu1 }
 0x151   :  { %5894 = vst [vmem:[#allocation27_spill] sm:$0xff] %v4502_v14  ;;  %v4504_v34 = vadd.f32 %v748_v31, %v660_v57  ;;  %1313 = vmatmul.f32.gmra.mxu1 %v4502_v14  ;;  %v866_v62 = vsub.f32 %v4496_v1, %v4502_v14  ;;  %v664_v9 = vadd.f32 %v663_v42, %v537_v43  ;;  %v451_v21 = vpop.f32.mrf.mxu2  ;;  %v5901_v42 = vld [vmem:[#allocation5_spill] sm:$0xff]  ;;  %v5902_v31 = vld [vmem:[#allocation8_spill] sm:$0xff] }
 0x152   :  { %v555_v57 = vadd.f32 %v554_v29, %v442_v13  ;;  %v341_v37 = vadd.f32 %v5902_v31, %v5901_v42  ;;  %v5907_v42 = vld [vmem:[#allocation9_spill] sm:$0xff]  ;;  %v5908_v31 = vld [vmem:[#allocation12_spill] sm:$0xff] }
 0x153   :  { %5895 = vst [vmem:[#allocation28_spill] sm:$0xff] %v4504_v34  ;;  %v4510_v49 = vand.u32 4294901760, %v4504_v34  ;;  %v4512_v52 = vand.u32 4294901760, %v866_v62  ;;  %v560_v7 = vpop.f32.mrf.mxu3 }
 0x155   :  { %v4518_v4 = vsub.f32 %v4504_v34, %v4510_v49  ;;  %868 = vmatmul.f32.gmra.mxu2 %v4512_v52  ;;  %1085 = vmatmul.f32.gmra.mxu3 %v4510_v49  ;;  %v5917_v34 = vld [vmem:[#allocation18_spill] sm:$0xff] }
 0x157   :  { %1202 = vmatmul.f32.gmra.mxu0 %v4518_v4  ;;  %v4524_v58 = vand.u32 4294901760, %v4518_v4 }
 0x158   :  { %v667_v60 = vpop.f32.mrf.mxu0  ;;  %v752_v38 = vpop.f32.mrf.mxu1 }
 0x159   :  { %5896 = vst [vmem:[#allocation29_spill] sm:$0xff] %v4524_v58  ;;  %v4526_v56 = vadd.f32 %v752_v38, %v664_v9  ;;  %1319 = vmatmul.f32.gmra.mxu1 %v4524_v58  ;;  %v874_v8 = vsub.f32 %v4518_v4, %v4524_v58  ;;  %v668_v12 = vadd.f32 %v667_v60, %v543_v54 }
 0x15a   :  { %v447_v38 = vadd.f32 %v446_v25, %v341_v37  ;;  %v349_v37 = vadd.f32 %v5908_v31, %v5907_v42 }
 0x15b   :  { %5897 = vst [vmem:[#allocation30_spill] sm:$0xff] %v4526_v56  ;;  %v4532_v33 = vand.u32 4294901760, %v4526_v56  ;;  %v4534_v46 = vand.u32 4294901760, %v874_v8  ;;  %v566_v62 = vpop.f32.mrf.mxu3  ;;  %v456_v8 = vpop.f32.mrf.mxu2 }
 0x15d   :  { %v4540_v53 = vsub.f32 %v4526_v56, %v4532_v33  ;;  %876 = vmatmul.f32.gmra.mxu2 %v4534_v46  ;;  %1089 = vmatmul.f32.gmra.mxu3 %v4532_v33  ;;  %v5916_v56 = vld [vmem:[#allocation15_spill] sm:$0xff] }
 0x15e   :  { %v361_v0 = vadd.f32 %v5917_v34, %v5916_v56 }
 0x15f   :  { %1207 = vmatmul.f32.gmra.mxu0 %v4540_v53  ;;  %v4546_v28 = vand.u32 4294901760, %v4540_v53 }
 0x160   :  { %v671_v20 = vpop.f32.mrf.mxu0  ;;  %v756_v63 = vpop.f32.mrf.mxu1 }
 0x161   :  { %v4548_v22 = vadd.f32 %v756_v63, %v668_v12  ;;  %1325 = vmatmul.f32.gmra.mxu1 %v4546_v28  ;;  %v882_v6 = vsub.f32 %v4540_v53, %v4546_v28  ;;  %v672_v39 = vadd.f32 %v671_v20, %v549_v10  ;;  %v561_v12 = vadd.f32 %v560_v7, %v447_v38  ;;  %v5904_v20 = vld [vmem:[#allocation7_spill] sm:$0xff]  ;;  %v5905_v63 = vld [vmem:[#allocation10_spill] sm:$0xff] }
 0x162   :  { %v345_v50 = vadd.f32 %v5905_v63, %v5904_v20 }
 0x163   :  { %5898 = vst [vmem:[#allocation31_spill] sm:$0xff] %v4548_v22  ;;  %v4554_v44 = vand.u32 4294901760, %v4548_v22  ;;  %v4556_v59 = vand.u32 4294901760, %v882_v6  ;;  %v572_v6 = vpop.f32.mrf.mxu3 }
 0x165   :  { %v4562_v19 = vsub.f32 %v4548_v22, %v4554_v44  ;;  %884 = vmatmul.f32.gmra.mxu2 %v4556_v59  ;;  %1093 = vmatmul.f32.gmra.mxu3 %v4554_v44 }
 0x167   :  { %1212 = vmatmul.f32.gmra.mxu0 %v4562_v19  ;;  %v4568_v55 = vand.u32 4294901760, %v4562_v19 }
 0x168   :  { %v675_v5 = vpop.f32.mrf.mxu0  ;;  %v760_v18 = vpop.f32.mrf.mxu1 }
 0x169   :  { %v4570_v35 = vadd.f32 %v760_v18, %v672_v39  ;;  %1331 = vmatmul.f32.gmra.mxu1 %v4568_v55  ;;  %v890_v48 = vsub.f32 %v4562_v19, %v4568_v55  ;;  %v676_v61 = vadd.f32 %v675_v5, %v555_v57  ;;  %v452_v39 = vadd.f32 %v451_v21, %v345_v50 }
 0x16b   :  { %5900 = vst [vmem:[#allocation6_spill] sm:$0xff] %v4570_v35  ;;  %v4576_v36 = vand.u32 4294901760, %v4570_v35  ;;  %v4578_v40 = vand.u32 4294901760, %v890_v48  ;;  %v567_v57 = vadd.f32 %v566_v62, %v452_v39  ;;  %v578_v63 = vpop.f32.mrf.mxu3  ;;  %v5911_v39 = vld [vmem:[#allocation14_spill] sm:$0xff] }
 0x16d   :  { %v4584_v43 = vsub.f32 %v4570_v35, %v4576_v36  ;;  %892 = vmatmul.f32.gmra.mxu2 %v4578_v40  ;;  %1097 = vmatmul.f32.gmra.mxu3 %v4576_v36 }
 0x16f   :  { %1217 = vmatmul.f32.gmra.mxu0 %v4584_v43  ;;  %v4590_v16 = vand.u32 4294901760, %v4584_v43 }
 0x170   :  { %v679_v9 = vpop.f32.mrf.mxu0  ;;  %v764_v60 = vpop.f32.mrf.mxu1 }
 0x171   :  { %v4592_v11 = vadd.f32 %v764_v60, %v676_v61  ;;  %1337 = vmatmul.f32.gmra.mxu1 %v4590_v16  ;;  %v898_v29 = vsub.f32 %v4584_v43, %v4590_v16  ;;  %v680_v10 = vadd.f32 %v679_v9, %v561_v12  ;;  %v461_v61 = vpop.f32.mrf.mxu2 }
 0x173   :  { %5903 = vst [vmem:[#allocation5_spill] sm:$0xff] %v4592_v11  ;;  %v4598_v54 = vand.u32 4294901760, %v4592_v11  ;;  %v4600_v17 = vand.u32 4294901760, %v898_v29  ;;  %v457_v29 = vadd.f32 %v456_v8, %v349_v37 }
 0x175   :  { %v4606_v25 = vsub.f32 %v4592_v11, %v4598_v54  ;;  %900 = vmatmul.f32.gmra.mxu2 %v4600_v17  ;;  %1101 = vmatmul.f32.gmra.mxu3 %v4598_v54  ;;  %v5914_v11 = vld [vmem:[#allocation16_spill] sm:$0xff] }
 0x177   :  { %1222 = vmatmul.f32.gmra.mxu0 %v4606_v25  ;;  %v4612_v32 = vand.u32 4294901760, %v4606_v25 }
 0x178   :  { %v683_v41 = vpop.f32.mrf.mxu0  ;;  %v768_v7 = vpop.f32.mrf.mxu1 }
 0x179   :  { %v4614_v5 = vadd.f32 %v768_v7, %v680_v10  ;;  %1343 = vmatmul.f32.gmra.mxu1 %v4612_v32  ;;  %v906_v18 = vsub.f32 %v4606_v25, %v4612_v32  ;;  %v684_v9 = vadd.f32 %v683_v41, %v567_v57  ;;  %v573_v41 = vadd.f32 %v572_v6, %v457_v29  ;;  %v5910_v7 = vld [vmem:[#allocation11_spill] sm:$0xff]  ;;  %v466_v57 = vpop.f32.mrf.mxu2 }
 0x17b   :  { %5906 = vst [vmem:[#allocation8_spill] sm:$0xff] %v4614_v5  ;;  %v4620_v13 = vand.u32 4294901760, %v4614_v5  ;;  %v4622_v48 = vand.u32 4294901760, %v906_v18  ;;  %v353_v18 = vadd.f32 %v5911_v39, %v5910_v7  ;;  %v5913_v39 = vld [vmem:[#allocation13_spill] sm:$0xff] }
 0x17c   :  { %v357_v35 = vadd.f32 %v5914_v11, %v5913_v39 }
 0x17d   :  { %v4628_v21 = vsub.f32 %v4614_v5, %v4620_v13  ;;  %908 = vmatmul.f32.gmra.mxu2 %v4622_v48  ;;  %1105 = vmatmul.f32.gmra.mxu3 %v4620_v13  ;;  %v5922_v5 = vld [vmem:[#allocation19_spill] sm:$0xff] }
 0x17e   :  { %v369_v2 = vadd.f32 %v5923_v47, %v5922_v5 }
 0x17f   :  { %1227 = vmatmul.f32.gmra.mxu0 %v4628_v21  ;;  %v4634_v60 = vand.u32 4294901760, %v4628_v21 }
 0x180   :  { %v687_v38 = vpop.f32.mrf.mxu0  ;;  %v772_v62 = vpop.f32.mrf.mxu1 }
 0x181   :  { %v4636_v12 = vadd.f32 %v772_v62, %v684_v9  ;;  %1349 = vmatmul.f32.gmra.mxu1 %v4634_v60  ;;  %v914_v20 = vsub.f32 %v4628_v21, %v4634_v60  ;;  %v688_v42 = vadd.f32 %v687_v38, %v573_v41  ;;  %v462_v9 = vadd.f32 %v461_v61, %v353_v18  ;;  %v584_v38 = vpop.f32.mrf.mxu3  ;;  %v471_v39 = vpop.f32.mrf.mxu2 }
 0x183   :  { %5909 = vst [vmem:[#allocation7_spill] sm:$0xff] %v4636_v12  ;;  %v4642_v50 = vand.u32 4294901760, %v4636_v12  ;;  %v4644_v10 = vand.u32 4294901760, %v914_v20  ;;  %v579_v41 = vadd.f32 %v578_v63, %v462_v9  ;;  %v467_v63 = vadd.f32 %v466_v57, %v357_v35 }
 0x185   :  { %v4650_v8 = vsub.f32 %v4636_v12, %v4642_v50  ;;  %916 = vmatmul.f32.gmra.mxu2 %v4644_v10  ;;  %1109 = vmatmul.f32.gmra.mxu3 %v4642_v50 }
 0x187   :  { %1232 = vmatmul.f32.gmra.mxu0 %v4650_v8  ;;  %v4656_v31 = vand.u32 4294901760, %v4650_v8 }
 0x188   :  { %v691_v37 = vpop.f32.mrf.mxu0  ;;  %v776_v6 = vpop.f32.mrf.mxu1 }
 0x189   :  { %v4658_v62 = vadd.f32 %v776_v6, %v688_v42  ;;  %1355 = vmatmul.f32.gmra.mxu1 %v4656_v31  ;;  %v922_v29 = vsub.f32 %v4650_v8, %v4656_v31  ;;  %v692_v18 = vadd.f32 %v691_v37, %v579_v41  ;;  %v585_v41 = vadd.f32 %v584_v38, %v467_v63  ;;  %v590_v57 = vpop.f32.mrf.mxu3 }
 0x18a   :  { %v472_v63 = vadd.f32 %v471_v39, %v361_v0 }
 0x18b   :  { %5912 = vst [vmem:[#allocation10_spill] sm:$0xff] %v4658_v62  ;;  %v4664_v20 = vand.u32 4294901760, %v4658_v62  ;;  %v4666_v7 = vand.u32 4294901760, %v922_v29 }
 0x18d   :  { %v4672_v61 = vsub.f32 %v4658_v62, %v4664_v20  ;;  %924 = vmatmul.f32.gmra.mxu2 %v4666_v7  ;;  %1113 = vmatmul.f32.gmra.mxu3 %v4664_v20  ;;  %v5920_v62 = vld [vmem:[#allocation20_spill] sm:$0xff] }
 0x18f   :  { %1237 = vmatmul.f32.gmra.mxu0 %v4672_v61  ;;  %v4678_v42 = vand.u32 4294901760, %v4672_v61 }
 0x190   :  { %v695_v6 = vpop.f32.mrf.mxu0  ;;  %v780_v29 = vpop.f32.mrf.mxu1 }
 0x191   :  { %v4680_v9 = vadd.f32 %v780_v29, %v692_v18  ;;  %1361 = vmatmul.f32.gmra.mxu1 %v4678_v42  ;;  %v930_v11 = vsub.f32 %v4672_v61, %v4678_v42  ;;  %v696_v18 = vadd.f32 %v695_v6, %v585_v41  ;;  %v476_v6 = vpop.f32.mrf.mxu2  ;;  %v591_v41 = vadd.f32 %v590_v57, %v472_v63 }
 0x193   :  { %5915 = vst [vmem:[#allocation9_spill] sm:$0xff] %v4680_v9  ;;  %v4686_v22 = vand.u32 4294901760, %v4680_v9  ;;  %v4688_v37 = vand.u32 4294901760, %v930_v11 }
 0x195   :  { %v4694_v35 = vsub.f32 %v4680_v9, %v4686_v22  ;;  %932 = vmatmul.f32.gmra.mxu2 %v4688_v37  ;;  %1117 = vmatmul.f32.gmra.mxu3 %v4686_v22  ;;  %v5919_v9 = vld [vmem:[#allocation17_spill] sm:$0xff] }
 0x196   :  { %v365_v12 = vadd.f32 %v5920_v62, %v5919_v9 }
 0x197   :  { %1242 = vmatmul.f32.gmra.mxu0 %v4694_v35  ;;  %v4700_v29 = vand.u32 4294901760, %v4694_v35 }
 0x198   :  { %v699_v11 = vpop.f32.mrf.mxu0  ;;  %v784_v38 = vpop.f32.mrf.mxu1  ;;  %v477_v57 = vadd.f32 %v476_v6, %v365_v12 }
 0x199   :  { %v4702_v51 = vadd.f32 %v784_v38, %v696_v18  ;;  %1367 = vmatmul.f32.gmra.mxu1 %v4700_v29  ;;  %v938_v34 = vsub.f32 %v4694_v35, %v4700_v29  ;;  %v700_v39 = vadd.f32 %v699_v11, %v591_v41  ;;  %v596_v38 = vpop.f32.mrf.mxu3  ;;  %v481_v6 = vpop.f32.mrf.mxu2 }
 0x19a   :  { %v597_v41 = vadd.f32 %v596_v38, %v477_v57  ;;  %v482_v38 = vadd.f32 %v481_v6, %v369_v2 }
 0x19b   :  { %5918 = vst [vmem:[#allocation12_spill] sm:$0xff] %v4702_v51  ;;  %v4708_v56 = vand.u32 4294901760, %v4702_v51  ;;  %v4710_v3 = vand.u32 4294901760, %v938_v34 }
 0x19d   :  { %v4716_v0 = vsub.f32 %v4702_v51, %v4708_v56  ;;  %940 = vmatmul.f32.gmra.mxu2 %v4710_v3  ;;  %1121 = vmatmul.f32.gmra.mxu3 %v4708_v56 }
 0x19f   :  { %1247 = vmatmul.f32.gmra.mxu0 %v4716_v0  ;;  %v4722_v18 = vand.u32 4294901760, %v4716_v0 }
 0x1a0   :  { %v788_v34 = vpop.f32.mrf.mxu1  ;;  %v703_v9 = vpop.f32.mrf.mxu0 }
 0x1a1   :  { %v4724_v63 = vadd.f32 %v788_v34, %v700_v39  ;;  %1373 = vmatmul.f32.gmra.mxu1 %v4722_v18  ;;  %v946_v62 = vsub.f32 %v4716_v0, %v4722_v18  ;;  %v704_v39 = vadd.f32 %v703_v9, %v597_v41  ;;  %v602_v5 = vpop.f32.mrf.mxu3 }
 0x1a2   :  { %v603_v41 = vadd.f32 %v602_v5, %v482_v38 }
 0x1a3   :  { %5921 = vst [vmem:[#allocation11_spill] sm:$0xff] %v4724_v63  ;;  %v4730_v51 = vand.u32 4294901760, %v4724_v63  ;;  %v4732_v11 = vand.u32 4294901760, %v946_v62 }
 0x1a5   :  { %v4738_v12 = vsub.f32 %v4724_v63, %v4730_v51  ;;  %948 = vmatmul.f32.gmra.mxu2 %v4732_v11  ;;  %1125 = vmatmul.f32.gmra.mxu3 %v4730_v51 }
 0x1a7   :  { %5924 = vst [vmem:[#allocation14_spill] sm:$0xff] %v4738_v12  ;;  %1252 = vmatmul.f32.gmra.mxu0 %v4738_v12  ;;  %v4744_v34 = vand.u32 4294901760, %v4738_v12 }
 0x1a8   :  { %v792_v62 = vpop.f32.mrf.mxu1  ;;  %v707_v9 = vpop.f32.mrf.mxu0 }
 0x1a9   :  { %v4746_v57 = vadd.f32 %v792_v62, %v704_v39  ;;  %1379 = vmatmul.f32.gmra.mxu1 %v4744_v34  ;;  %v954_v47 = vsub.f32 %v4738_v12, %v4744_v34  ;;  %v708_v2 = vadd.f32 %v707_v9, %v603_v41 }
 0x1ab   :  { %5925 = vst [vmem:[#allocation13_spill] sm:$0xff] %v4746_v57  ;;  %v4752_v63 = vand.u32 4294901760, %v4746_v57  ;;  %v4754_v14 = vand.u32 4294901760, %v954_v47 }
 0x1ad   :  { %v4758_v58 = vsub.f32 %v4746_v57, %v4752_v63  ;;  %956 = vmatmul.f32.gmra.mxu2 %v4754_v14  ;;  %1129 = vmatmul.f32.gmra.mxu3 %v4752_v63 }
 0x1af   :  { %5926 = vst [vmem:[#allocation16_spill] sm:$0xff] %v4758_v58  ;;  %1257 = vmatmul.f32.gmra.mxu0 %v4758_v58  ;;  %v4764_v6 = vand.u32 4294901760, %v4758_v58 }
 0x1b0   :  { %v796_v39 = vpop.f32.mrf.mxu1 }
 0x1b1   :  { %v4766_v62 = vadd.f32 %v796_v39, %v708_v2  ;;  %1385 = vmatmul.f32.gmra.mxu1 %v4764_v6  ;;  %v962_v38 = vsub.f32 %v4758_v58, %v4764_v6 }
 0x1b3   :  { %5927 = vst [vmem:[#allocation15_spill] sm:$0xff] %v4766_v62  ;;  %v4772_v47 = vand.u32 4294901760, %v4766_v62  ;;  %v4774_v5 = vand.u32 4294901760, %v962_v38 }
 0x1b5   :  { %v4778_v9 = vsub.f32 %v4766_v62, %v4772_v47  ;;  %964 = vmatmul.f32.gmra.mxu2 %v4774_v5  ;;  %1133 = vmatmul.f32.gmra.mxu3 %v4772_v47 }
 0x1b6   :  { %1623 = vmatpush.xpose.msra.mxu0 %v4772_v47  ;;  %1819 = vmatpush.xpose.msrb.mxu3 %v4772_v47 }
 0x1b7   :  { %1262 = vmatmul.f32.gmra.mxu0 %v4778_v9  ;;  %1766 = vmatpush.xpose.msrb.mxu2 %v4778_v9  ;;  %v4787_v41 = vand.u32 4294901760, %v4778_v9 }
 0x1b9   :  { %1391 = vmatmul.f32.gmra.mxu1 %v4787_v41  ;;  %v970_v2 = vsub.f32 %v4778_v9, %v4787_v41 }
 0x1ba   :  { %1625 = vmatpush.xpose.msra.mxu0 %v4752_v63  ;;  %1821 = vmatpush.xpose.msrb.mxu3 %v4752_v63 }
 0x1bb   :  { %1769 = vmatpush.xpose.msrb.mxu2 %v4758_v58  ;;  %v4795_v39 = vand.u32 4294901760, %v970_v2 }
 0x1bc   :  { %v4797_v38 = vpop.f32.mrf.mxu0 }
 0x1bd   :  { %5928 = vst [vmem:[#allocation18_spill] sm:$0xff] %v4797_v38  ;;  %972 = vmatmul.f32.gmra.mxu2 %v4795_v39  ;;  %1557 = vmatmul.f32.vlgmr.msra.gmra.mxu3 %v4445_v15 }
 0x1be   :  { %1627 = vmatpush.xpose.msra.mxu0 %v4730_v51  ;;  %1668 = vmatpush.xpose.msra.mxu1 %v4795_v39  ;;  %v4803_v62 = vpop.f32.mrf.mxu1 }
 0x1bf   :  { %5929 = vst [vmem:[#allocation17_spill] sm:$0xff] %v4803_v62  ;;  %1823 = vmatpush.xpose.msrb.mxu3 %v4730_v51  ;;  %1772 = vmatpush.xpose.msrb.mxu2 %v4738_v12 }
 0x1c0   :  { %v1074_v57 = vpop.f32.mrf.mxu3 }
 0x1c2   :  { %1629 = vmatpush.xpose.msra.mxu0 %v4708_v56  ;;  %1674 = vmatpush.xpose.msra.mxu1 %v4774_v5 }
 0x1c3   :  { %1825 = vmatpush.xpose.msrb.mxu3 %v4708_v56  ;;  %1775 = vmatpush.xpose.msrb.mxu2 %v4716_v0 }
 0x1c4   :  { %v4811_v2 = vpop.f32.mrf.mxu0 }
 0x1c5   :  { %5930 = vst [vmem:[#allocation20_spill] sm:$0xff] %v4811_v2  ;;  %1460 = vmatmul.f32.vlgmr.msra.gmra.mxu2 %v4445_v15  ;;  %1561 = vmatmul.f32.gmra.mxu3 %v4465_v23 }
 0x1c6   :  { %1631 = vmatpush.xpose.msra.mxu0 %v4686_v22  ;;  %1680 = vmatpush.xpose.msra.mxu1 %v4754_v14  ;;  %v4817_v62 = vpop.f32.mrf.mxu1 }
 0x1c7   :  { %5931 = vst [vmem:[#allocation19_spill] sm:$0xff] %v4817_v62  ;;  %1827 = vmatpush.xpose.msrb.mxu3 %v4686_v22  ;;  %1778 = vmatpush.xpose.msrb.mxu2 %v4694_v35 }
 0x1c8   :  { %v853_v38 = vpop.f32.mrf.mxu2  ;;  %v1078_v12 = vpop.f32.mrf.mxu3 }
 0x1c9   :  { %v4821_v58 = vadd.f32 %v1074_v57, %v853_v38 }
 0x1ca   :  { %1633 = vmatpush.xpose.msra.mxu0 %v4664_v20  ;;  %1686 = vmatpush.xpose.msra.mxu1 %v4732_v11 }
 0x1cb   :  { %5932 = vst [vmem:[#allocation21_spill] sm:$0xff] %v4821_v58  ;;  %1829 = vmatpush.xpose.msrb.mxu3 %v4664_v20  ;;  %1781 = vmatpush.xpose.msrb.mxu2 %v4672_v61 }
 0x1cc   :  { %v4827_v2 = vpop.f32.mrf.mxu0 }
 0x1cd   :  { %5933 = vst [vmem:[#allocation32_spill] sm:$0xff] %v4827_v2  ;;  %1464 = vmatmul.f32.gmra.mxu2 %v4465_v23  ;;  %1565 = vmatmul.f32.gmra.mxu3 %v4488_v45 }
 0x1ce   :  { %1635 = vmatpush.xpose.msra.mxu0 %v4642_v50  ;;  %1692 = vmatpush.xpose.msra.mxu1 %v4710_v3  ;;  %v4833_v57 = vpop.f32.mrf.mxu1 }
 0x1cf   :  { %5934 = vst [vmem:[#allocation33_spill] sm:$0xff] %v4833_v57  ;;  %1831 = vmatpush.xpose.msrb.mxu3 %v4642_v50  ;;  %1784 = vmatpush.xpose.msrb.mxu2 %v4650_v8 }
 0x1d0   :  { %v861_v38 = vpop.f32.mrf.mxu2  ;;  %v1082_v62 = vpop.f32.mrf.mxu3 }
 0x1d1   :  { %v4837_v58 = vadd.f32 %v1078_v12, %v861_v38 }
 0x1d2   :  { %1637 = vmatpush.xpose.msra.mxu0 %v4620_v13  ;;  %1698 = vmatpush.xpose.msra.mxu1 %v4688_v37 }
 0x1d3   :  { %5935 = vst [vmem:[#allocation34_spill] sm:$0xff] %v4837_v58  ;;  %1833 = vmatpush.xpose.msrb.mxu3 %v4620_v13  ;;  %1787 = vmatpush.xpose.msrb.mxu2 %v4628_v21 }
 0x1d4   :  { %v4843_v2 = vpop.f32.mrf.mxu0 }
 0x1d5   :  { %5936 = vst [vmem:[#allocation35_spill] sm:$0xff] %v4843_v2  ;;  %1468 = vmatmul.f32.gmra.mxu2 %v4488_v45  ;;  %1569 = vmatmul.f32.gmra.mxu3 %v4510_v49 }
 0x1d6   :  { %1639 = vmatpush.xpose.msra.mxu0 %v4598_v54  ;;  %1704 = vmatpush.xpose.msra.mxu1 %v4666_v7  ;;  %v4849_v12 = vpop.f32.mrf.mxu1 }
 0x1d7   :  { %5937 = vst [vmem:[#allocation36_spill] sm:$0xff] %v4849_v12  ;;  %1835 = vmatpush.xpose.msrb.mxu3 %v4598_v54  ;;  %1790 = vmatpush.xpose.msrb.mxu2 %v4606_v25 }
 0x1d8   :  { %v869_v38 = vpop.f32.mrf.mxu2  ;;  %v1086_v57 = vpop.f32.mrf.mxu3 }
 0x1d9   :  { %v4853_v58 = vadd.f32 %v1082_v62, %v869_v38 }
 0x1da   :  { %1641 = vmatpush.xpose.msra.mxu0 %v4576_v36  ;;  %1710 = vmatpush.xpose.msra.mxu1 %v4644_v10 }
 0x1db   :  { %5938 = vst [vmem:[#allocation37_spill] sm:$0xff] %v4853_v58  ;;  %1837 = vmatpush.xpose.msrb.mxu3 %v4576_v36  ;;  %1793 = vmatpush.xpose.msrb.mxu2 %v4584_v43 }
 0x1dc   :  { %v4859_v2 = vpop.f32.mrf.mxu0 }
 0x1dd   :  { %5939 = vst [vmem:[#allocation38_spill] sm:$0xff] %v4859_v2  ;;  %1472 = vmatmul.f32.gmra.mxu2 %v4510_v49  ;;  %1573 = vmatmul.f32.gmra.mxu3 %v4532_v33 }
 0x1de   :  { %1643 = vmatpush.xpose.msra.mxu0 %v4554_v44  ;;  %1716 = vmatpush.xpose.msra.mxu1 %v4622_v48  ;;  %v4865_v62 = vpop.f32.mrf.mxu1 }
 0x1df   :  { %5940 = vst [vmem:[#allocation39_spill] sm:$0xff] %v4865_v62  ;;  %1839 = vmatpush.xpose.msrb.mxu3 %v4554_v44  ;;  %1796 = vmatpush.xpose.msrb.mxu2 %v4562_v19 }
 0x1e0   :  { %v877_v38 = vpop.f32.mrf.mxu2  ;;  %v1090_v12 = vpop.f32.mrf.mxu3 }
 0x1e1   :  { %v4869_v58 = vadd.f32 %v1086_v57, %v877_v38 }
 0x1e2   :  { %1645 = vmatpush.xpose.msra.mxu0 %v4532_v33  ;;  %1722 = vmatpush.xpose.msra.mxu1 %v4600_v17 }
 0x1e3   :  { %5941 = vst [vmem:[#allocation40_spill] sm:$0xff] %v4869_v58  ;;  %1841 = vmatpush.xpose.msrb.mxu3 %v4532_v33  ;;  %1799 = vmatpush.xpose.msrb.mxu2 %v4540_v53 }
 0x1e4   :  { %v4875_v2 = vpop.f32.mrf.mxu0 }
 0x1e5   :  { %5942 = vst [vmem:[#allocation41_spill] sm:$0xff] %v4875_v2  ;;  %1476 = vmatmul.f32.gmra.mxu2 %v4532_v33  ;;  %1577 = vmatmul.f32.gmra.mxu3 %v4554_v44 }
 0x1e6   :  { %1647 = vmatpush.xpose.msra.mxu0 %v4510_v49  ;;  %1728 = vmatpush.xpose.msra.mxu1 %v4578_v40  ;;  %v4881_v57 = vpop.f32.mrf.mxu1 }
 0x1e7   :  { %5943 = vst [vmem:[#allocation42_spill] sm:$0xff] %v4881_v57  ;;  %1843 = vmatpush.xpose.msrb.mxu3 %v4510_v49  ;;  %1802 = vmatpush.xpose.msrb.mxu2 %v4518_v4 }
 0x1e8   :  { %v885_v38 = vpop.f32.mrf.mxu2  ;;  %v1094_v62 = vpop.f32.mrf.mxu3 }
 0x1e9   :  { %v4885_v58 = vadd.f32 %v1090_v12, %v885_v38 }
 0x1ea   :  { %1649 = vmatpush.xpose.msra.mxu0 %v4488_v45  ;;  %1734 = vmatpush.xpose.msra.mxu1 %v4556_v59 }
 0x1eb   :  { %5944 = vst [vmem:[#allocation43_spill] sm:$0xff] %v4885_v58  ;;  %1845 = vmatpush.xpose.msrb.mxu3 %v4488_v45  ;;  %1805 = vmatpush.xpose.msrb.mxu2 %v4496_v1 }
 0x1ec   :  { %v4891_v2 = vpop.f32.mrf.mxu0 }
 0x1ed   :  { %1480 = vmatmul.f32.gmra.mxu2 %v4554_v44  ;;  %1581 = vmatmul.f32.gmra.mxu3 %v4576_v36 }
 0x1ee   :  { %1651 = vmatpush.xpose.msra.mxu0 %v4465_v23  ;;  %1740 = vmatpush.xpose.msra.mxu1 %v4534_v46  ;;  %v4897_v12 = vpop.f32.mrf.mxu1 }
 0x1ef   :  { %5945 = vst [vmem:[#allocation44_spill] sm:$0xff] %v4897_v12  ;;  %1847 = vmatpush.xpose.msrb.mxu3 %v4465_v23  ;;  %1808 = vmatpush.xpose.msrb.mxu2 %v4471_v27 }
 0x1f0   :  { %v893_v38 = vpop.f32.mrf.mxu2  ;;  %v1098_v57 = vpop.f32.mrf.mxu3 }
 0x1f1   :  { %v4901_v58 = vadd.f32 %v1094_v62, %v893_v38 }
 0x1f2   :  { %1653 = vmatpush.xpose.msra.mxu0 %v4445_v15  ;;  %1746 = vmatpush.xpose.msra.mxu1 %v4512_v52 }
 0x1f3   :  { %1849 = vmatpush.xpose.msrb.mxu3 %v4445_v15  ;;  %1811 = vmatpush.xpose.msrb.mxu2 %v4450_v30 }
 0x1f4   :  { %v4909_v12 = vpop.f32.mrf.mxu0 }
 0x1f5   :  { %5946 = vst [vmem:[#allocation45_spill] sm:$0xff] %v4909_v12  ;;  %1585 = vmatmul.f32.gmra.mxu3 %v4598_v54  ;;  %1484 = vmatmul.f32.gmra.mxu2 %v4576_v36 }
 0x1f6   :  { %1860 = vmatpush.xpose.msrb.mxu0 %v4787_v41  ;;  %v4915_v62 = vpop.f32.mrf.mxu1  ;;  %1752 = vmatpush.xpose.msra.mxu1 %v4490_v26 }
 0x1f7   :  { %2738 = vmatpush.msra.mxu3 %v4795_v39  ;;  %2573 = vmatpush.msra.mxu2 %v4772_v47  ;;  %5947 = vst [vmem:[#allocation46_spill] sm:$0xff] %v4915_v62 }
 0x1f8   :  { %v901_v39 = vpop.f32.mrf.mxu2  ;;  %v1102_v38 = vpop.f32.mrf.mxu3 }
 0x1f9   :  { %2744 = vmatpush.msra.mxu3 %v4774_v5  ;;  %2575 = vmatpush.msra.mxu2 %v4752_v63  ;;  %v4921_v12 = vadd.f32 %v1098_v57, %v901_v39  ;;  %v1621_v39 = vld [vmem:[%s5812_s2] sm:$0x1] }
 0x1fa   :  { %1864 = vmatpush.xpose.msrb.mxu0 %v4764_v6  ;;  %1758 = vmatpush.xpose.msra.mxu1 %v4467_v24 }
 0x1fb   :  { %2750 = vmatpush.msra.mxu3 %v4754_v14  ;;  %2577 = vmatpush.msra.mxu2 %v4730_v51 }
 0x1fc   :  { %v4930_v5 = vpop.f32.mrf.mxu0 }
 0x1fd   :  { %2756 = vmatpush.msra.mxu3 %v4732_v11  ;;  %2579 = vmatpush.msra.mxu2 %v4708_v56  ;;  %5948 = vst [vmem:[#allocation47_spill] sm:$0xff] %v4930_v5 }
 0x1fe   :  { %1868 = vmatpush.xpose.msrb.mxu0 %v4744_v34  ;;  %1927 = vmatpush.xpose.msrb.mxu1 %v4772_v47  ;;  %v4936_v14 = vpop.f32.mrf.mxu1 }
 0x1ff   :  { %2762 = vmatpush.msra.mxu3 %v4710_v3  ;;  %2581 = vmatpush.msra.mxu2 %v4686_v22  ;;  %5949 = vst [vmem:[#allocation48_spill] sm:$0xff] %v4936_v14 }
 0x200   :  { %1589 = vmatmul.f32.gmra.mxu3 %v4620_v13  ;;  %1488 = vmatmul.f32.gmra.mxu2 %v4598_v54  ;;  %v909_v11 = vpop.f32.mrf.mxu2  ;;  %v1106_v57 = vpop.f32.mrf.mxu3 }
 0x201   :  { %2768 = vmatpush.msra.mxu3 %v4688_v37  ;;  %2583 = vmatpush.msra.mxu2 %v4664_v20  ;;  %v4942_v3 = vadd.f32 %v1102_v38, %v909_v11 }
 0x202   :  { %1872 = vmatpush.xpose.msrb.mxu0 %v4722_v18  ;;  %1929 = vmatpush.xpose.msrb.mxu1 %v4752_v63 }
 0x203   :  { %2774 = vmatpush.msra.mxu3 %v4666_v7  ;;  %2585 = vmatpush.msra.mxu2 %v4642_v50 }
 0x204   :  { %v4951_v37 = vpop.f32.mrf.mxu0 }
 0x205   :  { %2780 = vmatpush.msra.mxu3 %v4644_v10  ;;  %2587 = vmatpush.msra.mxu2 %v4620_v13  ;;  %5950 = vst [vmem:[#allocation49_spill] sm:$0xff] %v4951_v37  ;;  %v5965_v37 = vld [vmem:[#allocation25_spill] sm:$0xff] }
 0x206   :  { %1876 = vmatpush.xpose.msrb.mxu0 %v4700_v29  ;;  %1931 = vmatpush.xpose.msrb.mxu1 %v4730_v51 }
 0x207   :  { %2786 = vmatpush.msra.mxu3 %v4622_v48  ;;  %2589 = vmatpush.msra.mxu2 %v4598_v54  ;;  %v4962_v48 = vpop.f32.mrf.mxu1 }
 0x208   :  { %1593 = vmatmul.f32.gmra.mxu3 %v4642_v50  ;;  %1492 = vmatmul.f32.gmra.mxu2 %v4620_v13  ;;  %v917_v10 = vpop.f32.mrf.mxu2  ;;  %v4957_v7 = vpop.f32.mrf.mxu3  ;;  %5952 = vst [vmem:[#allocation51_spill] sm:$0xff] %v4962_v48 }
 0x209   :  { %2792 = vmatpush.msra.mxu3 %v4600_v17  ;;  %5951 = vst [vmem:[#allocation50_spill] sm:$0xff] %v4957_v7  ;;  %2591 = vmatpush.msra.mxu2 %v4576_v36  ;;  %v4966_v38 = vadd.f32 %v1106_v57, %v917_v10  ;;  %v4968_v17 = vand.u32 4294901760, %v1621_v39 }
 0x20a   :  { %1880 = vmatpush.xpose.msrb.mxu0 %v4678_v42  ;;  %1933 = vmatpush.xpose.msrb.mxu1 %v4708_v56 }
 0x20b   :  { %5953 = vst [vmem:[#allocation52_spill] sm:$0xff] %v4966_v38  ;;  %2798 = vmatpush.msra.mxu3 %v4578_v40  ;;  %2593 = vmatpush.msra.mxu2 %v4554_v44  ;;  %v4973_v11 = vsub.f32 %v1621_v39, %v4968_v17  ;;  %v5966_v38 = vld [vmem:[#allocation23_spill] sm:$0xff] }
 0x20c   :  { %1760 = vmatmul.f32.vlgmr.msra.gmra.mxu1 %v4968_v17  ;;  %v4993_v39 = vpop.f32.mrf.mxu0 }
 0x20d   :  { %2804 = vmatpush.msra.mxu3 %v4556_v59  ;;  %2595 = vmatpush.msra.mxu2 %v4532_v33  ;;  %v5857_v57 = vand.u32 4294901760, %v4973_v11  ;;  %5956 = vst [vmem:[#allocation55_spill] sm:$0xff] %v4993_v39  ;;  %v5963_v39 = vld [vmem:[#allocation29_spill] sm:$0xff] }
 0x20e   :  { %1884 = vmatpush.xpose.msrb.mxu0 %v4656_v31  ;;  %1935 = vmatpush.xpose.msrb.mxu1 %v4686_v22 }
 0x20f   :  { %2810 = vmatpush.msra.mxu3 %v4534_v46  ;;  %2597 = vmatpush.msra.mxu2 %v4510_v49  ;;  %v1657_v40 = vsub.f32 %v4973_v11, %v5857_v57  ;;  %v4999_v57 = vpop.f32.mrf.mxu1 }
 0x210   :  { %1597 = vmatmul.f32.gmra.mxu3 %v4664_v20  ;;  %1496 = vmatmul.f32.gmra.mxu2 %v4642_v50  ;;  %v4989_v59 = vpop.f32.mrf.mxu2  ;;  %v4991_v10 = vpop.f32.mrf.mxu3  ;;  %5957 = vst [vmem:[#allocation56_spill] sm:$0xff] %v4999_v57 }
 0x211   :  { %2816 = vmatpush.msra.mxu3 %v4512_v52  ;;  %5954 = vst [vmem:[#allocation53_spill] sm:$0xff] %v4989_v59  ;;  %v1658_v46 = vand.u32 4294901760, %v1657_v40  ;;  %2599 = vmatpush.msra.mxu2 %v4488_v45 }
 0x212   :  { %5955 = vst [vmem:[#allocation54_spill] sm:$0xff] %v4991_v10  ;;  %1888 = vmatpush.xpose.msrb.mxu0 %v4634_v60  ;;  %1937 = vmatpush.xpose.msrb.mxu1 %v4664_v20  ;;  %v5964_v10 = vld [vmem:[#allocation27_spill] sm:$0xff] }
 0x213   :  { %2822 = vmatpush.msra.mxu3 %v4490_v26  ;;  %1659 = vmatmul.f32.vlgmr.msra.gmra.mxu0 %v1658_v46 }
 0x214   :  { %2601 = vmatpush.msra.mxu2 %v4465_v23  ;;  %v5014_v40 = vpop.f32.mrf.mxu0 }
 0x215   :  { %2828 = vmatpush.msra.mxu3 %v4467_v24  ;;  %5960 = vst [vmem:[#allocation59_spill] sm:$0xff] %v5014_v40 }
 0x216   :  { %1892 = vmatpush.xpose.msrb.mxu0 %v4612_v32  ;;  %1939 = vmatpush.xpose.msrb.mxu1 %v4642_v50 }
 0x217   :  { %2603 = vmatpush.msra.mxu2 %v4445_v15  ;;  %v5016_v24 = vpop.f32.mrf.mxu1 }
 0x218   :  { %1601 = vmatmul.f32.gmra.mxu3 %v4686_v22  ;;  %1500 = vmatmul.f32.gmra.mxu2 %v4664_v20  ;;  %v5008_v52 = vpop.f32.mrf.mxu2  ;;  %v5010_v26 = vpop.f32.mrf.mxu3  ;;  %5961 = vst [vmem:[#allocation60_spill] sm:$0xff] %v5016_v24 }
 0x219   :  { %5958 = vst [vmem:[#allocation57_spill] sm:$0xff] %v5008_v52 }
 0x21a   :  { %5959 = vst [vmem:[#allocation58_spill] sm:$0xff] %v5010_v26  ;;  %1896 = vmatpush.xpose.msrb.mxu0 %v4590_v16  ;;  %1941 = vmatpush.xpose.msrb.mxu1 %v4620_v13 }
 0x21c   :  { %v1248_v26 = vpop.f32.mrf.mxu0 }
 0x21e   :  { %1900 = vmatpush.xpose.msrb.mxu0 %v4568_v55  ;;  %1943 = vmatpush.xpose.msrb.mxu1 %v4598_v54 }
 0x21f   :  { %v1374_v24 = vpop.f32.mrf.mxu1 }
 0x220   :  { %1605 = vmatmul.f32.gmra.mxu3 %v4708_v56  ;;  %1504 = vmatmul.f32.gmra.mxu2 %v4686_v22  ;;  %v5022_v46 = vpop.f32.mrf.mxu2  ;;  %v1122_v57 = vpop.f32.mrf.mxu3 }
 0x221   :  { %5962 = vst [vmem:[#allocation61_spill] sm:$0xff] %v5022_v46 }
 0x222   :  { %1904 = vmatpush.xpose.msrb.mxu0 %v4546_v28  ;;  %1945 = vmatpush.xpose.msrb.mxu1 %v4576_v36 }
 0x224   :  { %v1253_v7 = vpop.f32.mrf.mxu0 }
 0x226   :  { %1908 = vmatpush.xpose.msrb.mxu0 %v5963_v39  ;;  %1947 = vmatpush.xpose.msrb.mxu1 %v4554_v44 }
 0x228   :  { %1609 = vmatmul.f32.gmra.mxu3 %v4730_v51  ;;  %1508 = vmatmul.f32.gmra.mxu2 %v4708_v56  ;;  %v949_v40 = vpop.f32.mrf.mxu2  ;;  %v1126_v48 = vpop.f32.mrf.mxu3 }
 0x229   :  { %v1123_v46 = vadd.f32 %v1122_v57, %v949_v40  ;;  %v1380_v57 = vpop.f32.mrf.mxu1 }
 0x22a   :  { %1912 = vmatpush.xpose.msrb.mxu0 %v5964_v10  ;;  %1949 = vmatpush.xpose.msrb.mxu1 %v4532_v33 }
 0x22b   :  { %v1249_v52 = vadd.f32 %v1248_v26, %v1123_v46  ;;  %v3690_v26 = vmov 0   ;;  %v5968_v46 = vld [vmem:[#allocation14_spill] sm:$0xff] }
 0x22c   :  { %3564 = vset.pattern.permute.xlu0 %v3690_v26  ;;  %3565 = vset.pattern.permute.xlu1 %v3690_v26 }
 0x22d   :  { %v5034_v14 = vadd.f32 %v1374_v24, %v1249_v52  ;;  %3566 = vset.pattern.permute.xlu2 %v3690_v26  ;;  %v5967_v52 = vld [vmem:[#allocation16_spill] sm:$0xff] }
 0x22e   :  { %1916 = vmatpush.xpose.msrb.mxu0 %v5965_v37  ;;  %1951 = vmatpush.xpose.msrb.mxu1 %v4510_v49 }
 0x230   :  { %1613 = vmatmul.f32.gmra.mxu3 %v4752_v63  ;;  %1512 = vmatmul.f32.gmra.mxu2 %v4730_v51  ;;  %v957_v59 = vpop.f32.mrf.mxu2  ;;  %v1130_v5 = vpop.f32.mrf.mxu3 }
 0x231   :  { %v1127_v62 = vadd.f32 %v1126_v48, %v957_v59  ;;  %v1258_v48 = vpop.f32.mrf.mxu0 }
 0x232   :  { %1920 = vmatpush.xpose.msrb.mxu0 %v5966_v38  ;;  %1953 = vmatpush.xpose.msrb.mxu1 %v4488_v45 }
 0x233   :  { %v1254_v40 = vadd.f32 %v1253_v7, %v1127_v62 }
 0x235   :  { %1922 = vmatmul.f32.vlgmr.msrb.gmra.mxu0 %v4968_v17  ;;  %v5044_v24 = vadd.f32 %v1380_v57, %v1254_v40  ;;  %v1386_v57 = vpop.f32.mrf.mxu1  ;;  %v5983_v40 = vld [vmem:[#allocation38_spill] sm:$0xff] }
 0x236   :  { %2896 = vmatpush.msra.mxu0 %v4778_v9  ;;  %1955 = vmatpush.xpose.msrb.mxu1 %v4465_v23 }
 0x238   :  { %2899 = vmatpush.msra.mxu0 %v5967_v52  ;;  %1617 = vmatmul.f32.gmra.mxu3 %v4772_v47  ;;  %v965_v9 = vpop.f32.mrf.mxu2  ;;  %v5050_v62 = vpop.f32.mrf.mxu3 }
 0x239   :  { %1516 = vmatmul.f32.gmra.mxu2 %v4752_v63  ;;  %v1131_v7 = vadd.f32 %v1130_v5, %v965_v9  ;;  %v5969_v5 = vand.u32 4294901760, %v4973_v11  ;;  %v5985_v9 = vld [vmem:[#allocation41_spill] sm:$0xff] }
 0x23a   :  { %2902 = vmatpush.msra.mxu0 %v5968_v46  ;;  %1957 = vmatpush.xpose.msrb.mxu1 %v4445_v15 }
 0x23b   :  { %v1259_v59 = vadd.f32 %v1258_v48, %v1131_v7  ;;  %v5986_v48 = vld [vmem:[#allocation42_spill] sm:$0xff] }
 0x23c   :  { %2905 = vmatpush.msra.mxu0 %v4716_v0 }
 0x23d   :  { %1959 = vmatmul.f32.vlgmr.msrb.gmra.mxu1 %v4968_v17  ;;  %v5058_v0 = vadd.f32 %v1386_v57, %v1259_v59  ;;  %v5971_v17 = vld [vmem:[#allocation18_spill] sm:$0xff] }
 0x23e   :  { %2908 = vmatpush.msra.mxu0 %v4694_v35  ;;  %3024 = vmatpush.msra.mxu1 %v4772_v47 }
 0x240   :  { %2911 = vmatpush.msra.mxu0 %v4672_v61  ;;  %3026 = vmatpush.msra.mxu1 %v4752_v63  ;;  %v5066_v35 = vpop.f32.mrf.mxu2  ;;  %v1558_v61 = vpop.f32.mrf.mxu3 }
 0x241   :  { %1853 = vmatmul.f32.vlgmr.msrb.gmra.mxu3 %v5969_v5  ;;  %1520 = vmatmul.f32.gmra.mxu2 %v4772_v47 }
 0x242   :  { %2914 = vmatpush.msra.mxu0 %v4650_v8  ;;  %3028 = vmatpush.msra.mxu1 %v4730_v51  ;;  %v5970_v8 = vld [vmem:[#allocation21_spill] sm:$0xff] }
 0x243   :  { %3282 = vmatpush.msrb.mxu3 %v4772_v47  ;;  %v1189_v26 = vadd.f32 %v5971_v17, %v5970_v8 }
 0x244   :  { %2917 = vmatpush.msra.mxu0 %v4628_v21  ;;  %3030 = vmatpush.msra.mxu1 %v4708_v56 }
 0x245   :  { %3284 = vmatpush.msrb.mxu3 %v4752_v63 }
 0x246   :  { %2920 = vmatpush.msra.mxu0 %v4606_v25  ;;  %3032 = vmatpush.msra.mxu1 %v4686_v22  ;;  %v5972_v25 = vld [vmem:[#allocation17_spill] sm:$0xff] }
 0x247   :  { %3286 = vmatpush.msrb.mxu3 %v4730_v51  ;;  %v1303_v21 = vadd.f32 %v5972_v25, %v1189_v26 }
 0x248   :  { %2923 = vmatpush.msra.mxu0 %v4584_v43  ;;  %3034 = vmatpush.msra.mxu1 %v4664_v20  ;;  %v1461_v63 = vpop.f32.mrf.mxu2  ;;  %v1562_v47 = vpop.f32.mrf.mxu3  ;;  %v5974_v43 = vld [vmem:[#allocation20_spill] sm:$0xff] }
 0x249   :  { %3288 = vmatpush.msrb.mxu3 %v4708_v56  ;;  %1814 = vmatmul.f32.vlgmr.msrb.gmra.mxu2 %v4973_v11  ;;  %v1462_v51 = vadd.f32 %v1461_v63, %v1303_v21 }
 0x24a   :  { %2926 = vmatpush.msra.mxu0 %v4562_v19  ;;  %3036 = vmatpush.msra.mxu1 %v4642_v50  ;;  %v5973_v19 = vld [vmem:[#allocation34_spill] sm:$0xff] }
 0x24b   :  { %3155 = vmatpush.msrb.mxu2 %v4787_v41  ;;  %3290 = vmatpush.msrb.mxu3 %v4686_v22  ;;  %v5975_v22 = vld [vmem:[#allocation19_spill] sm:$0xff] }
 0x24c   :  { %2929 = vmatpush.msra.mxu0 %v4540_v53  ;;  %3038 = vmatpush.msra.mxu1 %v4620_v13  ;;  %v1194_v53 = vadd.f32 %v5974_v43, %v5973_v19 }
 0x24d   :  { %3159 = vmatpush.msrb.mxu2 %v4764_v6  ;;  %3292 = vmatpush.msrb.mxu3 %v4664_v20 }
 0x24e   :  { %2932 = vmatpush.msra.mxu0 %v4518_v4  ;;  %3040 = vmatpush.msra.mxu1 %v4598_v54  ;;  %v1559_v4 = vadd.f32 %v1558_v61, %v1462_v51  ;;  %v1309_v20 = vadd.f32 %v5975_v22, %v1194_v53  ;;  %v5990_v22 = vld [vmem:[#allocation52_spill] sm:$0xff] }
 0x24f   :  { %3163 = vmatpush.msrb.mxu2 %v4744_v34  ;;  %3294 = vmatpush.msrb.mxu3 %v4642_v50  ;;  %v5976_v50 = vld [vmem:[#allocation37_spill] sm:$0xff]  ;;  %v5977_v34 = vld [vmem:[#allocation32_spill] sm:$0xff] }
 0x250   :  { %2935 = vmatpush.msra.mxu0 %v4496_v1  ;;  %3042 = vmatpush.msra.mxu1 %v4576_v36  ;;  %v1465_v1 = vpop.f32.mrf.mxu2  ;;  %v1566_v56 = vpop.f32.mrf.mxu3  ;;  %v1199_v6 = vadd.f32 %v5977_v34, %v5976_v50  ;;  %v5994_v50 = vld [vmem:[#allocation48_spill] sm:$0xff] }
 0x251   :  { %3167 = vmatpush.msrb.mxu2 %v4722_v18  ;;  %3296 = vmatpush.msrb.mxu3 %v4620_v13 }
 0x252   :  { %2938 = vmatpush.msra.mxu0 %v4471_v27  ;;  %3044 = vmatpush.msra.mxu1 %v4554_v44  ;;  %v1466_v27 = vadd.f32 %v1465_v1, %v1309_v20  ;;  %v5991_v20 = vld [vmem:[#allocation47_spill] sm:$0xff]  ;;  %v5992_v1 = vld [vmem:[#allocation53_spill] sm:$0xff] }
 0x253   :  { %3171 = vmatpush.msrb.mxu2 %v4700_v29  ;;  %3298 = vmatpush.msrb.mxu3 %v4598_v54  ;;  %v5978_v54 = vld [vmem:[#allocation33_spill] sm:$0xff] }
 0x254   :  { %2941 = vmatpush.msra.mxu0 %v4450_v30  ;;  %3046 = vmatpush.msra.mxu1 %v4532_v33  ;;  %v1563_v30 = vadd.f32 %v1562_v47, %v1466_v27  ;;  %v1315_v13 = vadd.f32 %v5978_v54, %v1199_v6  ;;  %v5989_v47 = vld [vmem:[#allocation46_spill] sm:$0xff] }
 0x255   :  { %1965 = vperm.xlu0 %3564, %v1559_v4   ;;  %3175 = vmatpush.msrb.mxu2 %v4678_v42 }
 0x256   :  { %3048 = vmatpush.msra.mxu1 %v4510_v49  ;;  %3300 = vmatpush.msrb.mxu3 %v4576_v36 }
 0x257   :  { %3179 = vmatpush.msrb.mxu2 %v4656_v31  ;;  %v5979_v31 = vld [vmem:[#allocation40_spill] sm:$0xff] }
 0x258   :  { %3050 = vmatpush.msra.mxu1 %v4488_v45  ;;  %3302 = vmatpush.msrb.mxu3 %v4554_v44  ;;  %v1469_v29 = vpop.f32.mrf.mxu2  ;;  %v1570_v18 = vpop.f32.mrf.mxu3  ;;  %v5980_v44 = vld [vmem:[#allocation35_spill] sm:$0xff] }
 0x259   :  { %3183 = vmatpush.msrb.mxu2 %v4634_v60  ;;  %v1470_v36 = vadd.f32 %v1469_v29, %v1315_v13  ;;  %v1204_v42 = vadd.f32 %v5980_v44, %v5979_v31  ;;  %v5996_v29 = vld [vmem:[#allocation57_spill] sm:$0xff]  ;;  %v5998_v31 = vld [vmem:[#allocation51_spill] sm:$0xff] }
 0x25a   :  { %3052 = vmatpush.msra.mxu1 %v4465_v23  ;;  %3304 = vmatpush.msrb.mxu3 %v4532_v33  ;;  %v5981_v33 = vld [vmem:[#allocation36_spill] sm:$0xff] }
 0x25b   :  { %3187 = vmatpush.msrb.mxu2 %v4612_v32  ;;  %v1567_v60 = vadd.f32 %v1566_v56, %v1470_v36  ;;  %v1321_v32 = vadd.f32 %v5981_v33, %v1204_v42  ;;  %v5993_v56 = vld [vmem:[#allocation50_spill] sm:$0xff] }
 0x25c   :  { %3054 = vmatpush.msra.mxu1 %v4445_v15  ;;  %3306 = vmatpush.msrb.mxu3 %v4510_v49  ;;  %v1111_v27 = vadd.f32 %v5993_v56, %v5992_v1 }
 0x25d   :  { %1970 = vperm.xlu0 %3564, %v1563_v30   ;;  %3191 = vmatpush.msrb.mxu2 %v4590_v16  ;;  %v5982_v16 = vld [vmem:[#allocation43_spill] sm:$0xff] }
 0x25e   :  { %3308 = vmatpush.msrb.mxu3 %v4488_v45  ;;  %1975 = vperm.xlu1 %3565, %v1567_v60   ;;  %v1209_v52 = vadd.f32 %v5983_v40, %v5982_v16  ;;  %v6001_v16 = vld [vmem:[#allocation58_spill] sm:$0xff] }
 0x25f   :  { %3195 = vmatpush.msrb.mxu2 %v4568_v55 }
 0x260   :  { %3310 = vmatpush.msrb.mxu3 %v4465_v23  ;;  %v1473_v49 = vpop.f32.mrf.mxu2  ;;  %v1574_v41 = vpop.f32.mrf.mxu3  ;;  %v5984_v23 = vld [vmem:[#allocation39_spill] sm:$0xff] }
 0x261   :  { %3199 = vmatpush.msrb.mxu2 %v4546_v28  ;;  %v1474_v11 = vadd.f32 %v1473_v49, %v1321_v32  ;;  %v1327_v28 = vadd.f32 %v5984_v23, %v1209_v52  ;;  %v5999_v32 = vld [vmem:[#allocation55_spill] sm:$0xff]  ;;  %v6002_v52 = vld [vmem:[#allocation56_spill] sm:$0xff] }
 0x262   :  { %3312 = vmatpush.msrb.mxu3 %v4445_v15 }
 0x263   :  { %3203 = vmatpush.msrb.mxu2 %v5963_v39  ;;  %v1571_v45 = vadd.f32 %v1570_v18, %v1474_v11  ;;  %v1214_v39 = vadd.f32 %v5985_v9, %v4901_v58  ;;  %v5988_v58 = vld [vmem:[#allocation45_spill] sm:$0xff]  ;;  %v5997_v18 = vld [vmem:[#allocation54_spill] sm:$0xff] }
 0x264   :  { %v1224_v63 = vadd.f32 %v5988_v58, %v4942_v3  ;;  %v5995_v3 = vld [vmem:[#allocation49_spill] sm:$0xff]  ;;  %v1115_v36 = vadd.f32 %v5997_v18, %v5996_v29 }
 0x265   :  { %3207 = vmatpush.msrb.mxu2 %v5964_v10  ;;  %v1333_v59 = vadd.f32 %v5986_v48, %v1214_v39  ;;  %v1234_v54 = vadd.f32 %v5995_v3, %v1111_v27  ;;  %v6000_v11 = vld [vmem:[#allocation61_spill] sm:$0xff]  ;;  %v6004_v39 = vld [vmem:[#allocation60_spill] sm:$0xff]  ;;  %v5186_v27 = vld [vmem:[%s5814_s4 + $0x10] sm:$0xff] }
 0x266   :  { %1980 = vperm.xlu1 %3565, %v1571_v45   ;;  %v1345_v51 = vadd.f32 %v5989_v47, %v1224_v63  ;;  %v1239_v49 = vadd.f32 %v5999_v32, %v1115_v36  ;;  %v1119_v40 = vadd.f32 %v6001_v16, %v6000_v11  ;;  %vm2126_vm1 = vcmp.gt.f32.partialorder %v5186_v27, 0.0 }
 0x267   :  { %3211 = vmatpush.msrb.mxu2 %v5965_v37  ;;  %v1219_v37 = vadd.f32 %v4891_v2, %v4921_v12  ;;  %v1229_v2 = vadd.f32 %v5991_v20, %v5990_v22  ;;  %v1357_v44 = vadd.f32 %v5998_v31, %v1234_v54 }
 0x268   :  { %v1477_v55 = vpop.f32.mrf.mxu2  ;;  %v1578_v15 = vpop.f32.mrf.mxu3  ;;  %v1363_v45 = vadd.f32 %v6002_v52, %v1239_v49  ;;  %v5224_v52 = vld [vmem:[%s5814_s4 + $0x20] sm:$0xff] }
 0x269   :  { %3215 = vmatpush.msrb.mxu2 %v5966_v38  ;;  %v1478_v46 = vadd.f32 %v1477_v55, %v1327_v28  ;;  %v5987_v38 = vld [vmem:[#allocation44_spill] sm:$0xff]  ;;  %v1351_v34 = vadd.f32 %v5994_v50, %v1229_v2  ;;  %v5191_v50 = vld [vmem:[%s5814_s4] sm:$0xff]  ;;  %vm2128_vm9 = vcmp.gt.f32.partialorder %v5224_v52, 0.0 }
 0x26a   :  { %v1339_v8 = vadd.f32 %v5987_v38, %v1219_v37  ;;  %vm2124_vm2 = vcmp.gt.f32.partialorder %v5191_v50, 0.0 }
 0x26b   :  { %v1575_v7 = vadd.f32 %v1574_v41, %v1478_v46 }
 0x26d   :  { %1985 = vperm.xlu2 %3566, %v1575_v7  }
 0x270   :  { %v1481_v57 = vpop.f32.mrf.mxu2  ;;  %v1582_v10 = vpop.f32.mrf.mxu3 }
 0x271   :  { %v1482_v5 = vadd.f32 %v1481_v57, %v1333_v59 }
 0x273   :  { %v1579_v61 = vadd.f32 %v1578_v15, %v1482_v5  ;;  %v6003_v15 = vld [vmem:[#allocation59_spill] sm:$0xff] }
 0x274   :  { %v1244_v46 = vadd.f32 %v6003_v15, %v1119_v40 }
 0x275   :  { %1990 = vperm.xlu2 %3566, %v1579_v61  }
 0x276   :  { %v1369_v7 = vadd.f32 %v6004_v39, %v1244_v46 }
 0x278   :  { %v1586_v17 = vpop.f32.mrf.mxu3  ;;  %v1485_v26 = vpop.f32.mrf.mxu2 }
 0x279   :  { %v1486_v25 = vadd.f32 %v1485_v26, %v1339_v8  ;;  %v5171_v8 = vpop.f32.mrf.mxu0  ;;  %v5175_v26 = vpop.f32.mrf.mxu1 }
 0x27b   :  { %v1583_v21 = vadd.f32 %v1582_v10, %v1486_v25 }
 0x27d   :  { %1995 = vperm.xlu1 %3565, %v1583_v21  }
 0x283   :  { %v1590_v19 = vpop.f32.mrf.mxu3  ;;  %v1489_v43 = vpop.f32.mrf.mxu2 }
 0x284   :  { %v1490_v53 = vadd.f32 %v1489_v43, %v1345_v51 }
 0x286   :  { %v1587_v4 = vadd.f32 %v1586_v17, %v1490_v53 }
 0x288   :  { %2000 = vperm.xlu1 %3565, %v1587_v4  }
 0x289   :  { %v1761_v63 = vpop.f32.mrf.mxu1 }
 0x28b   :  { %v1594_v12 = vpop.f32.mrf.mxu3  ;;  %v1493_v6 = vpop.f32.mrf.mxu2 }
 0x28c   :  { %v1494_v30 = vadd.f32 %v1493_v6, %v1351_v34  ;;  %v5196_v34 = vld [vmem:[%s5814_s4 + $0x8] sm:$0xff] }
 0x28d   :  { %vm2125_vm3 = vcmp.gt.f32.partialorder %v5196_v34, 0.0 }
 0x28e   :  { %v1591_v13 = vadd.f32 %v1590_v19, %v1494_v30 }
 0x290   :  { %2005 = vperm.xlu2 %3566, %v1591_v13   ;;  %v1660_v58 = vpop.f32.mrf.mxu0 }
 0x291   :  { %v1762_v47 = vadd.f32 %v1761_v63, %v1660_v58 }
 0x293   :  { %v1598_v42 = vpop.f32.mrf.mxu3  ;;  %v1497_v60 = vpop.f32.mrf.mxu2 }
 0x294   :  { %v1498_v33 = vadd.f32 %v1497_v60, %v1357_v44 }
 0x296   :  { %v1595_v41 = vadd.f32 %v1594_v12, %v1498_v33 }
 0x298   :  { %2010 = vperm.xlu0 %3564, %v1595_v41  }
 0x29b   :  { %v1602_v23 = vpop.f32.mrf.mxu3  ;;  %v1501_v28 = vpop.f32.mrf.mxu2 }
 0x29c   :  { %v1502_v55 = vadd.f32 %v1501_v28, %v1363_v45  ;;  %v5229_v45 = vld [vmem:[%s5814_s4 + $0x18] sm:$0xff] }
 0x29d   :  { %vm2127_vm10 = vcmp.gt.f32.partialorder %v5229_v45, 0.0 }
 0x29e   :  { %v1599_v9 = vadd.f32 %v1598_v42, %v1502_v55 }
 0x2a0   :  { %2015 = vperm.xlu2 %3566, %v1599_v9  }
 0x2a3   :  { %v1505_v48 = vpop.f32.mrf.mxu2  ;;  %v5161_v57 = vpop.f32.mrf.mxu3 }
 0x2a4   :  { %v1506_v59 = vadd.f32 %v1505_v48, %v1369_v7  ;;  %v5247_v7 = vld [vmem:[%s5814_s4 + $0x28] sm:$0xff] }
 0x2a5   :  { %vm2129_vm12 = vcmp.gt.f32.partialorder %v5247_v7, 0.0 }
 0x2a6   :  { %v1603_v10 = vadd.f32 %v1602_v23, %v1506_v59 }
 0x2a8   :  { %2020 = vperm.xlu0 %3564, %v1603_v10   ;;  %v5255_v10 = vld [vmem:[%s5814_s4 + $0x40] sm:$0xff] }
 0x2a9   :  { %vm2132_vm14 = vcmp.gt.f32.partialorder %v5255_v10, 0.0 }
 0x2ab   :  { %v5163_v5 = vpop.f32.mrf.mxu2  ;;  %v5165_v61 = vpop.f32.mrf.mxu3 }
 0x2b2   :  { %v1923_v4 = vpop.f32.mrf.mxu0 }
 0x2b3   :  { %v5167_v37 = vpop.f32.mrf.mxu2  ;;  %v5169_v38 = vpop.f32.mrf.mxu3 }
 0x2ba   :  { %v1960_v20 = vpop.f32.mrf.mxu1 }
 0x2bb   :  { %v5177_v25 = vpop.f32.mrf.mxu3 }
 0x2bc   :  { %v5173_v17 = vpop.f32.mrf.mxu2 }
 0x2c4   :  { %v5179_v21 = vpop.f32.mrf.mxu2  ;;  %v1854_v51 = vpop.f32.mrf.mxu3 }
 0x2c7   :  { %v1966_v19 = vpop.permute.xlu0 %1965  ;;  %v1986_v6 = vpop.permute.xlu2 %1985 }
 0x2cc   :  { %v1815_v43 = vpop.f32.mrf.mxu2 }
 0x2cd   :  { %v1816_v53 = vadd.f32 %v1815_v43, %v1762_v47 }
 0x2cf   :  { %v1855_v22 = vadd.f32 %v1854_v51, %v1816_v53  ;;  %v1971_v30 = vpop.permute.xlu0 %1970  ;;  %v1991_v23 = vpop.permute.xlu2 %1990  ;;  %v5270_v53 = vld [vmem:[%s5814_s4 + $0x30] sm:$0xff] }
 0x2d0   :  { %v1976_v2 = vpop.permute.xlu1 %1975  ;;  %vm2130_vm0 = vcmp.gt.f32.partialorder %v5270_v53, 0.0 }
 0x2d1   :  { %v1924_v12 = vadd.f32 %v1923_v4, %v1855_v22 }
 0x2d3   :  { %v1961_v1 = vadd.f32 %v1960_v20, %v1924_v12 }
 0x2d5   :  { %v5181_v56 = vperm.slane %v1961_v1, 0  ;;  %v5282_v1 = vld [vmem:[%s5814_s4 + $0x38] sm:$0xff] }
 0x2d7   :  { %v2046_v3 = vadd.f32 %v5181_v56, %v1976_v2  ;;  %v2044_v54 = vadd.f32 %v5181_v56, %v1966_v19  ;;  %v2045_v13 = vadd.f32 %v5181_v56, %v1971_v30  ;;  %v2048_v31 = vadd.f32 %v5181_v56, %v1986_v6 }
 0x2d8   :  { %v1981_v29 = vpop.permute.xlu1 %1980  ;;  %v2049_v28 = vadd.f32 %v5181_v56, %v1991_v23 }
 0x2d9   :  { %v2078_v18 = vmul.f32 0.2, %v2046_v3  ;;  %v2047_v36 = vadd.f32 %v5181_v56, %v1981_v29  ;;  %vm2062_vm4 = vcmp.gt.f32.partialorder %v2046_v3, 0.0  ;;  %vm2060_vm5 = vcmp.gt.f32.partialorder %v2044_v54, 0.0 }
 0x2da   :  { %v2076_v44 = vmul.f32 0.2, %v2044_v54  ;;  %vm2061_vm6 = vcmp.gt.f32.partialorder %v2045_v13, 0.0  ;;  %v2077_v42 = vmul.f32 0.2, %v2045_v13  ;;  %vm2064_vm7 = vcmp.gt.f32.partialorder %v2048_v31, 0.0 }
 0x2db   :  { %v5206_v60 = vsel %vm2062_vm4, %v2046_v3, %v2078_v18  ;;  %v2080_v16 = vmul.f32 0.2, %v2048_v31  ;;  %v2079_v40 = vmul.f32 0.2, %v2047_v36  ;;  %vm2063_vm8 = vcmp.gt.f32.partialorder %v2047_v36, 0.0  ;;  %v5296_v18 = vld [vmem:[%s5814_s4 + $0x48] sm:$0xff] }
 0x2dc   :  { %v2142_v33 = vsel %vm2126_vm1, %v5206_v60, -1e+30  ;;  %v5211_v32 = vsel %vm2060_vm5, %v2044_v54, %v2076_v44  ;;  %v5213_v49 = vsel %vm2061_vm6, %v2045_v13, %v2077_v42  ;;  %v2081_v9 = vmul.f32 0.2, %v2049_v28 }
 0x2dd   :  { %2160 = vmax.xlane.f32.xlu1 %v2142_v33  ;;  %v2140_v41 = vsel %vm2124_vm2, %v5211_v32, -1e+30  ;;  %v2141_v11 = vsel %vm2125_vm3, %v5213_v49, -1e+30  ;;  %v5232_v55 = vsel %vm2064_vm7, %v2048_v31, %v2080_v16  ;;  %v5235_v15 = vsel %vm2063_vm8, %v2047_v36, %v2079_v40 }
 0x2de   :  { %2156 = vmax.xlane.f32.xlu0 %v2140_v41  ;;  %2158 = vmax.xlane.f32.xlu2 %v2141_v11  ;;  %v2144_v46 = vsel %vm2128_vm9, %v5232_v55, -1e+30  ;;  %v2143_v39 = vsel %vm2127_vm10, %v5235_v15, -1e+30  ;;  %vm2065_vm11 = vcmp.gt.f32.partialorder %v2049_v28, 0.0  ;;  %vm2131_vm5 = vcmp.gt.f32.partialorder %v5282_v1, 0.0 }
 0x2df   :  { %v5249_v48 = vsel %vm2065_vm11, %v2049_v28, %v2081_v9  ;;  %v1514_v13 = vadd.f32 %v5167_v37, %v5044_v24  ;;  %vm2133_vm7 = vcmp.gt.f32.partialorder %v5296_v18, 0.0  ;;  %v1135_v37 = vadd.f32 %v5050_v62, %v5066_v35 }
 0x2e0   :  { %v2145_v63 = vsel %vm2129_vm12, %v5249_v48, -1e+30  ;;  %v1510_v33 = vadd.f32 %v5163_v5, %v5034_v14 }
 0x2e1   :  { %v1611_v31 = vadd.f32 %v5165_v61, %v1514_v13  ;;  %v1264_v61 = vadd.f32 %v5171_v8, %v1135_v37  ;;  %v5350_v13 = vld [vmem:[%s5814_s4 + $0x58] sm:$0xff] }
 0x2e2   :  { %v1607_v41 = vadd.f32 %v5161_v57, %v1510_v33 }
 0x2e3   :  { %v1393_v11 = vadd.f32 %v5175_v26, %v1264_v61 }
 0x2e5   :  { %2164 = vmax.xlane.f32.xlu1 %v2144_v46  ;;  %v1522_v16 = vadd.f32 %v5179_v21, %v1393_v11 }
 0x2e6   :  { %2162 = vmax.xlane.f32.xlu0 %v2143_v39 }
 0x2e7   :  { %v1619_v40 = vadd.f32 %v5177_v25, %v1522_v16 }
 0x2ea   :  { %v2006_v59 = vpop.permute.xlu2 %2005 }
 0x2eb   :  { %v2052_v58 = vadd.f32 %v5181_v56, %v2006_v59 }
 0x2ed   :  { %2166 = vmax.xlane.f32.xlu1 %v2145_v63  ;;  %v2084_v47 = vmul.f32 0.2, %v2052_v58  ;;  %vm2068_vm13 = vcmp.gt.f32.partialorder %v2052_v58, 0.0 }
 0x2ef   :  { %v5262_v51 = vsel %vm2068_vm13, %v2052_v58, %v2084_v47  ;;  %v1996_v43 = vpop.permute.xlu1 %1995 }
 0x2f0   :  { %v2148_v19 = vsel %vm2132_vm14, %v5262_v51, -1e+30  ;;  %v2050_v4 = vadd.f32 %v5181_v56, %v1996_v43 }
 0x2f1   :  { %2172 = vmax.xlane.f32.xlu0 %v2148_v19 }
 0x2f2   :  { %v2082_v22 = vmul.f32 0.2, %v2050_v4  ;;  %vm2066_vm15 = vcmp.gt.f32.partialorder %v2050_v4, 0.0 }
 0x2f4   :  { %v5274_v20 = vsel %vm2066_vm15, %v2050_v4, %v2082_v22 }
 0x2f5   :  { %v2146_v2 = vsel %vm2130_vm0, %v5274_v20, -1e+30 }
 0x2f6   :  { %2168 = vmax.xlane.f32.xlu2 %v2146_v2 }
 0x2fa   :  { %v2001_v12 = vpop.permute.xlu1 %2000  ;;  %v2016_v23 = vpop.permute.xlu2 %2015 }
 0x2fb   :  { %v2051_v6 = vadd.f32 %v5181_v56, %v2001_v12  ;;  %v2054_v62 = vadd.f32 %v5181_v56, %v2016_v23 }
 0x2fd   :  { %v2083_v30 = vmul.f32 0.2, %v2051_v6  ;;  %vm2067_vm4 = vcmp.gt.f32.partialorder %v2051_v6, 0.0  ;;  %v2086_v9 = vmul.f32 0.2, %v2054_v62  ;;  %vm2070_vm8 = vcmp.gt.f32.partialorder %v2054_v62, 0.0 }
 0x2ff   :  { %v5286_v3 = vsel %vm2067_vm4, %v2051_v6, %v2083_v30  ;;  %v5331_v58 = vsel %vm2070_vm8, %v2054_v62, %v2086_v9 }
 0x300   :  { %v2147_v54 = vsel %vm2131_vm5, %v5286_v3, -1e+30 }
 0x301   :  { %2170 = vmax.xlane.f32.xlu1 %v2147_v54 }
 0x30a   :  { %v2011_v29 = vpop.permute.xlu0 %2010 }
 0x30b   :  { %v2053_v36 = vadd.f32 %v5181_v56, %v2011_v29 }
 0x30d   :  { %v2085_v44 = vmul.f32 0.2, %v2053_v36  ;;  %vm2069_vm6 = vcmp.gt.f32.partialorder %v2053_v36, 0.0 }
 0x30e   :  { %2030 = vperm.xlu2 %3566, %v1611_v31  }
 0x30f   :  { %v5301_v42 = vsel %vm2069_vm6, %v2053_v36, %v2085_v44 }
 0x310   :  { %v2149_v24 = vsel %vm2133_vm7, %v5301_v42, -1e+30 }
 0x311   :  { %2174 = vmax.xlane.f32.xlu1 %v2149_v24 }
 0x31a   :  { %v2021_v28 = vpop.permute.xlu0 %2020 }
 0x31b   :  { %v2055_v47 = vadd.f32 %v5181_v56, %v2021_v28 }
 0x31d   :  { %v2087_v12 = vmul.f32 0.2, %v2055_v47 }
 0x32a   :  { %2025 = vperm.xlu1 %3565, %v1607_v41  }
 0x332   :  { %2040 = vperm.xlu1 %3565, %v1619_v40  }
 0x350   :  { %v2161_v46 = vpop.xlane.xlu1 %2160 }
 0x351   :  { %v2190_v35 = vsub.f32 %v5206_v60, %v2161_v46  ;;  %v2159_v14 = vpop.xlane.xlu2 %2158  ;;  %v2157_v5 = vpop.xlane.xlu0 %2156  ;;  %v5326_v60 = vld [vmem:[%s5814_s4 + $0x50] sm:$0xff] }
 0x352   :  { %v2188_v8 = vsub.f32 %v5211_v32, %v2157_v5  ;;  %v2189_v26 = vsub.f32 %v5213_v49, %v2159_v14 }
 0x353   :  { %v2206_v57 = vsel %vm2126_vm1, %v2190_v35, -1e+30  ;;  %vm2134_vm1 = vcmp.gt.f32.partialorder %v5326_v60, 0.0  ;;  %v1518_v35 = vadd.f32 %v5173_v17, %v5058_v0 }
 0x354   :  { %v2224_v21 = vmul.f32 1.442695, %v2206_v57  ;;  %v2204_v25 = vsel %vm2124_vm2, %v2188_v8, -1e+30  ;;  %v2205_v32 = vsel %vm2125_vm3, %v2189_v26, -1e+30 }
 0x355   :  { %v2220_v39 = vmul.f32 1.442695, %v2204_v25  ;;  %v2222_v63 = vmul.f32 1.442695, %v2205_v32  ;;  %v2150_v43 = vsel %vm2134_vm1, %v5331_v58, -1e+30  ;;  %v1615_v8 = vadd.f32 %v5169_v38, %v1518_v35 }
 0x356   :  { %3568 = vpow2.f32 %v2224_v21  ;;  %vm2071_vm2 = vcmp.gt.f32.partialorder %v2055_v47, 0.0  ;;  %vm2135_vm3 = vcmp.gt.f32.partialorder %v5350_v13, 0.0 }
 0x357   :  { %3570 = vpow2.f32 %v2220_v39  ;;  %v5354_v29 = vsel %vm2071_vm2, %v2055_v47, %v2087_v12  ;;  %v5410_v39 = vld [vmem:[%s5814_s4 + $0x78] sm:$0xff] }
 0x358   :  { %v2165_v59 = vpop.xlane.xlu1 %2164  ;;  %3572 = vpow2.f32 %v2222_v63  ;;  %v2151_v24 = vsel %vm2135_vm3, %v5354_v29, -1e+30 }
 0x359   :  { %v2192_v49 = vsub.f32 %v5232_v55, %v2165_v59  ;;  %v2163_v22 = vpop.xlane.xlu0 %2162 }
 0x35a   :  { %v2191_v0 = vsub.f32 %v5235_v15, %v2163_v22 }
 0x35b   :  { %v2208_v4 = vsel %vm2128_vm9, %v2192_v49, -1e+30 }
 0x35c   :  { %v3569_v19 = vpop.eup %3568  ;;  %2176 = vmax.xlane.f32.xlu1 %v2150_v43  ;;  %v2228_v30 = vmul.f32 1.442695, %v2208_v4  ;;  %v2207_v17 = vsel %vm2127_vm10, %v2191_v0, -1e+30  ;;  %vm2139_vm10 = vcmp.gt.f32.partialorder %v5410_v39, 0.0 }
 0x35d   :  { %v5341_v2 = vmul.f32 %v3569_v19, %v5186_v27  ;;  %v3571_v55 = vpop.eup %3570  ;;  %v2226_v38 = vmul.f32 1.442695, %v2207_v17 }
 0x35e   :  { %v5345_v6 = vmul.f32 %v3571_v55, %v5191_v50  ;;  %v3573_v36 = vpop.eup %3572  ;;  %3574 = vpow2.f32 %v2228_v30  ;;  %v5435_v55 = vld [vmem:[%s5814_s4 + $0x68] sm:$0xff] }
 0x35f   :  { %2272 = vadd.xlane.f32.xlu2 %v5341_v2  ;;  %v5364_v37 = vmul.f32 %v3573_v36, %v5196_v34 }
 0x360   :  { %v2167_v54 = vpop.xlane.xlu1 %2166  ;;  %2268 = vadd.xlane.f32.xlu0 %v5345_v6 }
 0x361   :  { %v2193_v27 = vsub.f32 %v5249_v48, %v2167_v54 }
 0x363   :  { %v2209_v50 = vsel %vm2129_vm12, %v2193_v27, -1e+30 }
 0x364   :  { %v2173_v31 = vpop.xlane.xlu0 %2172  ;;  %v2230_v48 = vmul.f32 1.442695, %v2209_v50  ;;  %v3575_v41 = vpop.eup %3574 }
 0x365   :  { %v2196_v44 = vsub.f32 %v5262_v51, %v2173_v31  ;;  %v5371_v16 = vmul.f32 %v3575_v41, %v5224_v52 }
 0x367   :  { %2178 = vmax.xlane.f32.xlu2 %v2151_v24  ;;  %v2212_v33 = vsel %vm2132_vm14, %v2196_v44, -1e+30  ;;  %vm2137_vm14 = vcmp.gt.f32.partialorder %v5435_v55, 0.0 }
 0x368   :  { %v2236_v61 = vmul.f32 1.442695, %v2212_v33  ;;  %2270 = vadd.xlane.f32.xlu0 %v5364_v37 }
 0x369   :  { %v2169_v11 = vpop.xlane.xlu2 %2168 }
 0x36a   :  { %3576 = vpow2.f32 %v2236_v61  ;;  %v2194_v51 = vsub.f32 %v5274_v20, %v2169_v11 }
 0x36b   :  { %3578 = vpow2.f32 %v2230_v48 }
 0x36c   :  { %v2210_v34 = vsel %vm2130_vm0, %v2194_v51, -1e+30 }
 0x36d   :  { %v2232_v40 = vmul.f32 1.442695, %v2210_v34 }
 0x36f   :  { %2276 = vadd.xlane.f32.xlu2 %v5371_v16  ;;  %3580 = vpow2.f32 %v2232_v40 }
 0x370   :  { %v3577_v23 = vpop.eup %3576 }
 0x371   :  { %v3579_v28 = vpop.eup %3578  ;;  %v5377_v46 = vmul.f32 %v3577_v23, %v5255_v10  ;;  %v2031_v59 = vpop.permute.xlu2 %2030 }
 0x372   :  { %v5382_v52 = vmul.f32 %v3579_v28, %v5247_v7  ;;  %v2057_v47 = vadd.f32 %v5181_v56, %v2031_v59 }
 0x373   :  { %2284 = vadd.xlane.f32.xlu1 %v5377_v46 }
 0x374   :  { %v2171_v62 = vpop.xlane.xlu1 %2170  ;;  %v2089_v22 = vmul.f32 0.2, %v2057_v47  ;;  %vm2073_vm13 = vcmp.gt.f32.partialorder %v2057_v47, 0.0 }
 0x375   :  { %v2195_v20 = vsub.f32 %v5286_v3, %v2171_v62  ;;  %v3581_v10 = vpop.eup %3580 }
 0x376   :  { %v5391_v57 = vmul.f32 %v3581_v10, %v5270_v53  ;;  %v5437_v12 = vsel %vm2073_vm13, %v2057_v47, %v2089_v22 }
 0x377   :  { %v2211_v14 = vsel %vm2131_vm5, %v2195_v20, -1e+30  ;;  %2278 = vadd.xlane.f32.xlu2 %v5382_v52  ;;  %v2153_v30 = vsel %vm2137_vm14, %v5437_v12, -1e+30 }
 0x378   :  { %v2234_v5 = vmul.f32 1.442695, %v2211_v14 }
 0x37a   :  { %3582 = vpow2.f32 %v2234_v5 }
 0x37b   :  { %3584 = vpow2.f32 %v2226_v38 }
 0x37c   :  { %2035 = vperm.xlu0 %3564, %v1615_v8  }
 0x37f   :  { %2280 = vadd.xlane.f32.xlu2 %v5391_v57 }
 0x380   :  { %v3583_v7 = vpop.eup %3582 }
 0x381   :  { %v5395_v3 = vmul.f32 %v3583_v7, %v5282_v1  ;;  %v3585_v53 = vpop.eup %3584 }
 0x382   :  { %v5405_v9 = vmul.f32 %v3585_v53, %v5229_v45  ;;  %v5418_v45 = vld [vmem:[%s5814_s4 + $0x60] sm:$0xff] }
 0x383   :  { %vm2136_vm12 = vcmp.gt.f32.partialorder %v5418_v45, 0.0 }
 0x384   :  { %v5401_v26 = vpop.xlane.xlu1 %2174 }
 0x387   :  { %2282 = vadd.xlane.f32.xlu2 %v5395_v3 }
 0x39c   :  { %v2026_v21 = vpop.permute.xlu1 %2025 }
 0x39d   :  { %v2056_v25 = vadd.f32 %v5181_v56, %v2026_v21 }
 0x39f   :  { %v2088_v32 = vmul.f32 0.2, %v2056_v25  ;;  %vm2072_vm11 = vcmp.gt.f32.partialorder %v2056_v25, 0.0 }
 0x3a1   :  { %v5426_v43 = vsel %vm2072_vm11, %v2056_v25, %v2088_v32 }
 0x3a2   :  { %v2152_v4 = vsel %vm2136_vm12, %v5426_v43, -1e+30 }
 0x3a4   :  { %v2041_v1 = vpop.permute.xlu1 %2040 }
 0x3a5   :  { %v2059_v15 = vadd.f32 %v5181_v56, %v2041_v1 }
 0x3a6   :  { %2274 = vadd.xlane.f32.xlu0 %v5405_v9 }
 0x3a7   :  { %v2091_v49 = vmul.f32 0.2, %v2059_v15  ;;  %vm2075_vm9 = vcmp.gt.f32.partialorder %v2059_v15, 0.0 }
 0x3a9   :  { %v5420_v63 = vsel %vm2075_vm9, %v2059_v15, %v2091_v49  ;;  %v2197_v49 = vsub.f32 %v5301_v42, %v5401_v26 }
 0x3aa   :  { %v2155_v19 = vsel %vm2139_vm10, %v5420_v63, -1e+30 }
 0x3ab   :  { %2186 = vmax.xlane.f32.xlu2 %v2155_v19 }
 0x3ae   :  { %2180 = vmax.xlane.f32.xlu0 %v2152_v4 }
 0x3b6   :  { %2182 = vmax.xlane.f32.xlu0 %v2153_v30 }
 0x3cf   :  { %v2177_v54 = vpop.xlane.xlu1 %2176 }
 0x3d0   :  { %v2198_v27 = vsub.f32 %v5331_v58, %v2177_v54 }
 0x3d2   :  { %v2273_v36 = vpop.xlane.xlu2 %2272  ;;  %v2214_v50 = vsel %vm2134_vm1, %v2198_v27, -1e+30 }
 0x3d3   :  { %vm2302_vm15 = vcmp.gt.f32.partialorder %v2273_v36, 0.0  ;;  %v2240_v31 = vmul.f32 1.442695, %v2214_v50  ;;  %v2269_v24 = vpop.xlane.xlu0 %2268  ;;  %v2213_v50 = vsel %vm2133_vm7, %v2197_v49, -1e+30 }
 0x3d4   :  { %v2318_v44 = vsel %vm2302_vm15, %v2273_v36, 1.0  ;;  %vm2300_vm0 = vcmp.gt.f32.partialorder %v2269_v24, 0.0 }
 0x3d5   :  { %3586 = vrcp.f32 %v2318_v44  ;;  %v2316_v48 = vsel %vm2300_vm0, %v2269_v24, 1.0  ;;  %v2373_v53 = vand.u32 2147483648, %v2318_v44  ;;  %v2371_v15 = vand.u32 2147483647, %v2318_v44 }
 0x3d6   :  { %3588 = vpow2.f32 %v2240_v31  ;;  %v2343_v5 = vand.u32 2147483648, %v2316_v48  ;;  %v2341_v8 = vand.u32 2147483647, %v2316_v48  ;;  %vm2337_vm6 = vweird.f32 %v2316_v48 }
 0x3d7   :  { %3590 = vrcp.f32 %v2316_v48  ;;  %v2374_v54 = vor.u32 1.1754944e-38, %v2373_v53  ;;  %vm2372_vm13 = vcmp.eq.f32.partialorder %v2371_v15, 8.507059e+37 }
 0x3d8   :  { %v2344_v38 = vor.u32 1.1754944e-38, %v2343_v5  ;;  %vm2342_vm2 = vcmp.eq.f32.partialorder %v2341_v8, 8.507059e+37 }
 0x3da   :  { %v2179_v33 = vpop.xlane.xlu2 %2178 }
 0x3db   :  { %v3587_v61 = vpop.eup %3586  ;;  %v2199_v41 = vsub.f32 %v5354_v29, %v2179_v33  ;;  %v2271_v58 = vpop.xlane.xlu0 %2270 }
 0x3dc   :  { %v3589_v11 = vpop.eup %3588  ;;  %v2363_v51 = vmul.f32 %v3587_v61, %v2318_v44  ;;  %vm2301_vm4 = vcmp.gt.f32.partialorder %v2271_v58, 0.0  ;;  %vm2368_vm8 = vweird.f32 %v3587_v61 }
 0x3dd   :  { %v2215_v34 = vsel %vm2135_vm3, %v2199_v41, -1e+30  ;;  %v5450_v40 = vmul.f32 %v3589_v11, %v5326_v60  ;;  %v3591_v23 = vpop.eup %3590  ;;  %v2317_v20 = vsel %vm2301_vm4, %v2271_v58, 1.0  ;;  %vm2367_vm3 = vweird.f32 %v2318_v44 }
 0x3de   :  { %v2364_v28 = vsub.f32 1.0, %v2363_v51  ;;  %v2242_v62 = vmul.f32 1.442695, %v2215_v34  ;;  %v2333_v35 = vmul.f32 %v3591_v23, %v2316_v48  ;;  %3592 = vrcp.f32 %v2317_v20  ;;  %vm5458_vm9 = vmor %vm2367_vm3, %vm2368_vm8  ;;  %v5478_v51 = vld [vmem:[%s5814_s4 + $0x70] sm:$0xff] }
 0x3df   :  { %2288 = vadd.xlane.f32.xlu1 %v5450_v40  ;;  %vm2338_vm5 = vweird.f32 %v3591_v23  ;;  %v2358_v4 = vand.u32 2147483648, %v2317_v20  ;;  %v2356_v30 = vand.u32 2147483647, %v2317_v20  ;;  %vm2352_vm15 = vweird.f32 %v2317_v20 }
 0x3e0   :  { %3594 = vpow2.f32 %v2242_v62  ;;  %v2334_v29 = vsub.f32 1.0, %v2333_v35  ;;  %v2365_v14 = vmul.f32 %v3587_v61, %v2364_v28  ;;  %vm2339_vm1 = vmor %vm2337_vm6, %vm2338_vm5  ;;  %v2238_v11 = vmul.f32 1.442695, %v2213_v50 }
 0x3e1   :  { %v2359_v26 = vor.u32 1.1754944e-38, %v2358_v4  ;;  %vm2357_vm4 = vcmp.eq.f32.partialorder %v2356_v30, 8.507059e+37  ;;  %vm2138_vm5 = vcmp.gt.f32.partialorder %v5478_v51, 0.0 }
 0x3e2   :  { %v2335_v10 = vmul.f32 %v3591_v23, %v2334_v29  ;;  %v2366_v17 = vadd.f32 %v3587_v61, %v2365_v14  ;;  %3596 = vpow2.f32 %v2238_v11  ;;  %v2277_v14 = vpop.xlane.xlu2 %2276 }
 0x3e3   :  { %vm2304_vm6 = vcmp.gt.f32.partialorder %v2277_v14, 0.0 }
 0x3e4   :  { %v3593_v7 = vpop.eup %3592  ;;  %v2336_v0 = vadd.f32 %v3591_v23, %v2335_v10 }
 0x3e5   :  { %v2348_v21 = vmul.f32 %v3593_v7, %v2317_v20  ;;  %vm2353_vm11 = vweird.f32 %v3593_v7 }
 0x3e6   :  { %v3595_v60 = vpop.eup %3594  ;;  %v2340_v25 = vsel %vm2339_vm1, %v3591_v23, %v2336_v0  ;;  %vm2354_vm0 = vmor %vm2352_vm15, %vm2353_vm11  ;;  %v2285_v30 = vpop.xlane.xlu1 %2284 }
 0x3e7   :  { %v5454_v1 = vmul.f32 %v3595_v60, %v5350_v13  ;;  %v2345_v32 = vsel %vm2342_vm2, %v2344_v38, %v2340_v25  ;;  %v2349_v59 = vsub.f32 1.0, %v2348_v21  ;;  %v2370_v13 = vsel %vm5458_vm9, %v3587_v61, %v2366_v17 }
 0x3e8   :  { %v2346_v19 = vmul.f32 %v2345_v32, %v5345_v6  ;;  %v2375_v36 = vsel %vm2372_vm13, %v2374_v54, %v2370_v13  ;;  %v3597_v5 = vpop.eup %3596  ;;  %v2320_v38 = vsel %vm2304_vm6, %v2277_v14, 1.0  ;;  %vm2308_vm13 = vcmp.gt.f32.partialorder %v2285_v30, 0.0 }
 0x3e9   :  { %2290 = vadd.xlane.f32.xlu2 %v5454_v1  ;;  %v2350_v22 = vmul.f32 %v3593_v7, %v2349_v59  ;;  %v2376_v41 = vmul.f32 %v2375_v36, %v5341_v2  ;;  %3598 = vrcp.f32 %v2320_v38  ;;  %vm2397_vm11 = vweird.f32 %v2320_v38 }
 0x3ea   :  { %v5466_v27 = vand.u32 4294901760, %v2346_v19  ;;  %v2279_v60 = vpop.xlane.xlu2 %2278 }
 0x3eb   :  { %v2351_v42 = vadd.f32 %v3593_v7, %v2350_v22  ;;  %vm2305_vm8 = vcmp.gt.f32.partialorder %v2279_v60, 0.0 }
 0x3ec   :  { %2830 = vmatmul.f32.vlgmr.msra.gmra.mxu3 %v5466_v27  ;;  %v2605_v6 = vsub.f32 %v2346_v19, %v5466_v27  ;;  %v5498_v53 = vsel %vm2305_vm8, %v2279_v60, 1.0 }
 0x3ed   :  { %v2355_v31 = vsel %vm2354_vm0, %v3593_v7, %v2351_v42  ;;  %v5495_v7 = vmul.f32 %v3597_v5, %v5296_v18  ;;  %3600 = vrcp.f32 %v5498_v53 }
 0x3ee   :  { %2944 = vmatmul.f32.vlgmr.msra.gmra.mxu0 %v2605_v6  ;;  %v2036_v44 = vpop.permute.xlu0 %2035  ;;  %v2606_v24 = vand.u32 4294901760, %v2605_v6  ;;  %v2360_v48 = vsel %vm2357_vm4, %v2359_v26, %v2355_v31 }
 0x3ef   :  { %v2058_v33 = vadd.f32 %v5181_v56, %v2036_v44  ;;  %v2361_v61 = vmul.f32 %v2360_v48, %v5364_v37  ;;  %v5484_v56 = vand.u32 4294901760, %v2376_v41  ;;  %v3599_v25 = vpop.eup %3598  ;;  %v2403_v44 = vand.u32 2147483648, %v2320_v38 }
 0x3f0   :  { %3058 = vmatmul.f32.vlgmr.msra.gmra.mxu1 %v2606_v24  ;;  %v2607_v34 = vsub.f32 %v2605_v6, %v2606_v24  ;;  %v2393_v18 = vmul.f32 %v3599_v25, %v2320_v38  ;;  %vm2398_vm9 = vweird.f32 %v3599_v25  ;;  %v2401_v6 = vand.u32 2147483647, %v2320_v38 }
 0x3f1   :  { %v2090_v58 = vmul.f32 0.2, %v2058_v33  ;;  %v5480_v23 = vand.u32 4294901760, %v2361_v61  ;;  %vm2074_vm7 = vcmp.gt.f32.partialorder %v2058_v33, 0.0  ;;  %v2621_v35 = vsub.f32 %v2376_v41, %v5484_v56  ;;  %vm5514_vm15 = vmor %vm2397_vm11, %vm2398_vm9 }
 0x3f2   :  { %v2608_v28 = vand.u32 4294901760, %v2607_v34  ;;  %v2281_v21 = vpop.xlane.xlu2 %2280  ;;  %v2394_v49 = vsub.f32 1.0, %v2393_v18  ;;  %vm2402_vm0 = vcmp.eq.f32.partialorder %v2401_v6, 8.507059e+37  ;;  %v2418_v38 = vand.u32 2147483648, %v5498_v53 }
 0x3f3   :  { %v2613_v62 = vsub.f32 %v2361_v61, %v5480_v23  ;;  %v5487_v2 = vsel %vm2074_vm7, %v2058_v33, %v2090_v58  ;;  %v2622_v8 = vand.u32 4294901760, %v2621_v35  ;;  %vm2306_vm1 = vcmp.gt.f32.partialorder %v2281_v21, 0.0  ;;  %v5503_v59 = vpop.eup %3600 }
 0x3f4   :  { %2834 = vmatmul.f32.gmra.mxu3 %v5480_v23  ;;  %2609 = vmatmul.f32.vlgmr.msra.gmra.mxu2 %v2608_v28  ;;  %v2154_v37 = vsel %vm2138_vm5, %v5487_v2, -1e+30  ;;  %v5501_v32 = vsel %vm2306_vm1, %v2281_v21, 1.0  ;;  %v2408_v4 = vmul.f32 %v5503_v59, %v5498_v53  ;;  %v2395_v13 = vmul.f32 %v3599_v25, %v2394_v49 }
 0x3f5   :  { %v2614_v20 = vand.u32 4294901760, %v2613_v62  ;;  %2184 = vmax.xlane.f32.xlu0 %v2154_v37  ;;  %v2623_v0 = vsub.f32 %v2621_v35, %v2622_v8  ;;  %3602 = vrcp.f32 %v5501_v32  ;;  %v2404_v28 = vor.u32 1.1754944e-38, %v2403_v44 }
 0x3f6   :  { %2949 = vmatmul.f32.gmra.mxu0 %v2613_v62  ;;  %v2409_v54 = vsub.f32 1.0, %v2408_v4  ;;  %v2396_v26 = vadd.f32 %v3599_v25, %v2395_v13 }
 0x3f7   :  { %v2615_v29 = vsub.f32 %v2613_v62, %v2614_v20  ;;  %v2624_v17 = vand.u32 4294901760, %v2623_v0  ;;  %v5526_v62 = vsel %vm2308_vm13, %v2285_v30, 1.0 }
 0x3f8   :  { %3064 = vmatmul.f32.gmra.mxu1 %v2614_v20  ;;  %v2410_v41 = vmul.f32 %v5503_v59, %v2409_v54 }
 0x3f9   :  { %v2616_v10 = vand.u32 4294901760, %v2615_v29 }
 0x3fa   :  { %v2283_v15 = vpop.xlane.xlu2 %2282  ;;  %v2411_v14 = vadd.f32 %v5503_v59, %v2410_v41 }
 0x3fb   :  { %vm2307_vm3 = vcmp.gt.f32.partialorder %v2283_v15, 0.0  ;;  %v5508_v42 = vpop.eup %3602 }
 0x3fc   :  { %2838 = vmatmul.f32.gmra.mxu3 %v5484_v56  ;;  %2617 = vmatmul.f32.gmra.mxu2 %v2616_v10  ;;  %v5510_v36 = vsel %vm2307_vm3, %v2283_v15, 1.0  ;;  %v2423_v11 = vmul.f32 %v5508_v42, %v5501_v32  ;;  %v2416_v15 = vand.u32 2147483647, %v5498_v53  ;;  %vm2427_vm3 = vweird.f32 %v5501_v32 }
 0x3fd   :  { %2286 = vadd.xlane.f32.xlu0 %v5495_v7 }
 0x3fe   :  { %2954 = vmatmul.f32.gmra.mxu0 %v2621_v35  ;;  %v2424_v5 = vsub.f32 1.0, %v2423_v11 }
 0x400   :  { %3070 = vmatmul.f32.gmra.mxu1 %v2622_v8  ;;  %v2425_v4 = vmul.f32 %v5508_v42, %v2424_v5 }
 0x402   :  { %v2426_v44 = vadd.f32 %v5508_v42, %v2425_v4 }
 0x404   :  { %2625 = vmatmul.f32.gmra.mxu2 %v2624_v17 }
 0x419   :  { %v2275_v47 = vpop.xlane.xlu0 %2274 }
 0x41a   :  { %vm2303_vm2 = vcmp.gt.f32.partialorder %v2275_v47, 0.0 }
 0x41b   :  { %v2319_v19 = vsel %vm2303_vm2, %v2275_v47, 1.0  ;;  %vm2417_vm2 = vcmp.eq.f32.partialorder %v2416_v15, 8.507059e+37 }
 0x41c   :  { %3604 = vrcp.f32 %v2319_v19  ;;  %v2388_v37 = vand.u32 2147483648, %v2319_v19  ;;  %v2386_v29 = vand.u32 2147483647, %v2319_v19  ;;  %vm2382_vm7 = vweird.f32 %v2319_v19 }
 0x41d   :  { %3606 = vrcp.f32 %v5510_v36 }
 0x41e   :  { %v2187_v22 = vpop.xlane.xlu2 %2186  ;;  %v2389_v21 = vor.u32 1.1754944e-38, %v2388_v37  ;;  %vm2387_vm1 = vcmp.eq.f32.partialorder %v2386_v29, 8.507059e+37 }
 0x41f   :  { %v2203_v24 = vsub.f32 %v5420_v63, %v2187_v22  ;;  %v2400_v63 = vsel %vm5514_vm15, %v3599_v25, %v2396_v26  ;;  %v2419_v26 = vor.u32 1.1754944e-38, %v2418_v38  ;;  %vm2442_vm15 = vweird.f32 %v5510_v36 }
 0x420   :  { %v2405_v10 = vsel %vm2402_vm0, %v2404_v28, %v2400_v63 }
 0x421   :  { %v2181_v50 = vpop.xlane.xlu0 %2180  ;;  %v2219_v20 = vsel %vm2139_vm10, %v2203_v24, -1e+30  ;;  %vm2412_vm10 = vweird.f32 %v5498_v53  ;;  %v2406_v47 = vmul.f32 %v2405_v10, %v5371_v16  ;;  %v2433_v24 = vand.u32 2147483648, %v5501_v32 }
 0x422   :  { %v3605_v31 = vpop.eup %3604  ;;  %v2200_v48 = vsub.f32 %v5426_v43, %v2181_v50  ;;  %v2250_v0 = vmul.f32 1.442695, %v2219_v20 }
 0x423   :  { %v2378_v33 = vmul.f32 %v3605_v31, %v2319_v19  ;;  %vm2383_vm4 = vweird.f32 %v3605_v31  ;;  %v5533_v17 = vpop.eup %3606  ;;  %v5561_v50 = vand.u32 4294901760, %v2406_v47  ;;  %v2434_v37 = vor.u32 1.1754944e-38, %v2433_v24 }
 0x424   :  { %v2216_v58 = vsel %vm2136_vm12, %v2200_v48, -1e+30  ;;  %vm2413_vm12 = vweird.f32 %v5503_v59  ;;  %vm2384_vm6 = vmor %vm2382_vm7, %vm2383_vm4  ;;  %v2438_v30 = vmul.f32 %v5533_v17, %v5510_v36  ;;  %vm2443_vm13 = vweird.f32 %v5533_v17 }
 0x425   :  { %v2379_v43 = vsub.f32 1.0, %v2378_v33  ;;  %v2244_v34 = vmul.f32 1.442695, %v2216_v58  ;;  %vm5539_vm8 = vmor %vm2412_vm10, %vm2413_vm12  ;;  %v2431_v33 = vand.u32 2147483647, %v5501_v32  ;;  %v2637_v41 = vsub.f32 %v2406_v47, %v5561_v50 }
 0x426   :  { %v2415_v19 = vsel %vm5539_vm8, %v5503_v59, %v2411_v14  ;;  %vm2444_vm0 = vmor %vm2442_vm15, %vm2443_vm13  ;;  %vm2457_vm7 = vweird.f32 %v5526_v62 }
 0x427   :  { %v2380_v35 = vmul.f32 %v3605_v31, %v2379_v43  ;;  %3608 = vpow2.f32 %v2244_v34  ;;  %vm2432_vm11 = vcmp.eq.f32.partialorder %v2431_v33, 8.507059e+37  ;;  %v2638_v29 = vand.u32 4294901760, %v2637_v41 }
 0x428   :  { %3610 = vrcp.f32 %v5526_v62 }
 0x429   :  { %v2381_v8 = vadd.f32 %v3605_v31, %v2380_v35  ;;  %v2183_v60 = vpop.xlane.xlu0 %2182  ;;  %3612 = vpow2.f32 %v2250_v0 }
 0x42a   :  { %v2201_v25 = vsub.f32 %v5437_v12, %v2183_v60 }
 0x42b   :  { %v2385_v49 = vsel %vm2384_vm6, %v3605_v31, %v2381_v8  ;;  %v2420_v31 = vsel %vm2417_vm2, %v2419_v26, %v2415_v19  ;;  %v2639_v8 = vsub.f32 %v2637_v41, %v2638_v29 }
 0x42c   :  { %v2217_v13 = vsel %vm2137_vm14, %v2201_v25, -1e+30  ;;  %v2390_v12 = vsel %vm2387_vm1, %v2389_v21, %v2385_v49  ;;  %vm2428_vm14 = vweird.f32 %v5508_v42  ;;  %v2421_v11 = vmul.f32 %v2420_v31, %v5382_v52 }
 0x42d   :  { %v3609_v22 = vpop.eup %3608  ;;  %v2246_v53 = vmul.f32 1.442695, %v2217_v13  ;;  %v2391_v54 = vmul.f32 %v2390_v12, %v5405_v9  ;;  %v2439_v9 = vsub.f32 1.0, %v2438_v30  ;;  %vm5573_vm9 = vmor %vm2427_vm3, %vm2428_vm14  ;;  %v2640_v18 = vand.u32 4294901760, %v2639_v8 }
 0x42e   :  { %v5555_v16 = vmul.f32 %v3609_v22, %v5418_v45  ;;  %v5557_v6 = vpop.eup %3610  ;;  %v2430_v34 = vsel %vm5573_vm9, %v5508_v42, %v2426_v44  ;;  %v5589_v14 = vand.u32 4294901760, %v2421_v11 }
 0x42f   :  { %3614 = vpow2.f32 %v2246_v53  ;;  %v5559_v59 = vand.u32 4294901760, %v2391_v54  ;;  %v3613_v48 = vpop.eup %3612  ;;  %v2453_v43 = vmul.f32 %v5557_v6, %v5526_v62  ;;  %v2440_v32 = vmul.f32 %v5533_v17, %v2439_v9 }
 0x430   :  { %2292 = vadd.xlane.f32.xlu0 %v5555_v16  ;;  %v5584_v20 = vmul.f32 %v3613_v48, %v5410_v39  ;;  %v2435_v42 = vsel %vm2432_vm11, %v2434_v37, %v2430_v34  ;;  %v2448_v39 = vand.u32 2147483648, %v5510_v36  ;;  %v2645_v0 = vsub.f32 %v2421_v11, %v5589_v14 }
 0x431   :  { %2842 = vmatmul.f32.gmra.mxu3 %v5559_v59  ;;  %v2629_v45 = vsub.f32 %v2391_v54, %v5559_v59  ;;  %v2454_v5 = vsub.f32 1.0, %v2453_v43  ;;  %v2441_v10 = vadd.f32 %v5533_v17, %v2440_v32  ;;  %v2436_v60 = vmul.f32 %v2435_v42, %v5391_v57 }
 0x432   :  { %v2449_v25 = vor.u32 1.1754944e-38, %v2448_v39  ;;  %v2646_v15 = vand.u32 4294901760, %v2645_v0  ;;  %vm2458_vm12 = vweird.f32 %v5557_v6  ;;  %v2463_v57 = vand.u32 2147483648, %v5526_v62 }
 0x433   :  { %2959 = vmatmul.f32.gmra.mxu0 %v2629_v45  ;;  %v2630_v61 = vand.u32 4294901760, %v2629_v45  ;;  %v2455_v38 = vmul.f32 %v5557_v6, %v2454_v5  ;;  %v2445_v21 = vsel %vm2444_vm0, %v5533_v17, %v2441_v10  ;;  %v5603_v49 = vand.u32 4294901760, %v2436_v60  ;;  %vm2459_vm10 = vmor %vm2457_vm7, %vm2458_vm12 }
 0x434   :  { %v2461_v17 = vand.u32 2147483647, %v5526_v62  ;;  %v2647_v19 = vsub.f32 %v2645_v0, %v2646_v15  ;;  %v2464_v22 = vor.u32 1.1754944e-38, %v2463_v57 }
 0x435   :  { %v3615_v63 = vpop.eup %3614  ;;  %3076 = vmatmul.f32.gmra.mxu1 %v2630_v61  ;;  %v2631_v28 = vsub.f32 %v2629_v45, %v2630_v61  ;;  %v2653_v4 = vsub.f32 %v2436_v60, %v5603_v49 }
 0x436   :  { %v5587_v52 = vmul.f32 %v3615_v63, %v5435_v55  ;;  %v2446_v55 = vand.u32 2147483647, %v5510_v36  ;;  %v2456_v36 = vadd.f32 %v5557_v6, %v2455_v38  ;;  %vm2462_vm6 = vcmp.eq.f32.partialorder %v2461_v17, 8.507059e+37 }
 0x437   :  { %v2632_v35 = vand.u32 4294901760, %v2631_v28  ;;  %v2648_v30 = vand.u32 4294901760, %v2647_v19  ;;  %v2654_v53 = vand.u32 4294901760, %v2653_v4 }
 0x438   :  { %2298 = vadd.xlane.f32.xlu0 %v5584_v20  ;;  %2294 = vadd.xlane.f32.xlu1 %v5587_v52  ;;  %vm2447_vm4 = vcmp.eq.f32.partialorder %v2446_v55, 8.507059e+37  ;;  %v2460_v12 = vsel %vm2459_vm10, %v5557_v6, %v2456_v36 }
 0x439   :  { %2633 = vmatmul.f32.gmra.mxu2 %v2632_v35  ;;  %2846 = vmatmul.f32.gmra.mxu3 %v5561_v50  ;;  %v2450_v47 = vsel %vm2447_vm4, %v2449_v25, %v2445_v21  ;;  %v2465_v26 = vsel %vm2462_vm6, %v2464_v22, %v2460_v12  ;;  %v2655_v62 = vsub.f32 %v2653_v4, %v2654_v53 }
 0x43a   :  { %v2451_v13 = vmul.f32 %v2450_v47, %v5395_v3  ;;  %v2466_v3 = vmul.f32 %v2465_v26, %v5377_v46 }
 0x43b   :  { %2964 = vmatmul.f32.gmra.mxu0 %v2637_v41  ;;  %v2656_v44 = vand.u32 4294901760, %v2655_v62 }
 0x43c   :  { %v5614_v54 = vand.u32 4294901760, %v2451_v13  ;;  %v5619_v9 = vand.u32 4294901760, %v2466_v3 }
 0x43d   :  { %3082 = vmatmul.f32.gmra.mxu1 %v2638_v29 }
 0x43e   :  { %v2661_v31 = vsub.f32 %v2451_v13, %v5614_v54  ;;  %v2669_v24 = vsub.f32 %v2466_v3, %v5619_v9 }
 0x440   :  { %v2662_v6 = vand.u32 4294901760, %v2661_v31  ;;  %v2670_v33 = vand.u32 4294901760, %v2669_v24 }
 0x441   :  { %2641 = vmatmul.f32.gmra.mxu2 %v2640_v18  ;;  %2850 = vmatmul.f32.gmra.mxu3 %v5589_v14 }
 0x442   :  { %v2663_v45 = vsub.f32 %v2661_v31, %v2662_v6  ;;  %v2671_v46 = vsub.f32 %v2669_v24, %v2670_v33 }
 0x443   :  { %2969 = vmatmul.f32.gmra.mxu0 %v2645_v0 }
 0x444   :  { %v2664_v48 = vand.u32 4294901760, %v2663_v45  ;;  %v2672_v41 = vand.u32 4294901760, %v2671_v46 }
 0x445   :  { %3088 = vmatmul.f32.gmra.mxu1 %v2646_v15 }
 0x449   :  { %2649 = vmatmul.f32.gmra.mxu2 %v2648_v30  ;;  %2854 = vmatmul.f32.gmra.mxu3 %v5603_v49 }
 0x44b   :  { %2974 = vmatmul.f32.gmra.mxu0 %v2653_v4 }
 0x44d   :  { %3094 = vmatmul.f32.gmra.mxu1 %v2654_v53 }
 0x451   :  { %2657 = vmatmul.f32.gmra.mxu2 %v2656_v44  ;;  %2858 = vmatmul.f32.gmra.mxu3 %v5614_v54 }
 0x452   :  { %v2289_v61 = vpop.xlane.xlu1 %2288 }
 0x453   :  { %2979 = vmatmul.f32.gmra.mxu0 %v2661_v31  ;;  %vm2310_vm8 = vcmp.gt.f32.partialorder %v2289_v61, 0.0 }
 0x454   :  { %v2326_v11 = vsel %vm2310_vm8, %v2289_v61, 1.0 }
 0x455   :  { %3100 = vmatmul.f32.gmra.mxu1 %v2662_v6  ;;  %3616 = vrcp.f32 %v2326_v11  ;;  %v2493_v21 = vand.u32 2147483648, %v2326_v11  ;;  %v2491_v25 = vand.u32 2147483647, %v2326_v11 }
 0x457   :  { %v2494_v57 = vor.u32 1.1754944e-38, %v2493_v21  ;;  %vm2492_vm9 = vcmp.eq.f32.partialorder %v2491_v25, 8.507059e+37 }
 0x459   :  { %2665 = vmatmul.f32.gmra.mxu2 %v2664_v48  ;;  %2862 = vmatmul.f32.gmra.mxu3 %v5619_v9 }
 0x45b   :  { %2984 = vmatmul.f32.gmra.mxu0 %v2669_v24  ;;  %v3617_v34 = vpop.eup %3616 }
 0x45c   :  { %v2291_v58 = vpop.xlane.xlu2 %2290  ;;  %v2483_v37 = vmul.f32 %v3617_v34, %v2326_v11  ;;  %vm2488_vm14 = vweird.f32 %v3617_v34 }
 0x45d   :  { %3106 = vmatmul.f32.gmra.mxu1 %v2670_v33  ;;  %vm2311_vm1 = vcmp.gt.f32.partialorder %v2291_v58, 0.0 }
 0x45e   :  { %v2327_v63 = vsel %vm2311_vm1, %v2291_v58, 1.0  ;;  %v2484_v29 = vsub.f32 1.0, %v2483_v37 }
 0x45f   :  { %3618 = vrcp.f32 %v2327_v63  ;;  %vm2502_vm0 = vweird.f32 %v2327_v63  ;;  %v2508_v22 = vand.u32 2147483648, %v2327_v63  ;;  %v2506_v53 = vand.u32 2147483647, %v2327_v63 }
 0x460   :  { %v2485_v55 = vmul.f32 %v3617_v34, %v2484_v29 }
 0x461   :  { %2673 = vmatmul.f32.gmra.mxu2 %v2672_v41  ;;  %v2509_v6 = vor.u32 1.1754944e-38, %v2508_v22  ;;  %vm2507_vm10 = vcmp.eq.f32.partialorder %v2506_v53, 8.507059e+37 }
 0x465   :  { %v3619_v5 = vpop.eup %3618 }
 0x466   :  { %v2498_v8 = vmul.f32 %v3619_v5, %v2327_v63  ;;  %vm2503_vm13 = vweird.f32 %v3619_v5 }
 0x467   :  { %vm2504_vm7 = vmor %vm2502_vm0, %vm2503_vm13 }
 0x468   :  { %v2185_v43 = vpop.xlane.xlu0 %2184  ;;  %v2499_v60 = vsub.f32 1.0, %v2498_v8 }
 0x469   :  { %v2202_v32 = vsub.f32 %v5487_v2, %v2185_v43  ;;  %v2486_v2 = vadd.f32 %v3617_v34, %v2485_v55 }
 0x46a   :  { %v2500_v47 = vmul.f32 %v3619_v5, %v2499_v60 }
 0x46b   :  { %v2218_v28 = vsel %vm2138_vm5, %v2202_v32, -1e+30  ;;  %vm2487_vm5 = vweird.f32 %v2326_v11 }
 0x46c   :  { %v2248_v35 = vmul.f32 1.442695, %v2218_v28  ;;  %vm2489_vm3 = vmor %vm2487_vm5, %vm2488_vm14  ;;  %v2501_v13 = vadd.f32 %v3619_v5, %v2500_v47 }
 0x46d   :  { %v2490_v15 = vsel %vm2489_vm3, %v3617_v34, %v2486_v2 }
 0x46e   :  { %3620 = vpow2.f32 %v2248_v35  ;;  %v2495_v4 = vsel %vm2492_vm9, %v2494_v57, %v2490_v15  ;;  %v2505_v3 = vsel %vm2504_vm7, %v3619_v5, %v2501_v13 }
 0x46f   :  { %v2496_v62 = vmul.f32 %v2495_v4, %v5450_v40  ;;  %v2510_v48 = vsel %vm2507_vm10, %v2509_v6, %v2505_v3  ;;  %v5645_v34 = vpop.f32.mrf.mxu3 }
 0x470   :  { %v2287_v42 = vpop.xlane.xlu0 %2286  ;;  %v2511_v61 = vmul.f32 %v2510_v48, %v5454_v1 }
 0x471   :  { %vm2309_vm2 = vcmp.gt.f32.partialorder %v2287_v42, 0.0  ;;  %v5635_v24 = vand.u32 4294901760, %v2496_v62 }
 0x472   :  { %v2325_v10 = vsel %vm2309_vm2, %v2287_v42, 1.0  ;;  %v5641_v58 = vand.u32 4294901760, %v2511_v61 }
 0x473   :  { %3622 = vrcp.f32 %v2325_v10  ;;  %v2478_v17 = vand.u32 2147483648, %v2325_v10  ;;  %vm2472_vm15 = vweird.f32 %v2325_v10  ;;  %v2685_v40 = vsub.f32 %v2496_v62, %v5635_v24 }
 0x474   :  { %v3621_v39 = vpop.eup %3620  ;;  %v2693_v43 = vsub.f32 %v2511_v61, %v5641_v58 }
 0x475   :  { %v5628_v0 = vmul.f32 %v3621_v39, %v5478_v51  ;;  %v2476_v51 = vand.u32 2147483647, %v2325_v10  ;;  %v2479_v30 = vor.u32 1.1754944e-38, %v2478_v17  ;;  %v2686_v11 = vand.u32 4294901760, %v2685_v40 }
 0x476   :  { %v2694_v28 = vand.u32 4294901760, %v2693_v43 }
 0x477   :  { %2296 = vadd.xlane.f32.xlu2 %v5628_v0  ;;  %vm2477_vm12 = vcmp.eq.f32.partialorder %v2476_v51, 8.507059e+37  ;;  %v2687_v63 = vsub.f32 %v2685_v40, %v2686_v11  ;;  %v5648_v37 = vpop.f32.mrf.mxu2  ;;  %v5650_v29 = vpop.f32.mrf.mxu3 }
 0x478   :  { %v2695_v1 = vsub.f32 %v2693_v43, %v2694_v28 }
 0x479   :  { %v3623_v38 = vpop.eup %3622  ;;  %v2688_v32 = vand.u32 4294901760, %v2687_v63 }
 0x47a   :  { %v2468_v18 = vmul.f32 %v3623_v38, %v2325_v10  ;;  %vm2473_vm11 = vweird.f32 %v3623_v38  ;;  %v2696_v35 = vand.u32 4294901760, %v2695_v1 }
 0x47b   :  { %vm2474_vm4 = vmor %vm2472_vm15, %vm2473_vm11 }
 0x47c   :  { %v2469_v36 = vsub.f32 1.0, %v2468_v18 }
 0x47e   :  { %v2470_v19 = vmul.f32 %v3623_v38, %v2469_v36 }
 0x47f   :  { %v5652_v10 = vpop.f32.mrf.mxu2  ;;  %v5654_v8 = vpop.f32.mrf.mxu3 }
 0x480   :  { %v2471_v12 = vadd.f32 %v3623_v38, %v2470_v19 }
 0x482   :  { %v2475_v26 = vsel %vm2474_vm4, %v3623_v38, %v2471_v12 }
 0x483   :  { %v2480_v31 = vsel %vm2477_vm12, %v2479_v30, %v2475_v26 }
 0x484   :  { %v2481_v44 = vmul.f32 %v2480_v31, %v5495_v7 }
 0x486   :  { %v5633_v45 = vand.u32 4294901760, %v2481_v44 }
 0x487   :  { %v5656_v47 = vpop.f32.mrf.mxu2 }
 0x488   :  { %2866 = vmatmul.f32.gmra.mxu3 %v5633_v45  ;;  %v2677_v33 = vsub.f32 %v2481_v44, %v5633_v45 }
 0x48a   :  { %2989 = vmatmul.f32.gmra.mxu0 %v2677_v33  ;;  %v2678_v46 = vand.u32 4294901760, %v2677_v33 }
 0x48c   :  { %3112 = vmatmul.f32.gmra.mxu1 %v2678_v46  ;;  %v2679_v41 = vsub.f32 %v2677_v33, %v2678_v46 }
 0x48e   :  { %v2680_v7 = vand.u32 4294901760, %v2679_v41 }
 0x490   :  { %2681 = vmatmul.f32.gmra.mxu2 %v2680_v7  ;;  %2870 = vmatmul.f32.gmra.mxu3 %v5635_v24 }
 0x492   :  { %2994 = vmatmul.f32.gmra.mxu0 %v2685_v40 }
 0x494   :  { %3118 = vmatmul.f32.gmra.mxu1 %v2686_v11 }
 0x498   :  { %2689 = vmatmul.f32.gmra.mxu2 %v2688_v32  ;;  %2874 = vmatmul.f32.gmra.mxu3 %v5641_v58 }
 0x49a   :  { %2999 = vmatmul.f32.gmra.mxu0 %v2693_v43 }
 0x49c   :  { %3124 = vmatmul.f32.gmra.mxu1 %v2694_v28 }
 0x4a0   :  { %2697 = vmatmul.f32.gmra.mxu2 %v2696_v35 }
 0x4a3   :  { %v2293_v42 = vpop.xlane.xlu0 %2292 }
 0x4a4   :  { %vm2312_vm6 = vcmp.gt.f32.partialorder %v2293_v42, 0.0 }
 0x4a5   :  { %v2328_v5 = vsel %vm2312_vm6, %v2293_v42, 1.0 }
 0x4a6   :  { %3624 = vrcp.f32 %v2328_v5  ;;  %v2523_v21 = vand.u32 2147483648, %v2328_v5  ;;  %v2521_v18 = vand.u32 2147483647, %v2328_v5  ;;  %vm2517_vm2 = vweird.f32 %v2328_v5 }
 0x4a8   :  { %v2524_v36 = vor.u32 1.1754944e-38, %v2523_v21  ;;  %vm2522_vm5 = vcmp.eq.f32.partialorder %v2521_v18, 8.507059e+37 }
 0x4ab   :  { %v2295_v39 = vpop.xlane.xlu1 %2294  ;;  %v2299_v42 = vpop.xlane.xlu0 %2298 }
 0x4ac   :  { %v3625_v55 = vpop.eup %3624  ;;  %vm2313_vm8 = vcmp.gt.f32.partialorder %v2295_v39, 0.0  ;;  %vm2315_vm15 = vcmp.gt.f32.partialorder %v2299_v42, 0.0 }
 0x4ad   :  { %v2513_v2 = vmul.f32 %v3625_v55, %v2328_v5  ;;  %v2329_v60 = vsel %vm2313_vm8, %v2295_v39, 1.0  ;;  %vm2518_vm1 = vweird.f32 %v3625_v55  ;;  %v2331_v5 = vsel %vm2315_vm15, %v2299_v42, 1.0 }
 0x4ae   :  { %3626 = vrcp.f32 %v2329_v60  ;;  %vm2519_vm14 = vmor %vm2517_vm2, %vm2518_vm1  ;;  %v2538_v22 = vand.u32 2147483648, %v2329_v60  ;;  %v2536_v26 = vand.u32 2147483647, %v2329_v60  ;;  %vm2532_vm9 = vweird.f32 %v2329_v60 }
 0x4af   :  { %v2514_v38 = vsub.f32 1.0, %v2513_v2  ;;  %3628 = vrcp.f32 %v2331_v5  ;;  %vm2562_vm12 = vweird.f32 %v2331_v5 }
 0x4b0   :  { %v2539_v44 = vor.u32 1.1754944e-38, %v2538_v22  ;;  %vm2537_vm13 = vcmp.eq.f32.partialorder %v2536_v26, 8.507059e+37  ;;  %v2566_v22 = vand.u32 2147483647, %v2331_v5 }
 0x4b1   :  { %v2515_v25 = vmul.f32 %v3625_v55, %v2514_v38  ;;  %v6013_v38 = vld [vmem:[#allocation8_spill] sm:$0xff] }
 0x4b2   :  { %vm2567_vm10 = vcmp.eq.f32.partialorder %v2566_v22, 8.507059e+37 }
 0x4b3   :  { %v2516_v15 = vadd.f32 %v3625_v55, %v2515_v25 }
 0x4b4   :  { %v5658_v57 = vpop.f32.mrf.mxu3  ;;  %v3627_v17 = vpop.eup %3626 }
 0x4b5   :  { %v2520_v19 = vsel %vm2519_vm14, %v3625_v55, %v2516_v15  ;;  %v2528_v51 = vmul.f32 %v3627_v17, %v2329_v60  ;;  %vm2533_vm3 = vweird.f32 %v3627_v17  ;;  %v3629_v60 = vpop.eup %3628 }
 0x4b6   :  { %v2525_v4 = vsel %vm2522_vm5, %v2524_v36, %v2520_v19  ;;  %vm2534_vm11 = vmor %vm2532_vm9, %vm2533_vm3  ;;  %v2558_v15 = vmul.f32 %v3629_v60, %v2331_v5  ;;  %vm2563_vm4 = vweird.f32 %v3629_v60 }
 0x4b7   :  { %v2526_v13 = vmul.f32 %v2525_v4, %v5555_v16  ;;  %v2529_v12 = vsub.f32 1.0, %v2528_v51  ;;  %vm2564_vm7 = vmor %vm2562_vm12, %vm2563_vm4 }
 0x4b8   :  { %v2559_v36 = vsub.f32 1.0, %v2558_v15 }
 0x4b9   :  { %v5661_v30 = vand.u32 4294901760, %v2526_v13  ;;  %v2530_v53 = vmul.f32 %v3627_v17, %v2529_v12  ;;  %v2568_v12 = vand.u32 2147483648, %v2331_v5 }
 0x4ba   :  { %v2560_v51 = vmul.f32 %v3629_v60, %v2559_v36 }
 0x4bb   :  { %2878 = vmatmul.f32.gmra.mxu3 %v5661_v30  ;;  %v2701_v62 = vsub.f32 %v2526_v13, %v5661_v30  ;;  %v2531_v31 = vadd.f32 %v3627_v17, %v2530_v53 }
 0x4bc   :  { %v5665_v3 = vpop.f32.mrf.mxu2  ;;  %v5667_v48 = vpop.f32.mrf.mxu3  ;;  %v2561_v4 = vadd.f32 %v3629_v60, %v2560_v51 }
 0x4bd   :  { %3004 = vmatmul.f32.gmra.mxu0 %v2701_v62  ;;  %v2702_v6 = vand.u32 4294901760, %v2701_v62  ;;  %v2535_v16 = vsel %vm2534_vm11, %v3627_v17, %v2531_v31  ;;  %v2569_v31 = vor.u32 1.1754944e-38, %v2568_v12  ;;  %v6015_v12 = vld [vmem:[#allocation10_spill] sm:$0xff] }
 0x4be   :  { %v2540_v33 = vsel %vm2537_vm13, %v2539_v44, %v2535_v16  ;;  %v2565_v26 = vsel %vm2564_vm7, %v3629_v60, %v2561_v4 }
 0x4bf   :  { %3130 = vmatmul.f32.gmra.mxu1 %v2702_v6  ;;  %v2703_v46 = vsub.f32 %v2701_v62, %v2702_v6  ;;  %v2541_v40 = vmul.f32 %v2540_v33, %v5587_v52  ;;  %v2570_v33 = vsel %vm2567_vm10, %v2569_v31, %v2565_v26 }
 0x4c1   :  { %v2704_v61 = vand.u32 4294901760, %v2703_v46  ;;  %v5670_v41 = vand.u32 4294901760, %v2541_v40 }
 0x4c3   :  { %2705 = vmatmul.f32.gmra.mxu2 %v2704_v61  ;;  %2882 = vmatmul.f32.gmra.mxu3 %v5670_v41  ;;  %v2709_v11 = vsub.f32 %v2541_v40, %v5670_v41 }
 0x4c4   :  { %v5673_v7 = vpop.f32.mrf.mxu2  ;;  %v5676_v43 = vpop.f32.mrf.mxu3 }
 0x4c5   :  { %3009 = vmatmul.f32.gmra.mxu0 %v2709_v11  ;;  %v2710_v63 = vand.u32 4294901760, %v2709_v11 }
 0x4c7   :  { %3136 = vmatmul.f32.gmra.mxu1 %v2710_v63  ;;  %v2711_v32 = vsub.f32 %v2709_v11, %v2710_v63  ;;  %v2571_v11 = vmul.f32 %v2570_v33, %v5584_v20 }
 0x4c9   :  { %v2712_v28 = vand.u32 4294901760, %v2711_v32  ;;  %v5695_v42 = vand.u32 4294901760, %v2571_v11 }
 0x4cb   :  { %2713 = vmatmul.f32.gmra.mxu2 %v2712_v28  ;;  %v2725_v60 = vsub.f32 %v2571_v11, %v5695_v42  ;;  %v6019_v11 = vld [vmem:[#allocation13_spill] sm:$0xff] }
 0x4cc   :  { %v5678_v1 = vpop.f32.mrf.mxu2  ;;  %v5680_v52 = vpop.f32.mrf.mxu3 }
 0x4d4   :  { %v5682_v35 = vpop.f32.mrf.mxu2  ;;  %v5684_v39 = vpop.f32.mrf.mxu3 }
 0x4dc   :  { %v5686_v55 = vpop.f32.mrf.mxu2  ;;  %v2863_v25 = vpop.f32.mrf.mxu3 }
 0x4e4   :  { %v2674_v2 = vpop.f32.mrf.mxu2 }
 0x4e5   :  { %v2675_v21 = vadd.f32 %v2674_v2, %v6013_v38 }
 0x4e7   :  { %v5689_v18 = vadd.f32 %v2863_v25, %v2675_v21  ;;  %v2726_v25 = vand.u32 4294901760, %v2725_v60 }
 0x4e9   :  { %v2727_v20 = vsub.f32 %v2725_v60, %v2726_v25 }
 0x4ea   :  { %v2297_v17 = vpop.xlane.xlu2 %2296 }
 0x4eb   :  { %vm2314_vm0 = vcmp.gt.f32.partialorder %v2297_v17, 0.0 }
 0x4ec   :  { %v2330_v19 = vsel %vm2314_vm0, %v2297_v17, 1.0  ;;  %v6014_v17 = vld [vmem:[#allocation7_spill] sm:$0xff] }
 0x4ed   :  { %3630 = vrcp.f32 %v2330_v19  ;;  %v2553_v44 = vand.u32 2147483648, %v2330_v19  ;;  %v2551_v16 = vand.u32 2147483647, %v2330_v19  ;;  %vm2547_vm8 = vweird.f32 %v2330_v19 }
 0x4ef   :  { %v2554_v40 = vor.u32 1.1754944e-38, %v2553_v44  ;;  %vm2552_vm2 = vcmp.eq.f32.partialorder %v2551_v16, 8.507059e+37  ;;  %v6017_v16 = vld [vmem:[#allocation12_spill] sm:$0xff] }
 0x4f3   :  { %v3631_v13 = vpop.eup %3630 }
 0x4f4   :  { %v2543_v53 = vmul.f32 %v3631_v13, %v2330_v19  ;;  %vm2548_vm6 = vweird.f32 %v3631_v13 }
 0x4f5   :  { %vm2549_vm1 = vmor %vm2547_vm8, %vm2548_vm6 }
 0x4f6   :  { %v2544_v62 = vsub.f32 1.0, %v2543_v53 }
 0x4f8   :  { %v2545_v6 = vmul.f32 %v3631_v13, %v2544_v62  ;;  %v6016_v62 = vld [vmem:[#allocation9_spill] sm:$0xff] }
 0x4fa   :  { %v2546_v46 = vadd.f32 %v3631_v13, %v2545_v6 }
 0x4fc   :  { %v2550_v61 = vsel %vm2549_vm1, %v3631_v13, %v2546_v46 }
 0x4fd   :  { %v2555_v63 = vsel %vm2552_vm2, %v2554_v40, %v2550_v61 }
 0x4fe   :  { %v2556_v32 = vmul.f32 %v2555_v63, %v5628_v0  ;;  %v2728_v0 = vand.u32 4294901760, %v2727_v20  ;;  %v6022_v20 = vld [vmem:[#allocation24_spill] sm:$0xff] }
 0x500   :  { %v5693_v28 = vand.u32 4294901760, %v2556_v32 }
 0x502   :  { %2886 = vmatmul.f32.gmra.mxu3 %v5693_v28  ;;  %v2717_v5 = vsub.f32 %v2556_v32, %v5693_v28 }
 0x504   :  { %3014 = vmatmul.f32.gmra.mxu0 %v2717_v5  ;;  %v2718_v2 = vand.u32 4294901760, %v2717_v5 }
 0x506   :  { %3142 = vmatmul.f32.gmra.mxu1 %v2718_v2  ;;  %v2719_v38 = vsub.f32 %v2717_v5, %v2718_v2 }
 0x508   :  { %v2720_v21 = vand.u32 4294901760, %v2719_v38 }
 0x50a   :  { %2721 = vmatmul.f32.gmra.mxu2 %v2720_v21  ;;  %2890 = vmatmul.f32.gmra.mxu3 %v5695_v42 }
 0x50b   :  { %v2867_v15 = vpop.f32.mrf.mxu3 }
 0x50c   :  { %3019 = vmatmul.f32.gmra.mxu0 %v2725_v60 }
 0x50e   :  { %3148 = vmatmul.f32.gmra.mxu1 %v2726_v25 }
 0x512   :  { %2729 = vmatmul.f32.gmra.mxu2 %v2728_v0  ;;  %3314 = vmatmul.f32.vlgmr.msrb.gmra.mxu3 %v5466_v27  ;;  %v2619_v0 = vadd.f32 %v5652_v10, %v6022_v20 }
 0x513   :  { %v2682_v36 = vpop.f32.mrf.mxu2  ;;  %v2871_v4 = vpop.f32.mrf.mxu3 }
 0x514   :  { %v2683_v19 = vadd.f32 %v2682_v36, %v6014_v17 }
 0x516   :  { %v5703_v51 = vadd.f32 %v2867_v15, %v2683_v19 }
 0x51a   :  { %3217 = vmatmul.f32.vlgmr.msrb.gmra.mxu2 %v5466_v27  ;;  %3318 = vmatmul.f32.gmra.mxu3 %v5480_v23 }
 0x51b   :  { %v2690_v13 = vpop.f32.mrf.mxu2  ;;  %v2875_v44 = vpop.f32.mrf.mxu3 }
 0x51c   :  { %v2691_v22 = vadd.f32 %v2690_v13, %v6015_v12  ;;  %v6023_v12 = vld [vmem:[#allocation26_spill] sm:$0xff] }
 0x51e   :  { %v5708_v53 = vadd.f32 %v2871_v4, %v2691_v22  ;;  %v2627_v22 = vadd.f32 %v5656_v47, %v6023_v12  ;;  %v6026_v12 = vld [vmem:[#allocation31_spill] sm:$0xff] }
 0x522   :  { %3221 = vmatmul.f32.gmra.mxu2 %v5480_v23  ;;  %3322 = vmatmul.f32.gmra.mxu3 %v5484_v56 }
 0x523   :  { %v2698_v26 = vpop.f32.mrf.mxu2 }
 0x524   :  { %v2699_v31 = vadd.f32 %v2698_v26, %v6016_v62 }
 0x526   :  { %v5713_v6 = vadd.f32 %v2875_v44, %v2699_v31 }
 0x52a   :  { %3225 = vmatmul.f32.gmra.mxu2 %v5484_v56  ;;  %3326 = vmatmul.f32.gmra.mxu3 %v5559_v59 }
 0x532   :  { %3229 = vmatmul.f32.gmra.mxu2 %v5559_v59  ;;  %3330 = vmatmul.f32.gmra.mxu3 %v5561_v50  ;;  %v6018_v59 = vld [vmem:[#allocation11_spill] sm:$0xff] }
 0x53a   :  { %3233 = vmatmul.f32.gmra.mxu2 %v5561_v50  ;;  %3334 = vmatmul.f32.gmra.mxu3 %v5589_v14 }
 0x53e   :  { %v2879_v23 = vpop.f32.mrf.mxu3 }
 0x542   :  { %3237 = vmatmul.f32.gmra.mxu2 %v5589_v14  ;;  %3338 = vmatmul.f32.gmra.mxu3 %v5603_v49  ;;  %v2945_v14 = vpop.f32.mrf.mxu0 }
 0x546   :  { %v2706_v27 = vpop.f32.mrf.mxu2  ;;  %v2883_v50 = vpop.f32.mrf.mxu3 }
 0x547   :  { %v2707_v33 = vadd.f32 %v2706_v27, %v6017_v16 }
 0x549   :  { %v5724_v46 = vadd.f32 %v2879_v23, %v2707_v33 }
 0x54a   :  { %3241 = vmatmul.f32.gmra.mxu2 %v5603_v49  ;;  %3342 = vmatmul.f32.gmra.mxu3 %v5614_v54  ;;  %v3059_v49 = vpop.f32.mrf.mxu1 }
 0x54e   :  { %v2714_v56 = vpop.f32.mrf.mxu2 }
 0x54f   :  { %v2715_v40 = vadd.f32 %v2714_v56, %v6018_v59 }
 0x551   :  { %v5729_v61 = vadd.f32 %v2883_v50, %v2715_v40  ;;  %v6024_v40 = vld [vmem:[#allocation28_spill] sm:$0xff] }
 0x552   :  { %3245 = vmatmul.f32.gmra.mxu2 %v5614_v54  ;;  %3346 = vmatmul.f32.gmra.mxu3 %v5619_v9  ;;  %v2635_v50 = vadd.f32 %v5665_v3, %v6024_v40 }
 0x55a   :  { %3249 = vmatmul.f32.gmra.mxu2 %v5619_v9  ;;  %3350 = vmatmul.f32.gmra.mxu3 %v5633_v45  ;;  %v2950_v9 = vpop.f32.mrf.mxu0 }
 0x562   :  { %3253 = vmatmul.f32.gmra.mxu2 %v5633_v45  ;;  %3354 = vmatmul.f32.gmra.mxu3 %v5635_v24  ;;  %v2955_v2 = vpop.f32.mrf.mxu0 }
 0x56a   :  { %3257 = vmatmul.f32.gmra.mxu2 %v5635_v24  ;;  %3358 = vmatmul.f32.gmra.mxu3 %v5641_v58  ;;  %v2960_v17 = vpop.f32.mrf.mxu0 }
 0x572   :  { %3261 = vmatmul.f32.gmra.mxu2 %v5641_v58  ;;  %3362 = vmatmul.f32.gmra.mxu3 %v5661_v30  ;;  %v3065_v58 = vpop.f32.mrf.mxu1  ;;  %v2965_v33 = vpop.f32.mrf.mxu0 }
 0x57a   :  { %3265 = vmatmul.f32.gmra.mxu2 %v5661_v30  ;;  %3366 = vmatmul.f32.gmra.mxu3 %v5670_v41  ;;  %v6020_v30 = vld [vmem:[#allocation22_spill] sm:$0xff]  ;;  %v3071_v25 = vpop.f32.mrf.mxu1  ;;  %v2970_v3 = vpop.f32.mrf.mxu0 }
 0x57b   :  { %v2611_v32 = vadd.f32 %v5648_v37, %v6020_v30  ;;  %v2836_v37 = vadd.f32 %v5650_v29, %v2619_v0  ;;  %v2840_v29 = vadd.f32 %v5654_v8, %v2627_v22  ;;  %v2651_v22 = vadd.f32 %v5678_v1, %v6026_v12 }
 0x57d   :  { %v2951_v62 = vadd.f32 %v2950_v9, %v2836_v37  ;;  %v2956_v47 = vadd.f32 %v2955_v2, %v2840_v29  ;;  %v2844_v9 = vadd.f32 %v5658_v57, %v2635_v50 }
 0x57f   :  { %v3066_v27 = vadd.f32 %v3065_v58, %v2951_v62  ;;  %v3072_v8 = vadd.f32 %v3071_v25, %v2956_v47 }
 0x582   :  { %3269 = vmatmul.f32.gmra.mxu2 %v5670_v41  ;;  %3370 = vmatmul.f32.gmra.mxu3 %v5693_v28  ;;  %v2832_v41 = vadd.f32 %v5645_v34, %v2611_v32  ;;  %v5763_v34 = vld [vmem:[%s5815_s5] ss:$0 sm:$0xff]  ;;  %v3077_v26 = vpop.f32.mrf.mxu1  ;;  %v6025_v32 = vld [vmem:[#allocation30_spill] sm:$0xff]  ;;  %v2975_v62 = vpop.f32.mrf.mxu0  ;;  %s3691_s5 = smov [#allocation2]  }
 0x583   :  { %s3514_s29 = sshll.u32 %s3691_s5, 4  ;;  %s3515_s29 = int_to_ptr.vmem [resolvable:$true] %s3514_s29 }
 0x584   :  { %v2946_v36 = vadd.f32 %v2945_v14, %v2832_v41  ;;  %v2643_v41 = vadd.f32 %v5673_v7, %v6025_v32 }
 0x585   :  { %v2887_v54 = vpop.f32.mrf.mxu3 }
 0x586   :  { %v3060_v19 = vadd.f32 %v3059_v49, %v2946_v36 }
 0x58a   :  { %3273 = vmatmul.f32.gmra.mxu2 %v5693_v28  ;;  %3374 = vmatmul.f32.gmra.mxu3 %v5695_v42  ;;  %v6021_v28 = vld [vmem:[#allocation15_spill] sm:$0xff]  ;;  %v3083_v49 = vpop.f32.mrf.mxu1 }
 0x58d   :  { %v2722_v45 = vpop.f32.mrf.mxu2  ;;  %v2891_v24 = vpop.f32.mrf.mxu3 }
 0x58e   :  { %v2723_v63 = vadd.f32 %v2722_v45, %v6019_v11 }
 0x590   :  { %v5750_v5 = vadd.f32 %v2887_v54, %v2723_v63 }
 0x592   :  { %3277 = vmatmul.f32.gmra.mxu2 %v5695_v42  ;;  %v3089_v25 = vpop.f32.mrf.mxu1 }
 0x595   :  { %v2730_v60 = vpop.f32.mrf.mxu2  ;;  %v3315_v38 = vpop.f32.mrf.mxu3 }
 0x596   :  { %v2731_v21 = vadd.f32 %v2730_v60, %v6021_v28 }
 0x598   :  { %v5757_v15 = vadd.f32 %v2891_v24, %v2731_v21  ;;  %v2848_v21 = vadd.f32 %v5667_v48, %v2643_v41  ;;  %v6028_v41 = vld [vmem:[#allocation5_spill] sm:$0xff] }
 0x59d   :  { %v3218_v4 = vpop.f32.mrf.mxu2  ;;  %v3319_v42 = vpop.f32.mrf.mxu3 }
 0x59e   :  { %v3219_v13 = vadd.f32 %v3218_v4, %v3060_v19 }
 0x5a0   :  { %v3316_v10 = vadd.f32 %v3315_v38, %v3219_v13  ;;  %v2961_v38 = vadd.f32 %v2960_v17, %v2844_v9  ;;  %v2966_v13 = vadd.f32 %v2965_v33, %v2848_v21 }
 0x5a2   :  { %v3382_v31 = vadd.f32 %v5763_v34, %v3316_v10  ;;  %v3078_v0 = vadd.f32 %v3077_v26, %v2961_v38  ;;  %v2852_v26 = vadd.f32 %v5676_v43, %v2651_v22  ;;  %v3084_v29 = vadd.f32 %v3083_v49, %v2966_v13 }
 0x5a4   :  { %v3414_v44 = vmin.f32 %v3382_v31, 0.0  ;;  %vm3398_vm14 = vcmp.gt.f32.partialorder %v3382_v31, 0.0 }
 0x5a5   :  { %v3222_v23 = vpop.f32.mrf.mxu2  ;;  %v3323_v16 = vpop.f32.mrf.mxu3 }
 0x5a6   :  { %v3430_v56 = vmul.f32 1.442695, %v3414_v44  ;;  %v3223_v59 = vadd.f32 %v3222_v23, %v3066_v27 }
 0x5a8   :  { %3632 = vpow2.f32 %v3430_v56  ;;  %v3320_v14 = vadd.f32 %v3319_v42, %v3223_v59  ;;  %v6027_v59 = vld [vmem:[#allocation6_spill] sm:$0xff] }
 0x5a9   :  { %v2659_v1 = vadd.f32 %v5682_v35, %v6027_v59 }
 0x5aa   :  { %v3383_v54 = vadd.f32 %v5763_v34, %v3320_v14  ;;  %v2971_v14 = vadd.f32 %v2970_v3, %v2852_v26 }
 0x5ab   :  { %v2856_v49 = vadd.f32 %v5680_v52, %v2659_v1 }
 0x5ac   :  { %v3415_v45 = vmin.f32 %v3383_v54, 0.0  ;;  %vm3399_vm5 = vcmp.gt.f32.partialorder %v3383_v54, 0.0 }
 0x5ad   :  { %v3226_v24 = vpop.f32.mrf.mxu2  ;;  %v3327_v58 = vpop.f32.mrf.mxu3 }
 0x5ae   :  { %v3633_v11 = vpop.eup %3632  ;;  %v3432_v63 = vmul.f32 1.442695, %v3415_v45  ;;  %v3227_v30 = vadd.f32 %v3226_v24, %v3072_v8  ;;  %v3090_v45 = vadd.f32 %v3089_v25, %v2971_v14 }
 0x5af   :  { %v3528_v60 = vadd.f32 -1.0, %v3633_v11 }
 0x5b0   :  { %3634 = vpow2.f32 %v3432_v63  ;;  %v3324_v2 = vadd.f32 %v3323_v16, %v3227_v30  ;;  %v3095_v16 = vpop.f32.mrf.mxu1  ;;  %v2976_v30 = vadd.f32 %v2975_v62, %v2856_v49 }
 0x5b1   :  { %v3478_v28 = vsel %vm3398_vm14, %v3382_v31, %v3528_v60  ;;  %v2667_v60 = vadd.f32 %v5686_v55, %v6028_v41 }
 0x5b2   :  { %3494 = vst [vmem:[#allocation2] sm:$0xff] %v3478_v28  ;;  %v3384_v57 = vadd.f32 %v5763_v34, %v3324_v2 }
 0x5b3   :  { %v2860_v38 = vadd.f32 %v5684_v39, %v2667_v60 }
 0x5b4   :  { %v3416_v20 = vmin.f32 %v3384_v57, 0.0  ;;  %vm3400_vm3 = vcmp.gt.f32.partialorder %v3384_v57, 0.0 }
 0x5b5   :  { %v3230_v36 = vpop.f32.mrf.mxu2  ;;  %v3331_v37 = vpop.f32.mrf.mxu3 }
 0x5b6   :  { %v3635_v19 = vpop.eup %3634  ;;  %v3434_v4 = vmul.f32 1.442695, %v3416_v20  ;;  %v3231_v7 = vadd.f32 %v3230_v36, %v3078_v0 }
 0x5b7   :  { %v3529_v42 = vadd.f32 -1.0, %v3635_v19 }
 0x5b8   :  { %3636 = vpow2.f32 %v3434_v4  ;;  %v3328_v17 = vadd.f32 %v3327_v58, %v3231_v7  ;;  %v3101_v32 = vpop.f32.mrf.mxu1 }
 0x5b9   :  { %v3479_v10 = vsel %vm3399_vm5, %v3383_v54, %v3529_v42  ;;  %v2980_v54 = vpop.f32.mrf.mxu0 }
 0x5ba   :  { %3495 = vst [vmem:[#allocation2 + $0x8] sm:$0xff] %v3479_v10  ;;  %v3385_v48 = vadd.f32 %v5763_v34, %v3328_v17  ;;  %v2981_v4 = vadd.f32 %v2980_v54, %v2860_v38 }
 0x5bc   :  { %v3417_v31 = vmin.f32 %v3385_v48, 0.0  ;;  %vm3401_vm9 = vcmp.gt.f32.partialorder %v3385_v48, 0.0  ;;  %v3102_v39 = vadd.f32 %v3101_v32, %v2981_v4 }
 0x5bd   :  { %v3234_v44 = vpop.f32.mrf.mxu2  ;;  %v3335_v27 = vpop.f32.mrf.mxu3 }
 0x5be   :  { %v3637_v23 = vpop.eup %3636  ;;  %v3436_v33 = vmul.f32 1.442695, %v3417_v31  ;;  %v3235_v56 = vadd.f32 %v3234_v44, %v3084_v29 }
 0x5bf   :  { %v3530_v40 = vadd.f32 -1.0, %v3637_v23 }
 0x5c0   :  { %3638 = vpow2.f32 %v3436_v33  ;;  %v3332_v50 = vadd.f32 %v3331_v37, %v3235_v56  ;;  %v3107_v42 = vpop.f32.mrf.mxu1 }
 0x5c1   :  { %v3480_v47 = vsel %vm3400_vm3, %v3384_v57, %v3530_v40  ;;  %v3096_v57 = vadd.f32 %v3095_v16, %v2976_v30  ;;  %v2985_v37 = vpop.f32.mrf.mxu0 }
 0x5c2   :  { %3496 = vst [vmem:[#allocation2 + $0x10] sm:$0xff] %v3480_v47  ;;  %v3386_v43 = vadd.f32 %v5763_v34, %v3332_v50  ;;  %v2986_v44 = vadd.f32 %v2985_v37, %v5689_v18 }
 0x5c4   :  { %v3418_v9 = vmin.f32 %v3386_v43, 0.0  ;;  %vm3402_vm11 = vcmp.gt.f32.partialorder %v3386_v43, 0.0  ;;  %v3108_v56 = vadd.f32 %v3107_v42, %v2986_v44 }
 0x5c5   :  { %v3238_v8 = vpop.f32.mrf.mxu2  ;;  %v3339_v24 = vpop.f32.mrf.mxu3 }
 0x5c6   :  { %v3639_v58 = vpop.eup %3638  ;;  %v3438_v11 = vmul.f32 1.442695, %v3418_v9  ;;  %v3239_v63 = vadd.f32 %v3238_v8, %v3090_v45 }
 0x5c7   :  { %v3531_v35 = vadd.f32 -1.0, %v3639_v58 }
 0x5c8   :  { %3640 = vpow2.f32 %v3438_v11  ;;  %v3336_v3 = vadd.f32 %v3335_v27, %v3239_v63  ;;  %v3113_v23 = vpop.f32.mrf.mxu1 }
 0x5c9   :  { %v3481_v2 = vsel %vm3401_vm9, %v3385_v48, %v3531_v35  ;;  %v2990_v26 = vpop.f32.mrf.mxu0 }
 0x5ca   :  { %3497 = vst [vmem:[#allocation2 + $0x18] sm:$0xff] %v3481_v2  ;;  %v3387_v52 = vadd.f32 %v5763_v34, %v3336_v3  ;;  %v2991_v49 = vadd.f32 %v2990_v26, %v5703_v51 }
 0x5cc   :  { %v3419_v28 = vmin.f32 %v3387_v52, 0.0  ;;  %vm3403_vm13 = vcmp.gt.f32.partialorder %v3387_v52, 0.0 }
 0x5cd   :  { %v3242_v21 = vpop.f32.mrf.mxu2  ;;  %v3343_v25 = vpop.f32.mrf.mxu3 }
 0x5ce   :  { %v3641_v20 = vpop.eup %3640  ;;  %v3440_v0 = vmul.f32 1.442695, %v3419_v28  ;;  %v3243_v36 = vadd.f32 %v3242_v21, %v3096_v57 }
 0x5cf   :  { %v3532_v19 = vadd.f32 -1.0, %v3641_v20 }
 0x5d0   :  { %3642 = vpow2.f32 %v3440_v0  ;;  %v3340_v55 = vadd.f32 %v3339_v24, %v3243_v36  ;;  %v3119_v45 = vpop.f32.mrf.mxu1  ;;  %v3114_v24 = vadd.f32 %v3113_v23, %v2991_v49 }
 0x5d1   :  { %v3482_v7 = vsel %vm3402_vm11, %v3386_v43, %v3532_v19  ;;  %v2995_v54 = vpop.f32.mrf.mxu0 }
 0x5d2   :  { %3498 = vst [vmem:[#allocation2 + $0x20] sm:$0xff] %v3482_v7  ;;  %v3388_v13 = vadd.f32 %v5763_v34, %v3340_v55  ;;  %v2996_v60 = vadd.f32 %v2995_v54, %v5708_v53 }
 0x5d4   :  { %v3420_v12 = vmin.f32 %v3388_v13, 0.0  ;;  %vm3404_vm15 = vcmp.gt.f32.partialorder %v3388_v13, 0.0  ;;  %v3120_v38 = vadd.f32 %v3119_v45, %v2996_v60 }
 0x5d5   :  { %v3246_v22 = vpop.f32.mrf.mxu2  ;;  %v3347_v17 = vpop.f32.mrf.mxu3 }
 0x5d6   :  { %v3643_v10 = vpop.eup %3642  ;;  %v3442_v62 = vmul.f32 1.442695, %v3420_v12  ;;  %v3247_v48 = vadd.f32 %v3246_v22, %v3102_v39 }
 0x5d7   :  { %v3533_v31 = vadd.f32 -1.0, %v3643_v10 }
 0x5d8   :  { %3644 = vpow2.f32 %v3442_v62  ;;  %v3344_v29 = vadd.f32 %v3343_v25, %v3247_v48  ;;  %v3125_v20 = vpop.f32.mrf.mxu1 }
 0x5d9   :  { %v3483_v27 = vsel %vm3403_vm13, %v3387_v52, %v3533_v31  ;;  %v3000_v2 = vpop.f32.mrf.mxu0 }
 0x5da   :  { %3499 = vst [vmem:[#allocation2 + $0x28] sm:$0xff] %v3483_v27  ;;  %v3389_v16 = vadd.f32 %v5763_v34, %v3344_v29  ;;  %v3001_v19 = vadd.f32 %v3000_v2, %v5713_v6 }
 0x5dc   :  { %v3421_v33 = vmin.f32 %v3389_v16, 0.0  ;;  %vm3405_vm0 = vcmp.gt.f32.partialorder %v3389_v16, 0.0  ;;  %v3126_v42 = vadd.f32 %v3125_v20, %v3001_v19 }
 0x5dd   :  { %v3250_v59 = vpop.f32.mrf.mxu2  ;;  %v3351_v1 = vpop.f32.mrf.mxu3 }
 0x5de   :  { %v3645_v40 = vpop.eup %3644  ;;  %v3444_v50 = vmul.f32 1.442695, %v3421_v33  ;;  %v3251_v14 = vadd.f32 %v3250_v59, %v3108_v56 }
 0x5df   :  { %v3534_v47 = vadd.f32 -1.0, %v3645_v40 }
 0x5e0   :  { %3646 = vpow2.f32 %v3444_v50  ;;  %v3348_v43 = vadd.f32 %v3347_v17, %v3251_v14  ;;  %v3131_v17 = vpop.f32.mrf.mxu1 }
 0x5e1   :  { %v3484_v18 = vsel %vm3404_vm15, %v3388_v13, %v3534_v47  ;;  %v3005_v4 = vpop.f32.mrf.mxu0 }
 0x5e2   :  { %3500 = vst [vmem:[#allocation2 + $0x30] sm:$0xff] %v3484_v18  ;;  %v3390_v9 = vadd.f32 %v5763_v34, %v3348_v43  ;;  %v3006_v48 = vadd.f32 %v3005_v4, %v5724_v46 }
 0x5e4   :  { %v3422_v8 = vmin.f32 %v3390_v9, 0.0  ;;  %vm3406_vm4 = vcmp.gt.f32.partialorder %v3390_v9, 0.0  ;;  %v3132_v44 = vadd.f32 %v3131_v17, %v3006_v48 }
 0x5e5   :  { %v3254_v58 = vpop.f32.mrf.mxu2  ;;  %v3355_v11 = vpop.f32.mrf.mxu3 }
 0x5e6   :  { %v3647_v63 = vpop.eup %3646  ;;  %v3446_v35 = vmul.f32 1.442695, %v3422_v8  ;;  %v3255_v30 = vadd.f32 %v3254_v58, %v3114_v24 }
 0x5e7   :  { %v3535_v32 = vadd.f32 -1.0, %v3647_v63 }
 0x5e8   :  { %3648 = vpow2.f32 %v3446_v35  ;;  %v3352_v41 = vadd.f32 %v3351_v1, %v3255_v30  ;;  %v3137_v50 = vpop.f32.mrf.mxu1 }
 0x5e9   :  { %v3485_v51 = vsel %vm3405_vm0, %v3389_v16, %v3535_v32  ;;  %v3010_v27 = vpop.f32.mrf.mxu0 }
 0x5ea   :  { %3501 = vst [vmem:[#allocation2 + $0x38] sm:$0xff] %v3485_v51  ;;  %v3391_v3 = vadd.f32 %v5763_v34, %v3352_v41  ;;  %v3011_v40 = vadd.f32 %v3010_v27, %v5729_v61 }
 0x5ec   :  { %v3423_v52 = vmin.f32 %v3391_v3, 0.0  ;;  %vm3407_vm12 = vcmp.gt.f32.partialorder %v3391_v3, 0.0  ;;  %v3138_v49 = vadd.f32 %v3137_v50, %v3011_v40 }
 0x5ed   :  { %v3258_v28 = vpop.f32.mrf.mxu2  ;;  %v3359_v36 = vpop.f32.mrf.mxu3 }
 0x5ee   :  { %v3649_v57 = vpop.eup %3648  ;;  %v3448_v21 = vmul.f32 1.442695, %v3423_v52  ;;  %v3259_v25 = vadd.f32 %v3258_v28, %v3120_v38 }
 0x5ef   :  { %v3536_v0 = vadd.f32 -1.0, %v3649_v57 }
 0x5f0   :  { %3650 = vpow2.f32 %v3448_v21  ;;  %v3356_v37 = vadd.f32 %v3355_v11, %v3259_v25  ;;  %v3143_v61 = vpop.f32.mrf.mxu1 }
 0x5f1   :  { %v3486_v53 = vsel %vm3406_vm4, %v3390_v9, %v3536_v0  ;;  %v3015_v54 = vpop.f32.mrf.mxu0 }
 0x5f2   :  { %3502 = vst [vmem:[#allocation2 + $0x40] sm:$0xff] %v3486_v53  ;;  %v3392_v55 = vadd.f32 %v5763_v34, %v3356_v37  ;;  %v3016_v11 = vadd.f32 %v3015_v54, %v5750_v5 }
 0x5f4   :  { %v3424_v7 = vmin.f32 %v3392_v55, 0.0  ;;  %vm3408_vm7 = vcmp.gt.f32.partialorder %v3392_v55, 0.0  ;;  %v3144_v32 = vadd.f32 %v3143_v61, %v3016_v11 }
 0x5f5   :  { %v3262_v13 = vpop.f32.mrf.mxu2  ;;  %v3363_v6 = vpop.f32.mrf.mxu3 }
 0x5f6   :  { %v3651_v12 = vpop.eup %3650  ;;  %v3450_v39 = vmul.f32 1.442695, %v3424_v7  ;;  %v3263_v22 = vadd.f32 %v3262_v13, %v3126_v42 }
 0x5f7   :  { %v3537_v10 = vadd.f32 -1.0, %v3651_v12 }
 0x5f8   :  { %3652 = vpow2.f32 %v3450_v39  ;;  %v3360_v62 = vadd.f32 %v3359_v36, %v3263_v22  ;;  %v3149_v25 = vpop.f32.mrf.mxu1 }
 0x5f9   :  { %v3487_v26 = vsel %vm3407_vm12, %v3391_v3, %v3537_v10  ;;  %v3020_v52 = vpop.f32.mrf.mxu0 }
 0x5fa   :  { %3503 = vst [vmem:[#allocation2 + $0x48] sm:$0xff] %v3487_v26  ;;  %v3393_v31 = vadd.f32 %v5763_v34, %v3360_v62  ;;  %v3021_v57 = vadd.f32 %v3020_v52, %v5757_v15 }
 0x5fc   :  { %v3425_v29 = vmin.f32 %v3393_v31, 0.0  ;;  %vm3409_vm10 = vcmp.gt.f32.partialorder %v3393_v31, 0.0  ;;  %v3150_v0 = vadd.f32 %v3149_v25, %v3021_v57 }
 0x5fd   :  { %v3266_v23 = vpop.f32.mrf.mxu2  ;;  %v3367_v47 = vpop.f32.mrf.mxu3 }
 0x5fe   :  { %v3653_v16 = vpop.eup %3652  ;;  %v3452_v33 = vmul.f32 1.442695, %v3425_v29  ;;  %v3267_v56 = vadd.f32 %v3266_v23, %v3132_v44 }
 0x5ff   :  { %v3538_v59 = vadd.f32 -1.0, %v3653_v16 }
 0x600   :  { %3654 = vpow2.f32 %v3452_v33  ;;  %v3364_v1 = vadd.f32 %v3363_v6, %v3267_v56 }
 0x601   :  { %v3488_v46 = vsel %vm3408_vm7, %v3392_v55, %v3538_v59 }
 0x602   :  { %3504 = vst [vmem:[#allocation2 + $0x50] sm:$0xff] %v3488_v46  ;;  %v3394_v14 = vadd.f32 %v5763_v34, %v3364_v1 }
 0x604   :  { %v3426_v43 = vmin.f32 %v3394_v14, 0.0  ;;  %vm3410_vm6 = vcmp.gt.f32.partialorder %v3394_v14, 0.0 }
 0x605   :  { %v3270_v18 = vpop.f32.mrf.mxu2  ;;  %v3371_v41 = vpop.f32.mrf.mxu3 }
 0x606   :  { %v3655_v9 = vpop.eup %3654  ;;  %v3454_v45 = vmul.f32 1.442695, %v3426_v43  ;;  %v3271_v8 = vadd.f32 %v3270_v18, %v3138_v49 }
 0x607   :  { %v3539_v24 = vadd.f32 -1.0, %v3655_v9 }
 0x608   :  { %3656 = vpow2.f32 %v3454_v45  ;;  %v3368_v58 = vadd.f32 %v3367_v47, %v3271_v8 }
 0x609   :  { %v3489_v63 = vsel %vm3409_vm10, %v3393_v31, %v3539_v24 }
 0x60a   :  { %3505 = vst [vmem:[#allocation2 + $0x58] sm:$0xff] %v3489_v63  ;;  %v3395_v35 = vadd.f32 %v5763_v34, %v3368_v58 }
 0x60c   :  { %v3427_v30 = vmin.f32 %v3395_v35, 0.0  ;;  %vm3411_vm8 = vcmp.gt.f32.partialorder %v3395_v35, 0.0 }
 0x60d   :  { %v3274_v60 = vpop.f32.mrf.mxu2  ;;  %v3375_v4 = vpop.f32.mrf.mxu3 }
 0x60e   :  { %v3657_v51 = vpop.eup %3656  ;;  %v3456_v3 = vmul.f32 1.442695, %v3427_v30  ;;  %v3275_v2 = vadd.f32 %v3274_v60, %v3144_v32 }
 0x60f   :  { %v3540_v38 = vadd.f32 -1.0, %v3657_v51 }
 0x610   :  { %3658 = vpow2.f32 %v3456_v3  ;;  %v3372_v28 = vadd.f32 %v3371_v41, %v3275_v2 }
 0x611   :  { %v3490_v5 = vsel %vm3410_vm6, %v3394_v14, %v3540_v38 }
 0x612   :  { %3506 = vst [vmem:[#allocation2 + $0x60] sm:$0xff] %v3490_v5  ;;  %v3396_v21 = vadd.f32 %v5763_v34, %v3372_v28 }
 0x614   :  { %v3428_v20 = vmin.f32 %v3396_v21, 0.0  ;;  %vm3412_vm1 = vcmp.gt.f32.partialorder %v3396_v21, 0.0 }
 0x615   :  { %v3278_v36 = vpop.f32.mrf.mxu2 }
 0x616   :  { %v3659_v37 = vpop.eup %3658  ;;  %v3458_v19 = vmul.f32 1.442695, %v3428_v20  ;;  %v3279_v53 = vadd.f32 %v3278_v36, %v3150_v0 }
 0x617   :  { %v3541_v55 = vadd.f32 -1.0, %v3659_v37 }
 0x618   :  { %3660 = vpow2.f32 %v3458_v19  ;;  %v3376_v7 = vadd.f32 %v3375_v4, %v3279_v53 }
 0x619   :  { %v3491_v42 = vsel %vm3411_vm8, %v3395_v35, %v3541_v55 }
 0x61a   :  { %3507 = vst [vmem:[#allocation2 + $0x68] sm:$0xff] %v3491_v42  ;;  %v3397_v15 = vadd.f32 %v5763_v34, %v3376_v7 }
 0x61c   :  { %v3429_v13 = vmin.f32 %v3397_v15, 0.0  ;;  %vm3413_vm2 = vcmp.gt.f32.partialorder %v3397_v15, 0.0 }
 0x61e   :  { %v3661_v12 = vpop.eup %3660  ;;  %v3460_v39 = vmul.f32 1.442695, %v3429_v13 }
 0x61f   :  { %v3542_v22 = vadd.f32 -1.0, %v3661_v12 }
 0x620   :  { %3662 = vpow2.f32 %v3460_v39 }
 0x621   :  { %v3492_v17 = vsel %vm3412_vm1, %v3396_v21, %v3542_v22 }
 0x622   :  { %3508 = vst [vmem:[#allocation2 + $0x70] sm:$0xff] %v3492_v17 }
 0x626   :  { %v3663_v10 = vpop.eup %3662 }
 0x627   :  { %v3543_v62 = vadd.f32 -1.0, %v3663_v10 }
 0x629   :  { %v3493_v34 = vsel %vm3413_vm2, %v3397_v15, %v3543_v62 }
 0x62a   :  { %3509 = vst [vmem:[#allocation2 + $0x78] sm:$0xff] %v3493_v34 }
 0x62b   :  { %3522 = dma.vmem_to_hbm [thread:$0]  %s3515_s29, 2048, %s3517_s8, [#allocation3], %s3692_s9, %s3692_s9, %s3693_s10  }
 0x62c   :  { %3688 = dma.done.wait [#allocation3], 2048  }
 0x62d   :  { %3689 = vsyncadd [#allocation3], 4294965248 }
 0x62e   :  { %3527 = vsyncpa [#allocation3], 1 }

</bundles_post_ra>
